<compile_context>
chip_gen: v6e
topology: v6e:2x2x1
jax: 0.10.0
libtpu: 0.0.40
codegen_flags: <defaults>
</compile_context>

<pallas_src>
import jax
import jax.numpy as jnp
from jax.experimental import pallas as pl
from jax.experimental.pallas import tpu as pltpu


def _stonk_kernel(x_ref, w1_ref, w2_ref, c_ref, o_ref):
    """Single-step kernel (trivial grid): everything is VMEM-resident.

    x_ref  : (B, K)  flattened input, stored dtype (f32 or bf16), cast in-kernel
    w1_ref : (H, K)  first-layer weight, natural nn.Linear layout, lane-dense
    w2_ref : (1, H)  f32 second-layer weight, natural nn.Linear layout
    c_ref  : (1,)    f32 folded bias  c = b1 @ w2^T + b2   (SMEM scalar)
    o_ref  : (B, 1)  f32 sigmoid output
    """
    # Casts right after the DMA: no-ops if already bf16, free VPU work if f32.
    xb = x_ref[...].astype(jnp.bfloat16)
    wb = w1_ref[...].astype(jnp.bfloat16)

    # (B, K) . (H, K)^T on the MXU, bf16 operands, f32 accumulation.
    h = jax.lax.dot_general(
        xb,
        wb,
        dimension_numbers=(((1,), (1,)), ((), ())),
        preferred_element_type=jnp.float32,
    )  # (B, H) f32

    # Second layer N=1: VPU broadcast-mul + cross-lane sum (XLU), folded bias,
    # sigmoid on the EUP. All f32.
    logits = jnp.sum(h * w2_ref[...], axis=-1, keepdims=True) + c_ref[0]
    o_ref[...] = jax.nn.sigmoid(logits).astype(o_ref.dtype)


@jax.jit
def stonk_forward(x_nchw, w1, b1, w2, b2):
    """x_nchw: (B, C, H, W) with C*H*W == 25088. Returns squeezed sigmoid output.

    w1: (H, 25088)  -- nn.Linear(25088, size).weight layout (f32 or bf16)
    b1: (size,)     -- nn.Linear(25088, size).bias
    w2: (1, size)   -- nn.Linear(size, 1).weight layout
    b2: (1,)        -- nn.Linear(size, 1).bias
    """
    B = x_nchw.shape[0]
    H, K = w1.shape

    # nn.Flatten() flattens C,H,W row-major: metadata-only reshape, no cast.
    x_flat = x_nchw.reshape(B, K)
    w2_f = w2.astype(jnp.float32).reshape(1, H)

    # Fold both biases into one scalar (affine pre-sigmoid):
    #   logits = x @ W1^T @ w2^T + (b1 @ w2^T + b2)
    c = (jnp.dot(b1.astype(jnp.float32), w2_f[0])
         + b2.astype(jnp.float32)[0]).reshape(1)

    out = pl.pallas_call(
        _stonk_kernel,
        out_shape=jax.ShapeDtypeStruct((B, 1), jnp.float32),
        in_specs=[
            pl.BlockSpec(memory_space=pltpu.MemorySpace.VMEM),   # x    (full block)
            pl.BlockSpec(memory_space=pltpu.MemorySpace.VMEM),   # W1   (full block)
            pl.BlockSpec(memory_space=pltpu.MemorySpace.VMEM),   # W2
            pl.BlockSpec(memory_space=pltpu.MemorySpace.SMEM),   # folded bias scalar
        ],
        out_specs=pl.BlockSpec(memory_space=pltpu.MemorySpace.VMEM),
    )(x_flat, w1, w2_f, c)

    # torch.squeeze on (B, 1) -> (B,)
    return jnp.squeeze(out)


def init_params(key, size):
    """Synthetic parameters matching nn.Linear's natural layouts (f32).

    nn.Linear(25088, size): weight (size, 25088), bias (size,)
    nn.Linear(size, 1):     weight (1, size),     bias (1,)
    """
    K = 25088
    k1, k2, k3, k4 = jax.random.split(key, 4)
    bound1 = 1.0 / jnp.sqrt(K)
    bound2 = 1.0 / jnp.sqrt(size)
    w1 = jax.random.uniform(k1, (size, K), jnp.float32, -bound1, bound1)
    b1 = jax.random.uniform(k2, (size,), jnp.float32, -bound1, bound1)
    w2 = jax.random.uniform(k3, (1, size), jnp.float32, -bound2, bound2)
    b2 = jax.random.uniform(k4, (1,), jnp.float32, -bound2, bound2)
    return w1, b1, w2, b2


if __name__ == "__main__":
    key = jax.random.PRNGKey(0)
    k_x, k_p = jax.random.split(key)

    B, size = 2, 32
    # 25088 = 512 * 7 * 7 is fixed by Linear(25088, size).
    x = jax.random.normal(k_x, (B, 512, 7, 7), jnp.float32)
    w1, b1, w2, b2 = init_params(k_p, size)

    # Store W1 in bf16 once, outside the jitted forward (simulating bf16 weight
    # storage upstream) -> the in-kernel cast is a no-op and the dominant W1
    # HBM read is 1.6 MB with no per-call convert fusion.
    w1 = w1.astype(jnp.bfloat16)

    out = jax.block_until_ready(stonk_forward(x, w1, b1, w2, b2))

    # Plain-JAX reference using the same bf16 quantization of x / W1, f32 math.
    # NOTE: this validates the kernel against its own quantization choice; the
    # true-f32 PyTorch module differs by the bf16 rounding of x and W1.
    x_f = x.reshape(B, -1).astype(jnp.bfloat16).astype(jnp.float32)
    w1_f = w1.astype(jnp.float32)
    logits = (x_f @ w1_f.T + b1[None, :]) @ w2.reshape(-1, 1) + b2.reshape(1, 1)
    ref = jnp.squeeze(jax.nn.sigmoid(logits))

    assert out.shape == (B,), out.shape
    assert jnp.allclose(out, ref, atol=2e-3, rtol=2e-3), (out, ref)

    print("KERNEL_OK")
</pallas_src>

<mosaic_0001>
module attributes {stable_mosaic.version = 11 : i64} {
  func.func @_stonk_kernel(%arg0: memref<2x25088xf32, #tpu.memory_space<vmem>>, %arg1: memref<32x25088xbf16, #tpu.memory_space<vmem>>, %arg2: memref<1x32xf32, #tpu.memory_space<vmem>>, %arg3: memref<1xf32, #tpu.memory_space<smem>>, %arg4: memref<2x1xf32, #tpu.memory_space<vmem>>) attributes {dimension_semantics = [], scalar_prefetch = 0 : i64, scratch_operands = 0 : i64, tpu.core_type = #tpu.core_type<tc>} {
    %c0 = arith.constant 0 : index
    %c0_0 = arith.constant 0 : index
    %0 = vector.load %arg0[%c0, %c0_0] : memref<2x25088xf32, #tpu.memory_space<vmem>>, vector<2x25088xf32>
    %1 = arith.truncf %0 : vector<2x25088xf32> to vector<2x25088xbf16>
    %c0_1 = arith.constant 0 : index
    %c0_2 = arith.constant 0 : index
    %2 = vector.load %arg1[%c0_1, %c0_2] : memref<32x25088xbf16, #tpu.memory_space<vmem>>, vector<32x25088xbf16>
    %cst = arith.constant dense<0.000000e+00> : vector<2x32xf32>
    %3 = tpu.matmul %1, %2, %cst {dimension_numbers = #tpu.dot_dimension_numbers<[1], [1], [0], [0], [0, 0, 1, 0], [], []>} : vector<2x25088xbf16>, vector<32x25088xbf16>, vector<2x32xf32> -> vector<2x32xf32>
    %c0_3 = arith.constant 0 : index
    %c0_4 = arith.constant 0 : index
    %4 = vector.load %arg2[%c0_3, %c0_4] : memref<1x32xf32, #tpu.memory_space<vmem>>, vector<1x32xf32>
    %5 = vector.broadcast %4 : vector<1x32xf32> to vector<2x32xf32>
    %6 = arith.mulf %3, %5 : vector<2x32xf32>
    %cst_5 = arith.constant dense<0.000000e+00> : vector<2xf32>
    %7 = vector.multi_reduction <add>, %6, %cst_5 [1] : vector<2x32xf32> to vector<2xf32>
    %8 = vector.shape_cast %7 : vector<2xf32> to vector<2x1xf32>
    %c0_6 = arith.constant 0 : index
    %9 = memref.load %arg3[%c0_6] : memref<1xf32, #tpu.memory_space<smem>>
    %10 = vector.broadcast %9 : f32 to vector<2x1xf32>
    %11 = arith.addf %8, %10 : vector<2x1xf32>
    %12 = arith.negf %11 : vector<2x1xf32>
    %13 = math.exp %12 : vector<2x1xf32>
    %cst_7 = arith.constant 1.000000e+00 : f32
    %14 = vector.broadcast %cst_7 : f32 to vector<2x1xf32>
    %15 = arith.addf %14, %13 : vector<2x1xf32>
    %16 = arith.divf %14, %15 : vector<2x1xf32>
    %c0_8 = arith.constant 0 : index
    %c0_9 = arith.constant 0 : index
    %17 = vector.load %arg4[%c0_8, %c0_9] : memref<2x1xf32, #tpu.memory_space<vmem>>, vector<2x1xf32>
    tpu.vector_store %arg4[%c0_8, %c0_9], %16 {strides = array<i32>} : memref<2x1xf32, #tpu.memory_space<vmem>>, vector<2x1xf32>,
    return
  }
}

</mosaic_0001>

<bundles_post_ra>
// kernel: stonk_forward.1
= control target key start
LH: loop header
LB: loop body
LE: loop exit
PB: predicated region body
PF: predicated region fallthrough
CT: control target
= control target key end

     0   :  { %v121_v0 = vlaneseq  ;;  %v8677_v2 = vmov 1983009808   ;;  %vm7622_vm0 = vcmask 254976   ;;  %vm7635_vm1 = vcmask 1024   ;;  %s10135_s1 = inlined_call_operand.vmem [shape: bf16[32,25088], index: 1, kind: input, shape index: {}]   ;;  %s10136_s0 = inlined_call_operand.vmem [shape: f32[2,25088], index: 0, kind: input, shape index: {}]   ;;  %s10137_s2 = inlined_call_operand.vmem [shape: f32[1,32], index: 2, kind: input, shape index: {}]   ;;  %s10138_s3 = inlined_call_operand.<no memory space> [shape: f32[1], index: 3, kind: input, shape index: {}]   ;;  %s10139_s4 = inlined_call_operand.vmem [shape: f32[2,1], index: 4, kind: output, shape index: {}]  }
   0x1   :  { %v8036_v1 = vld [vmem:[%s10135_s1 + $0x624] ss:$784 sps:$4 sm:$0xff]   ;;  %v119_v3 = vunpack.c.l.s4 %v8677_v2  ;;  %v8038_v4 = vld [vmem:[%s10135_s1 + $0x62c] ss:$784 sps:$4 sm:$0xff]   ;;  %v8040_v6 = vld [vmem:[%s10135_s1 + $0x620] ss:$784 sps:$4 sm:$0xff]  }
   0x2   :  { %v122_v5 = vshrl.u32 %v121_v0, 7  ;;  %3706 = vmatprep.subr.bf16.mxu0 %v8036_v1  ;;  %v8041_v7 = vld [vmem:[%s10135_s1 + $0x628] ss:$784 sps:$4 sm:$0xff]   ;;  %3746 = vmatprep.subr.bf16.mxu1 %v8038_v4  ;;  %v8042_v9 = vld [vmem:[%s10135_s1 + $0x4] ss:$784 sps:$4 sm:$0xff]  }
   0x3   :  { %v120_v8 = vunpack.c.0.s8 %v119_v3  ;;  %3707 = vmatpush1.bf16.xpose.msra.mxu0 %v8040_v6  ;;  %3747 = vmatpush1.bf16.xpose.msra.mxu1 %v8041_v7  ;;  %v8044_v10 = vld [vmem:[%s10135_s1 + $0xc] ss:$784 sps:$4 sm:$0xff]   ;;  %v19_v12 = vld [vmem:[%s10136_s0] sm:$0xff]  ;;  %v8047_v16 = vld [vmem:[%s10135_s1 + $0x8] ss:$784 sps:$4 sm:$0xff]  }
   0x4   :  { %3708 = vmatprep.subr.bf16.mxu0 %v8042_v9  ;;  %3748 = vmatprep.subr.bf16.mxu1 %v8044_v10  ;;  %v117_v14 = vcombine.high %v19_v12, %v19_v12  ;;  %v8046_v15 = vld [vmem:[%s10135_s1] ss:$784 sps:$4 sm:$0xff]   ;;  %v8051_v19 = vld [vmem:[%s10135_s1 + $0x634] ss:$784 sps:$4 sm:$0xff]   ;;  %v8054_v22 = vld [vmem:[%s10135_s1 + $0x63c] ss:$784 sps:$4 sm:$0xff]  }
   0x5   :  { %v8721_v11 = vsub.s32 %v120_v8, %v122_v5  ;;  %v20_v23 = vld [vmem:[%s10136_s0 + $0x8] sm:$0xff]  ;;  %v8049_v31 = vld [vmem:[%s10135_s1 + $0x630] ss:$784 sps:$4 sm:$0xff]   ;;  %v8057_v33 = vld [vmem:[%s10135_s1 + $0x14] ss:$784 sps:$4 sm:$0xff]  }
   0x6   :  { %v134_v26 = vcombine.high %v20_v23, %v20_v23  ;;  %v8052_v32 = vld [vmem:[%s10135_s1 + $0x638] ss:$784 sps:$4 sm:$0xff]   ;;  %v8060_v35 = vld [vmem:[%s10135_s1 + $0x1c] ss:$784 sps:$4 sm:$0xff]   ;;  %v21_v38 = vld [vmem:[%s10136_s0 + $0x10] sm:$0xff] }
   0x7   :  { %v124_v13 = vrot.slane %v19_v12, %v8721_v11  ;;  %v131_v18 = vrot.slane %v117_v14, %v8721_v11  ;;  %v141_v25 = vrot.slane %v20_v23, %v8721_v11  ;;  %v151_v39 = vcombine.high %v21_v38, %v21_v38  ;;  %v8055_v40 = vld [vmem:[%s10135_s1 + $0x10] ss:$784 sps:$4 sm:$0xff]   ;;  %v8058_v41 = vld [vmem:[%s10135_s1 + $0x18] ss:$784 sps:$4 sm:$0xff]   ;;  %v8064_v42 = vld [vmem:[%s10135_s1 + $0x644] ss:$784 sps:$4 sm:$0xff]  }
   0x8   :  { %v148_v28 = vrot.slane %v134_v26, %v8721_v11  ;;  %v8067_v43 = vld [vmem:[%s10135_s1 + $0x64c] ss:$784 sps:$4 sm:$0xff]   ;;  %v158_v44 = vrot.slane %v21_v38, %v8721_v11  ;;  %v8062_v50 = vld [vmem:[%s10135_s1 + $0x640] ss:$784 sps:$4 sm:$0xff]   ;;  %v8065_v51 = vld [vmem:[%s10135_s1 + $0x648] ss:$784 sps:$4 sm:$0xff]  }
   0x9   :  { %v132_v17 = vcombine.high %v124_v13, %v124_v13  ;;  %v133_v21 = vcombine.high %v131_v18, %v131_v18  ;;  %v149_v27 = vcombine.high %v141_v25, %v141_v25  ;;  %v1146_v29 = vpack.c.bf16 %v124_v13, %v124_v13  ;;  %v8070_v52 = vld [vmem:[%s10135_s1 + $0x24] ss:$784 sps:$4 sm:$0xff]   ;;  %v8073_v53 = vld [vmem:[%s10135_s1 + $0x2c] ss:$784 sps:$4 sm:$0xff]   ;;  %v8068_v58 = vld [vmem:[%s10135_s1 + $0x20] ss:$784 sps:$4 sm:$0xff]  }
   0xa   :  { %v1148_v30 = vpack.c.bf16 %v131_v18, %v131_v18  ;;  %v150_v34 = vcombine.high %v148_v28, %v148_v28  ;;  %v165_v45 = vrot.slane %v151_v39, %v8721_v11  ;;  %v166_v46 = vcombine.high %v158_v44, %v158_v44  ;;  %v22_v56 = vld [vmem:[%s10136_s0 + $0x18] sm:$0xff]  ;;  %v8077_v60 = vld [vmem:[%s10135_s1 + $0x654] ss:$784 sps:$4 sm:$0xff]   ;;  %v8075_v4 = vld [vmem:[%s10135_s1 + $0x650] ss:$784 sps:$4 sm:$0xff]  }
   0xb   :  { %v1147_v20 = vpack.c.bf16 %v132_v17, %v132_v17  ;;  %3709 = vmatpush1.bf16.xpose.msra.mxu0 %v8046_v15  ;;  %3749 = vmatpush1.bf16.xpose.msra.mxu1 %v8047_v16  ;;  %v1149_v24 = vpack.c.bf16 %v133_v21, %v133_v21  ;;  %v1151_v36 = vpack.c.bf16 %v149_v27, %v149_v27  ;;  %v8071_v59 = vld [vmem:[%s10135_s1 + $0x28] ss:$784 sps:$4 sm:$0xff]   ;;  %v8080_v61 = vld [vmem:[%s10135_s1 + $0x65c] ss:$784 sps:$4 sm:$0xff]   ;;  %v8083_v6 = vld [vmem:[%s10135_s1 + $0x34] ss:$784 sps:$4 sm:$0xff]  }
   0xc   :  { %3786 = vmatprep.subr.bf16.mxu0 %v8051_v19  ;;  %3826 = vmatprep.subr.bf16.mxu1 %v8054_v22  ;;  %v1153_v37 = vpack.c.bf16 %v150_v34, %v150_v34  ;;  %v167_v47 = vcombine.high %v165_v45, %v165_v45  ;;  %v1150_v48 = vpack.c.bf16 %v141_v25, %v141_v25  ;;  %v8078_v5 = vld [vmem:[%s10135_s1 + $0x658] ss:$784 sps:$4 sm:$0xff]   ;;  %v8086_v7 = vld [vmem:[%s10135_s1 + $0x3c] ss:$784 sps:$4 sm:$0xff]   ;;  %v23_v10 = vld [vmem:[%s10136_s0 + $0x20] sm:$0xff] }
   0xd   :  { %3726 = vmatprep.mubr.bf16.mxu0 %v1147_v20  ;;  %3766 = vmatprep.mubr.bf16.mxu1 %v1149_v24  ;;  %v1152_v49 = vpack.c.bf16 %v148_v28, %v148_v28  ;;  %v1155_v54 = vpack.c.bf16 %v166_v46, %v166_v46  ;;  %v168_v57 = vcombine.high %v22_v56, %v22_v56  ;;  %v8081_v13 = vld [vmem:[%s10135_s1 + $0x30] ss:$784 sps:$4 sm:$0xff]   ;;  %v8084_v14 = vld [vmem:[%s10135_s1 + $0x38] ss:$784 sps:$4 sm:$0xff]   ;;  %v8090_v15 = vld [vmem:[%s10135_s1 + $0x664] ss:$784 sps:$4 sm:$0xff]  }
   0xe   :  { %v1157_v55 = vpack.c.bf16 %v167_v47, %v167_v47  ;;  %v175_v62 = vrot.slane %v22_v56, %v8721_v11  ;;  %v1154_v2 = vpack.c.bf16 %v158_v44, %v158_v44  ;;  %v1156_v3 = vpack.c.bf16 %v165_v45, %v165_v45  ;;  %v8093_v16 = vld [vmem:[%s10135_s1 + $0x66c] ss:$784 sps:$4 sm:$0xff]   ;;  %v8088_v23 = vld [vmem:[%s10135_s1 + $0x660] ss:$784 sps:$4 sm:$0xff]   ;;  %v8091_v24 = vld [vmem:[%s10135_s1 + $0x668] ss:$784 sps:$4 sm:$0xff]  }
   0xf   :  { %v182_v63 = vrot.slane %v168_v57, %v8721_v11  ;;  %v185_v12 = vcombine.high %v23_v10, %v23_v10  ;;  %v192_v17 = vrot.slane %v23_v10, %v8721_v11  ;;  %v8096_v25 = vld [vmem:[%s10135_s1 + $0x44] ss:$784 sps:$4 sm:$0xff]   ;;  %v8099_v26 = vld [vmem:[%s10135_s1 + $0x4c] ss:$784 sps:$4 sm:$0xff]   ;;  %v8104_v38 = vld [vmem:[%s10135_s1 + $0x678] ss:$784 sps:$4 sm:$0xff]  }
  0x10   :  { %v183_v0 = vcombine.high %v175_v62, %v175_v62  ;;  %v1158_v21 = vpack.c.bf16 %v175_v62, %v175_v62  ;;  %v8106_v34 = vld [vmem:[%s10135_s1 + $0x67c] ss:$784 sps:$4 sm:$0xff]   ;;  %v25_v47 = vld [vmem:[%s10136_s0 + $0x30] sm:$0xff]  ;;  %v8117_v56 = vld [vmem:[%s10135_s1 + $0x688] ss:$784 sps:$4 sm:$0xff]  }
  0x11   :  { %v184_v1 = vcombine.high %v182_v63, %v182_v63  ;;  %v199_v18 = vrot.slane %v185_v12, %v8721_v11  ;;  %v200_v19 = vcombine.high %v192_v17, %v192_v17  ;;  %v1160_v22 = vpack.c.bf16 %v182_v63, %v182_v63  ;;  %v8112_v44 = vld [vmem:[%s10135_s1 + $0x5c] ss:$784 sps:$4 sm:$0xff]   ;;  %v8130_v10 = vld [vmem:[%s10135_s1 + $0x698] ss:$784 sps:$4 sm:$0xff]  }
  0x12   :  { %3727 = vmatmul.mubr.bf16.vlgmr.msra.gmra.mxu0 %v1146_v29  ;;  %3767 = vmatmul.mubr.bf16.vlgmr.msra.gmra.mxu1 %v1148_v30  ;;  %v1159_v8 = vpack.c.bf16 %v183_v0, %v183_v0  ;;  %v24_v29 = vld [vmem:[%s10136_s0 + $0x28] sm:$0xff] }
  0x13   :  { %3787 = vmatpush1.bf16.xpose.msra.mxu0 %v8049_v31  ;;  %3827 = vmatpush1.bf16.xpose.msra.mxu1 %v8052_v32  ;;  %v1161_v9 = vpack.c.bf16 %v184_v1, %v184_v1  ;;  %v201_v20 = vcombine.high %v199_v18, %v199_v18  ;;  %v1163_v27 = vpack.c.bf16 %v200_v19, %v200_v19  ;;  %v8094_v31 = vld [vmem:[%s10135_s1 + $0x40] ss:$784 sps:$4 sm:$0xff]   ;;  %v8097_v32 = vld [vmem:[%s10135_s1 + $0x48] ss:$784 sps:$4 sm:$0xff]   ;;  %v8125_v62 = vld [vmem:[%s10135_s1 + $0x6c] ss:$784 sps:$4 sm:$0xff]  }
  0x14   :  { %3788 = vmatprep.subr.bf16.mxu0 %v8057_v33  ;;  %3828 = vmatprep.subr.bf16.mxu1 %v8060_v35  ;;  %v202_v30 = vcombine.high %v24_v29, %v24_v29  ;;  %v8103_v33 = vld [vmem:[%s10135_s1 + $0x674] ss:$784 sps:$4 sm:$0xff]   ;;  %v209_v35 = vrot.slane %v24_v29, %v8721_v11  ;;  %v26_v1 = vld [vmem:[%s10136_s0 + $0x38] sm:$0xff] }
  0x15   :  { %3806 = vmatprep.mubr.bf16.mxu0 %v1151_v36  ;;  %3846 = vmatprep.mubr.bf16.mxu1 %v1153_v37  ;;  %v1165_v28 = vpack.c.bf16 %v201_v20, %v201_v20  ;;  %v8101_v37 = vld [vmem:[%s10135_s1 + $0x670] ss:$784 sps:$4 sm:$0xff]   ;;  %v8143_v29 = vld [vmem:[%s10135_s1 + $0x6a8] ss:$784 sps:$4 sm:$0xff]  }
  0x16   :  { %v216_v36 = vrot.slane %v202_v30, %v8721_v11  ;;  %v217_v39 = vcombine.high %v209_v35, %v209_v35  ;;  %v27_v20 = vld [vmem:[%s10136_s0 + $0x40] sm:$0xff] }
  0x18   :  { %v1167_v45 = vpack.c.bf16 %v217_v39, %v217_v39  ;;  %v8146_v39 = vld [vmem:[%s10135_s1 + $0x80] ss:$784 sps:$4 sm:$0xff]  }
  0x1b   :  { %3789 = vmatpush1.bf16.xpose.msra.mxu0 %v8055_v40  ;;  %3829 = vmatpush1.bf16.xpose.msra.mxu1 %v8058_v41  ;;  %v218_v40 = vcombine.high %v216_v36, %v216_v36  ;;  %v1162_v41 = vpack.c.bf16 %v192_v17, %v192_v17  ;;  %v8138_v17 = vld [vmem:[%s10135_s1 + $0x7c] ss:$784 sps:$4 sm:$0xff]  }
  0x1c   :  { %3866 = vmatprep.subr.bf16.mxu0 %v8064_v42  ;;  %3906 = vmatprep.subr.bf16.mxu1 %v8067_v43  ;;  %v1164_v42 = vpack.c.bf16 %v199_v18, %v199_v18  ;;  %v8109_v43 = vld [vmem:[%s10135_s1 + $0x54] ss:$784 sps:$4 sm:$0xff]  }
  0x1d   :  { %v1169_v46 = vpack.c.bf16 %v218_v40, %v218_v40  ;;  %v8149_v40 = vld [vmem:[%s10135_s1 + $0x88] ss:$784 sps:$4 sm:$0xff]  }
  0x22   :  { %3807 = vmatmul.mubr.bf16.vlgmr.msra.gmra.mxu0 %v1150_v48  ;;  %3847 = vmatmul.mubr.bf16.vlgmr.msra.gmra.mxu1 %v1152_v49  ;;  %v8107_v48 = vld [vmem:[%s10135_s1 + $0x50] ss:$784 sps:$4 sm:$0xff]   ;;  %v8110_v49 = vld [vmem:[%s10135_s1 + $0x58] ss:$784 sps:$4 sm:$0xff]  }
  0x23   :  { %3867 = vmatpush1.bf16.xpose.msra.mxu0 %v8062_v50  ;;  %3907 = vmatpush1.bf16.xpose.msra.mxu1 %v8065_v51  ;;  %v219_v50 = vcombine.high %v25_v47, %v25_v47  ;;  %v8116_v51 = vld [vmem:[%s10135_s1 + $0x684] ss:$784 sps:$4 sm:$0xff]  }
  0x24   :  { %3868 = vmatprep.subr.bf16.mxu0 %v8070_v52  ;;  %3908 = vmatprep.subr.bf16.mxu1 %v8073_v53  ;;  %v8119_v52 = vld [vmem:[%s10135_s1 + $0x68c] ss:$784 sps:$4 sm:$0xff]   ;;  %v226_v53 = vrot.slane %v25_v47, %v8721_v11  ;;  %v8156_v47 = vld [vmem:[%s10135_s1 + $0x6b8] ss:$784 sps:$4 sm:$0xff]  }
  0x25   :  { %3886 = vmatprep.mubr.bf16.mxu0 %v1155_v54  ;;  %3926 = vmatprep.mubr.bf16.mxu1 %v1157_v55  ;;  %v233_v54 = vrot.slane %v219_v50, %v8721_v11  ;;  %v8114_v55 = vld [vmem:[%s10135_s1 + $0x680] ss:$784 sps:$4 sm:$0xff]  }
  0x26   :  { %v234_v57 = vcombine.high %v226_v53, %v226_v53 }
  0x28   :  { %v1171_v63 = vpack.c.bf16 %v234_v57, %v234_v57  ;;  %v8159_v57 = vld [vmem:[%s10135_s1 + $0x90] ss:$784 sps:$4 sm:$0xff]  }
  0x2b   :  { %3869 = vmatpush1.bf16.xpose.msra.mxu0 %v8068_v58  ;;  %3909 = vmatpush1.bf16.xpose.msra.mxu1 %v8071_v59  ;;  %v235_v58 = vcombine.high %v233_v54, %v233_v54  ;;  %v1166_v59 = vpack.c.bf16 %v209_v35, %v209_v35  ;;  %v8151_v35 = vld [vmem:[%s10135_s1 + $0x8c] ss:$784 sps:$4 sm:$0xff]  }
  0x2c   :  { %3946 = vmatprep.subr.bf16.mxu0 %v8077_v60  ;;  %3986 = vmatprep.subr.bf16.mxu1 %v8080_v61  ;;  %v1168_v60 = vpack.c.bf16 %v216_v36, %v216_v36  ;;  %v8122_v61 = vld [vmem:[%s10135_s1 + $0x64] ss:$784 sps:$4 sm:$0xff]  }
  0x2d   :  { %v1173_v0 = vpack.c.bf16 %v235_v58, %v235_v58  ;;  %v8162_v58 = vld [vmem:[%s10135_s1 + $0x98] ss:$784 sps:$4 sm:$0xff]  }
  0x32   :  { %3887 = vmatmul.mubr.bf16.vlgmr.msra.gmra.mxu0 %v1154_v2  ;;  %3927 = vmatmul.mubr.bf16.vlgmr.msra.gmra.mxu1 %v1156_v3  ;;  %v8120_v2 = vld [vmem:[%s10135_s1 + $0x60] ss:$784 sps:$4 sm:$0xff]   ;;  %v8123_v3 = vld [vmem:[%s10135_s1 + $0x68] ss:$784 sps:$4 sm:$0xff]  }
  0x33   :  { %3947 = vmatpush1.bf16.xpose.msra.mxu0 %v8075_v4  ;;  %3987 = vmatpush1.bf16.xpose.msra.mxu1 %v8078_v5  ;;  %v236_v4 = vcombine.high %v26_v1, %v26_v1  ;;  %v8129_v5 = vld [vmem:[%s10135_s1 + $0x694] ss:$784 sps:$4 sm:$0xff]  }
  0x34   :  { %3948 = vmatprep.subr.bf16.mxu0 %v8083_v6  ;;  %3988 = vmatprep.subr.bf16.mxu1 %v8086_v7  ;;  %v8132_v6 = vld [vmem:[%s10135_s1 + $0x69c] ss:$784 sps:$4 sm:$0xff]   ;;  %v243_v7 = vrot.slane %v26_v1, %v8721_v11  ;;  %v8169_v1 = vld [vmem:[%s10135_s1 + $0x6c8] ss:$784 sps:$4 sm:$0xff]  }
  0x35   :  { %3966 = vmatprep.mubr.bf16.mxu0 %v1159_v8  ;;  %4006 = vmatprep.mubr.bf16.mxu1 %v1161_v9  ;;  %v250_v8 = vrot.slane %v236_v4, %v8721_v11  ;;  %v8127_v9 = vld [vmem:[%s10135_s1 + $0x690] ss:$784 sps:$4 sm:$0xff]  }
  0x36   :  { %v251_v12 = vcombine.high %v243_v7, %v243_v7 }
  0x38   :  { %v1175_v18 = vpack.c.bf16 %v251_v12, %v251_v12  ;;  %v8172_v12 = vld [vmem:[%s10135_s1 + $0xa0] ss:$784 sps:$4 sm:$0xff]  }
  0x3b   :  { %3949 = vmatpush1.bf16.xpose.msra.mxu0 %v8081_v13  ;;  %3989 = vmatpush1.bf16.xpose.msra.mxu1 %v8084_v14  ;;  %v252_v13 = vcombine.high %v250_v8, %v250_v8  ;;  %v1170_v14 = vpack.c.bf16 %v226_v53, %v226_v53  ;;  %v8164_v53 = vld [vmem:[%s10135_s1 + $0x9c] ss:$784 sps:$4 sm:$0xff]  }
  0x3c   :  { %4026 = vmatprep.subr.bf16.mxu0 %v8090_v15  ;;  %4066 = vmatprep.subr.bf16.mxu1 %v8093_v16  ;;  %v1172_v15 = vpack.c.bf16 %v233_v54, %v233_v54  ;;  %v8135_v16 = vld [vmem:[%s10135_s1 + $0x74] ss:$784 sps:$4 sm:$0xff]  }
  0x3d   :  { %v1177_v19 = vpack.c.bf16 %v252_v13, %v252_v13  ;;  %v8175_v13 = vld [vmem:[%s10135_s1 + $0xa8] ss:$784 sps:$4 sm:$0xff]  }
  0x42   :  { %3967 = vmatmul.mubr.bf16.vlgmr.msra.gmra.mxu0 %v1158_v21  ;;  %4007 = vmatmul.mubr.bf16.vlgmr.msra.gmra.mxu1 %v1160_v22  ;;  %v8133_v21 = vld [vmem:[%s10135_s1 + $0x70] ss:$784 sps:$4 sm:$0xff]   ;;  %v8136_v22 = vld [vmem:[%s10135_s1 + $0x78] ss:$784 sps:$4 sm:$0xff]  }
  0x43   :  { %4027 = vmatpush1.bf16.xpose.msra.mxu0 %v8088_v23  ;;  %4067 = vmatpush1.bf16.xpose.msra.mxu1 %v8091_v24  ;;  %v253_v23 = vcombine.high %v27_v20, %v27_v20  ;;  %v8142_v24 = vld [vmem:[%s10135_s1 + $0x6a4] ss:$784 sps:$4 sm:$0xff]  }
  0x44   :  { %4028 = vmatprep.subr.bf16.mxu0 %v8096_v25  ;;  %4068 = vmatprep.subr.bf16.mxu1 %v8099_v26  ;;  %v8145_v25 = vld [vmem:[%s10135_s1 + $0x6ac] ss:$784 sps:$4 sm:$0xff]   ;;  %v260_v26 = vrot.slane %v27_v20, %v8721_v11  ;;  %v8182_v20 = vld [vmem:[%s10135_s1 + $0x6d8] ss:$784 sps:$4 sm:$0xff]  }
  0x45   :  { %4046 = vmatprep.mubr.bf16.mxu0 %v1163_v27  ;;  %4086 = vmatprep.mubr.bf16.mxu1 %v1165_v28  ;;  %v267_v27 = vrot.slane %v253_v23, %v8721_v11  ;;  %v8140_v28 = vld [vmem:[%s10135_s1 + $0x6a0] ss:$784 sps:$4 sm:$0xff]  }
  0x46   :  { %v268_v30 = vcombine.high %v260_v26, %v260_v26  ;;  %v1178_v50 = vpack.c.bf16 %v260_v26, %v260_v26  ;;  %v8190_v26 = vld [vmem:[%s10135_s1 + $0xbc] ss:$784 sps:$4 sm:$0xff]  }
  0x48   :  { %v1179_v36 = vpack.c.bf16 %v268_v30, %v268_v30  ;;  %v8185_v30 = vld [vmem:[%s10135_s1 + $0xb0] ss:$784 sps:$4 sm:$0xff]  }
  0x4b   :  { %4029 = vmatpush1.bf16.xpose.msra.mxu0 %v8094_v31  ;;  %4069 = vmatpush1.bf16.xpose.msra.mxu1 %v8097_v32  ;;  %v269_v31 = vcombine.high %v267_v27, %v267_v27  ;;  %v1174_v32 = vpack.c.bf16 %v243_v7, %v243_v7  ;;  %v8177_v7 = vld [vmem:[%s10135_s1 + $0xac] ss:$784 sps:$4 sm:$0xff]  }
  0x4c   :  { %4106 = vmatprep.subr.bf16.mxu0 %v8103_v33  ;;  %4146 = vmatprep.subr.bf16.mxu1 %v8106_v34  ;;  %v1176_v33 = vpack.c.bf16 %v250_v8, %v250_v8  ;;  %v8148_v34 = vld [vmem:[%s10135_s1 + $0x84] ss:$784 sps:$4 sm:$0xff]  }
  0x52   :  { %4047 = vmatmul.mubr.bf16.vlgmr.msra.gmra.mxu0 %v1162_v41  ;;  %4087 = vmatmul.mubr.bf16.vlgmr.msra.gmra.mxu1 %v1164_v42  ;;  %v8155_v42 = vld [vmem:[%s10135_s1 + $0x6b4] ss:$784 sps:$4 sm:$0xff]  }
  0x53   :  { %4107 = vmatpush1.bf16.xpose.msra.mxu0 %v8101_v37  ;;  %4147 = vmatpush1.bf16.xpose.msra.mxu1 %v8104_v38  ;;  %v1181_v37 = vpack.c.bf16 %v269_v31, %v269_v31  ;;  %v28_v38 = vld [vmem:[%s10136_s0 + $0x48] sm:$0xff] }
  0x54   :  { %4108 = vmatprep.subr.bf16.mxu0 %v8109_v43  ;;  %4148 = vmatprep.subr.bf16.mxu1 %v8112_v44  ;;  %v270_v41 = vcombine.high %v28_v38, %v28_v38  ;;  %v8158_v43 = vld [vmem:[%s10135_s1 + $0x6bc] ss:$784 sps:$4 sm:$0xff]   ;;  %v277_v44 = vrot.slane %v28_v38, %v8721_v11  ;;  %v8188_v31 = vld [vmem:[%s10135_s1 + $0xb8] ss:$784 sps:$4 sm:$0xff]  }
  0x55   :  { %4126 = vmatprep.mubr.bf16.mxu0 %v1167_v45  ;;  %4166 = vmatprep.mubr.bf16.mxu1 %v1169_v46  ;;  %v8153_v46 = vld [vmem:[%s10135_s1 + $0x6b0] ss:$784 sps:$4 sm:$0xff]  }
  0x56   :  { %v284_v45 = vrot.slane %v270_v41, %v8721_v11  ;;  %v1182_v4 = vpack.c.bf16 %v277_v44, %v277_v44  ;;  %v8192_v41 = vld [vmem:[%s10135_s1 + $0x6e0] ss:$784 sps:$4 sm:$0xff]  }
  0x5b   :  { %4109 = vmatpush1.bf16.xpose.msra.mxu0 %v8107_v48  ;;  %4149 = vmatpush1.bf16.xpose.msra.mxu1 %v8110_v49  ;;  %v285_v48 = vcombine.high %v277_v44, %v277_v44  ;;  %v286_v49 = vcombine.high %v284_v45, %v284_v45  ;;  %v8203_v44 = vld [vmem:[%s10135_s1 + $0xcc] ss:$784 sps:$4 sm:$0xff]  }
  0x5c   :  { %4186 = vmatprep.subr.bf16.mxu0 %v8116_v51  ;;  %4226 = vmatprep.subr.bf16.mxu1 %v8119_v52  ;;  %v1180_v51 = vpack.c.bf16 %v267_v27, %v267_v27  ;;  %v8161_v52 = vld [vmem:[%s10135_s1 + $0x94] ss:$784 sps:$4 sm:$0xff]  }
  0x5d   :  { %v1183_v54 = vpack.c.bf16 %v285_v48, %v285_v48 }
  0x62   :  { %4127 = vmatmul.mubr.bf16.vlgmr.msra.gmra.mxu0 %v1166_v59  ;;  %4167 = vmatmul.mubr.bf16.vlgmr.msra.gmra.mxu1 %v1168_v60  ;;  %v8168_v60 = vld [vmem:[%s10135_s1 + $0x6c4] ss:$784 sps:$4 sm:$0xff]  }
  0x63   :  { %4187 = vmatpush1.bf16.xpose.msra.mxu0 %v8114_v55  ;;  %4227 = vmatpush1.bf16.xpose.msra.mxu1 %v8117_v56  ;;  %v1185_v55 = vpack.c.bf16 %v286_v49, %v286_v49  ;;  %v29_v56 = vld [vmem:[%s10136_s0 + $0x50] sm:$0xff] }
  0x64   :  { %4188 = vmatprep.subr.bf16.mxu0 %v8122_v61  ;;  %4228 = vmatprep.subr.bf16.mxu1 %v8125_v62  ;;  %v287_v59 = vcombine.high %v29_v56, %v29_v56  ;;  %v8171_v61 = vld [vmem:[%s10135_s1 + $0x6cc] ss:$784 sps:$4 sm:$0xff]   ;;  %v294_v62 = vrot.slane %v29_v56, %v8721_v11  ;;  %v8198_v49 = vld [vmem:[%s10135_s1 + $0xc0] ss:$784 sps:$4 sm:$0xff]  }
  0x65   :  { %4206 = vmatprep.mubr.bf16.mxu0 %v1171_v63  ;;  %4246 = vmatprep.mubr.bf16.mxu1 %v1173_v0  ;;  %v8166_v0 = vld [vmem:[%s10135_s1 + $0x6c0] ss:$784 sps:$4 sm:$0xff]  }
  0x66   :  { %v301_v63 = vrot.slane %v287_v59, %v8721_v11  ;;  %v1186_v23 = vpack.c.bf16 %v294_v62, %v294_v62  ;;  %v8205_v59 = vld [vmem:[%s10135_s1 + $0x6f0] ss:$784 sps:$4 sm:$0xff]  }
  0x6b   :  { %4189 = vmatpush1.bf16.xpose.msra.mxu0 %v8120_v2  ;;  %4229 = vmatpush1.bf16.xpose.msra.mxu1 %v8123_v3  ;;  %v302_v2 = vcombine.high %v294_v62, %v294_v62  ;;  %v303_v3 = vcombine.high %v301_v63, %v301_v63  ;;  %v8216_v62 = vld [vmem:[%s10135_s1 + $0xdc] ss:$784 sps:$4 sm:$0xff]  }
  0x6c   :  { %4266 = vmatprep.subr.bf16.mxu0 %v8129_v5  ;;  %4306 = vmatprep.subr.bf16.mxu1 %v8132_v6  ;;  %v1184_v5 = vpack.c.bf16 %v284_v45, %v284_v45  ;;  %v8174_v6 = vld [vmem:[%s10135_s1 + $0xa4] ss:$784 sps:$4 sm:$0xff]  }
  0x6d   :  { %v1187_v8 = vpack.c.bf16 %v302_v2, %v302_v2 }
  0x72   :  { %4207 = vmatmul.mubr.bf16.vlgmr.msra.gmra.mxu0 %v1170_v14  ;;  %4247 = vmatmul.mubr.bf16.vlgmr.msra.gmra.mxu1 %v1172_v15  ;;  %v8181_v15 = vld [vmem:[%s10135_s1 + $0x6d4] ss:$784 sps:$4 sm:$0xff]  }
  0x73   :  { %4267 = vmatpush1.bf16.xpose.msra.mxu0 %v8127_v9  ;;  %4307 = vmatpush1.bf16.xpose.msra.mxu1 %v8130_v10  ;;  %v1189_v9 = vpack.c.bf16 %v303_v3, %v303_v3  ;;  %v30_v10 = vld [vmem:[%s10136_s0 + $0x58] sm:$0xff]  ;;  %v33_v3 = vld [vmem:[%s10136_s0 + $0x70] sm:$0xff] }
  0x74   :  { %4268 = vmatprep.subr.bf16.mxu0 %v8135_v16  ;;  %4308 = vmatprep.subr.bf16.mxu1 %v8138_v17  ;;  %v304_v14 = vcombine.high %v30_v10, %v30_v10  ;;  %v8184_v16 = vld [vmem:[%s10135_s1 + $0x6dc] ss:$784 sps:$4 sm:$0xff]   ;;  %v311_v17 = vrot.slane %v30_v10, %v8721_v11  ;;  %v8211_v10 = vld [vmem:[%s10135_s1 + $0xd0] ss:$784 sps:$4 sm:$0xff]  }
  0x75   :  { %4286 = vmatprep.mubr.bf16.mxu0 %v1175_v18  ;;  %4326 = vmatprep.mubr.bf16.mxu1 %v1177_v19  ;;  %v8179_v19 = vld [vmem:[%s10135_s1 + $0x6d0] ss:$784 sps:$4 sm:$0xff]  }
  0x76   :  { %v318_v18 = vrot.slane %v304_v14, %v8721_v11 }
  0x7b   :  { %4269 = vmatpush1.bf16.xpose.msra.mxu0 %v8133_v21  ;;  %4309 = vmatpush1.bf16.xpose.msra.mxu1 %v8136_v22  ;;  %v319_v21 = vcombine.high %v311_v17, %v311_v17  ;;  %v320_v22 = vcombine.high %v318_v18, %v318_v18 }
  0x7c   :  { %4346 = vmatprep.subr.bf16.mxu0 %v8142_v24  ;;  %4386 = vmatprep.subr.bf16.mxu1 %v8145_v25  ;;  %v1188_v24 = vpack.c.bf16 %v301_v63, %v301_v63  ;;  %v8187_v25 = vld [vmem:[%s10135_s1 + $0xb4] ss:$784 sps:$4 sm:$0xff]  }
  0x7d   :  { %v1191_v27 = vpack.c.bf16 %v319_v21, %v319_v21 }
  0x82   :  { %4287 = vmatmul.mubr.bf16.vlgmr.msra.gmra.mxu0 %v1174_v32  ;;  %4327 = vmatmul.mubr.bf16.vlgmr.msra.gmra.mxu1 %v1176_v33  ;;  %v8194_v33 = vld [vmem:[%s10135_s1 + $0x6e4] ss:$784 sps:$4 sm:$0xff]  }
  0x83   :  { %4347 = vmatpush1.bf16.xpose.msra.mxu0 %v8140_v28  ;;  %4387 = vmatpush1.bf16.xpose.msra.mxu1 %v8143_v29  ;;  %v1193_v28 = vpack.c.bf16 %v320_v22, %v320_v22  ;;  %v31_v29 = vld [vmem:[%s10136_s0 + $0x60] sm:$0xff] }
  0x84   :  { %4348 = vmatprep.subr.bf16.mxu0 %v8148_v34  ;;  %4388 = vmatprep.subr.bf16.mxu1 %v8151_v35  ;;  %v321_v32 = vcombine.high %v31_v29, %v31_v29  ;;  %v8197_v34 = vld [vmem:[%s10135_s1 + $0x6ec] ss:$784 sps:$4 sm:$0xff]   ;;  %v328_v35 = vrot.slane %v31_v29, %v8721_v11 }
  0x85   :  { %4366 = vmatprep.mubr.bf16.mxu0 %v1179_v36  ;;  %4406 = vmatprep.mubr.bf16.mxu1 %v1181_v37 }
  0x86   :  { %v335_v36 = vrot.slane %v321_v32, %v8721_v11  ;;  %v336_v37 = vcombine.high %v328_v35, %v328_v35 }
  0x88   :  { %v337_v38 = vcombine.high %v335_v36, %v335_v36  ;;  %v1195_v45 = vpack.c.bf16 %v336_v37, %v336_v37 }
  0x8b   :  { %4349 = vmatpush1.bf16.xpose.msra.mxu0 %v8146_v39  ;;  %4389 = vmatpush1.bf16.xpose.msra.mxu1 %v8149_v40  ;;  %v1190_v39 = vpack.c.bf16 %v311_v17, %v311_v17  ;;  %v1192_v40 = vpack.c.bf16 %v318_v18, %v318_v18  ;;  %v362_v17 = vrot.slane %v33_v3, %v8721_v11 }
  0x8c   :  { %4426 = vmatprep.subr.bf16.mxu0 %v8155_v42  ;;  %4466 = vmatprep.subr.bf16.mxu1 %v8158_v43  ;;  %v8195_v42 = vld [vmem:[%s10135_s1 + $0x6e8] ss:$784 sps:$4 sm:$0xff]   ;;  %v8200_v43 = vld [vmem:[%s10135_s1 + $0xc4] ss:$784 sps:$4 sm:$0xff]  }
  0x92   :  { %4367 = vmatmul.mubr.bf16.vlgmr.msra.gmra.mxu0 %v1178_v50  ;;  %4407 = vmatmul.mubr.bf16.vlgmr.msra.gmra.mxu1 %v1180_v51  ;;  %v8201_v50 = vld [vmem:[%s10135_s1 + $0xc8] ss:$784 sps:$4 sm:$0xff]   ;;  %v8207_v51 = vld [vmem:[%s10135_s1 + $0x6f4] ss:$784 sps:$4 sm:$0xff]  }
  0x93   :  { %4427 = vmatpush1.bf16.xpose.msra.mxu0 %v8153_v46  ;;  %4467 = vmatpush1.bf16.xpose.msra.mxu1 %v8156_v47  ;;  %v1197_v46 = vpack.c.bf16 %v337_v38, %v337_v38  ;;  %v32_v47 = vld [vmem:[%s10136_s0 + $0x68] sm:$0xff] }
  0x94   :  { %4428 = vmatprep.subr.bf16.mxu0 %v8161_v52  ;;  %4468 = vmatprep.subr.bf16.mxu1 %v8164_v53  ;;  %v338_v48 = vcombine.high %v32_v47, %v32_v47  ;;  %v8210_v52 = vld [vmem:[%s10135_s1 + $0x6fc] ss:$784 sps:$4 sm:$0xff]   ;;  %v345_v53 = vrot.slane %v32_v47, %v8721_v11 }
  0x95   :  { %4446 = vmatprep.mubr.bf16.mxu0 %v1183_v54  ;;  %4486 = vmatprep.mubr.bf16.mxu1 %v1185_v55 }
  0x96   :  { %v352_v54 = vrot.slane %v338_v48, %v8721_v11  ;;  %v353_v55 = vcombine.high %v345_v53, %v345_v53  ;;  %v1198_v21 = vpack.c.bf16 %v345_v53, %v345_v53  ;;  %v8239_v53 = vld [vmem:[%s10135_s1 + $0xf4] ss:$784 sps:$4 sm:$0xff]  }
  0x98   :  { %v354_v56 = vcombine.high %v352_v54, %v352_v54  ;;  %v1199_v63 = vpack.c.bf16 %v353_v55, %v353_v55  ;;  %v1200_v22 = vpack.c.bf16 %v352_v54, %v352_v54  ;;  %v8242_v54 = vld [vmem:[%s10135_s1 + $0xfc] ss:$784 sps:$4 sm:$0xff]  }
  0x9b   :  { %4429 = vmatpush1.bf16.xpose.msra.mxu0 %v8159_v57  ;;  %4469 = vmatpush1.bf16.xpose.msra.mxu1 %v8162_v58  ;;  %v1194_v57 = vpack.c.bf16 %v328_v35, %v328_v35  ;;  %v1196_v58 = vpack.c.bf16 %v335_v36, %v335_v36 }
  0x9c   :  { %4506 = vmatprep.subr.bf16.mxu0 %v8168_v60  ;;  %4546 = vmatprep.subr.bf16.mxu1 %v8171_v61  ;;  %v8208_v60 = vld [vmem:[%s10135_s1 + $0x6f8] ss:$784 sps:$4 sm:$0xff]   ;;  %v8213_v61 = vld [vmem:[%s10135_s1 + $0xd4] ss:$784 sps:$4 sm:$0xff]  }
  0xa2   :  { %4447 = vmatmul.mubr.bf16.vlgmr.msra.gmra.mxu0 %v1182_v4  ;;  %4487 = vmatmul.mubr.bf16.vlgmr.msra.gmra.mxu1 %v1184_v5 }
  0xa3   :  { %4507 = vmatpush1.bf16.xpose.msra.mxu0 %v8166_v0  ;;  %4547 = vmatpush1.bf16.xpose.msra.mxu1 %v8169_v1  ;;  %v1201_v0 = vpack.c.bf16 %v354_v56, %v354_v56 }
  0xa4   :  { %4508 = vmatprep.subr.bf16.mxu0 %v8174_v6  ;;  %4548 = vmatprep.subr.bf16.mxu1 %v8177_v7  ;;  %v355_v7 = vcombine.high %v33_v3, %v33_v3  ;;  %v8237_v3 = vld [vmem:[%s10135_s1 + $0xf0] ss:$784 sps:$4 sm:$0xff]  }
  0xa5   :  { %4526 = vmatprep.mubr.bf16.mxu0 %v1187_v8  ;;  %4566 = vmatprep.mubr.bf16.mxu1 %v1189_v9 }
  0xa6   :  { %v369_v18 = vrot.slane %v355_v7, %v8721_v11  ;;  %v8246_v7 = vld [vmem:[%s10135_s1 + $0x724] ss:$784 sps:$4 sm:$0xff]  }
  0xab   :  { %4509 = vmatpush1.bf16.xpose.msra.mxu0 %v8172_v12  ;;  %4549 = vmatpush1.bf16.xpose.msra.mxu1 %v8175_v13  ;;  %v8214_v12 = vld [vmem:[%s10135_s1 + $0xd8] ss:$784 sps:$4 sm:$0xff]  }
  0xac   :  { %4586 = vmatprep.subr.bf16.mxu0 %v8181_v15  ;;  %4626 = vmatprep.subr.bf16.mxu1 %v8184_v16  ;;  %v8220_v15 = vld [vmem:[%s10135_s1 + $0x704] ss:$784 sps:$4 sm:$0xff]   ;;  %v8223_v16 = vld [vmem:[%s10135_s1 + $0x70c] ss:$784 sps:$4 sm:$0xff]  }
  0xb2   :  { %4527 = vmatmul.mubr.bf16.vlgmr.msra.gmra.mxu0 %v1186_v23  ;;  %4567 = vmatmul.mubr.bf16.vlgmr.msra.gmra.mxu1 %v1188_v24  ;;  %v8218_v23 = vld [vmem:[%s10135_s1 + $0x700] ss:$784 sps:$4 sm:$0xff]   ;;  %v8221_v24 = vld [vmem:[%s10135_s1 + $0x708] ss:$784 sps:$4 sm:$0xff]  }
  0xb3   :  { %4587 = vmatpush1.bf16.xpose.msra.mxu0 %v8179_v19  ;;  %4627 = vmatpush1.bf16.xpose.msra.mxu1 %v8182_v20  ;;  %v370_v19 = vcombine.high %v362_v17, %v362_v17  ;;  %v371_v20 = vcombine.high %v369_v18, %v369_v18 }
  0xb4   :  { %4588 = vmatprep.subr.bf16.mxu0 %v8187_v25  ;;  %4628 = vmatprep.subr.bf16.mxu1 %v8190_v26  ;;  %v8226_v25 = vld [vmem:[%s10135_s1 + $0xe4] ss:$784 sps:$4 sm:$0xff]   ;;  %v8229_v26 = vld [vmem:[%s10135_s1 + $0xec] ss:$784 sps:$4 sm:$0xff]  }
  0xb5   :  { %4606 = vmatprep.mubr.bf16.mxu0 %v1191_v27  ;;  %4646 = vmatprep.mubr.bf16.mxu1 %v1193_v28  ;;  %v1203_v27 = vpack.c.bf16 %v370_v19, %v370_v19  ;;  %v1205_v28 = vpack.c.bf16 %v371_v20, %v371_v20  ;;  %v8255_v19 = vld [vmem:[%s10135_s1 + $0x10c] ss:$784 sps:$4 sm:$0xff]  }
  0xbb   :  { %4589 = vmatpush1.bf16.xpose.msra.mxu0 %v8185_v30  ;;  %4629 = vmatpush1.bf16.xpose.msra.mxu1 %v8188_v31  ;;  %v34_v31 = vld [vmem:[%s10136_s0 + $0x78] sm:$0xff] }
  0xbc   :  { %4666 = vmatprep.subr.bf16.mxu0 %v8194_v33  ;;  %4706 = vmatprep.subr.bf16.mxu1 %v8197_v34  ;;  %v372_v36 = vcombine.high %v34_v31, %v34_v31 }
  0xc2   :  { %4607 = vmatmul.mubr.bf16.vlgmr.msra.gmra.mxu0 %v1190_v39  ;;  %4647 = vmatmul.mubr.bf16.vlgmr.msra.gmra.mxu1 %v1192_v40  ;;  %v8224_v39 = vld [vmem:[%s10135_s1 + $0xe0] ss:$784 sps:$4 sm:$0xff]   ;;  %v8227_v40 = vld [vmem:[%s10135_s1 + $0xe8] ss:$784 sps:$4 sm:$0xff]  }
  0xc3   :  { %4667 = vmatpush1.bf16.xpose.msra.mxu0 %v8192_v41  ;;  %4707 = vmatpush1.bf16.xpose.msra.mxu1 %v8195_v42 }
  0xc4   :  { %4668 = vmatprep.subr.bf16.mxu0 %v8200_v43  ;;  %4708 = vmatprep.subr.bf16.mxu1 %v8203_v44  ;;  %v8233_v43 = vld [vmem:[%s10135_s1 + $0x714] ss:$784 sps:$4 sm:$0xff]   ;;  %v8236_v44 = vld [vmem:[%s10135_s1 + $0x71c] ss:$784 sps:$4 sm:$0xff]  }
  0xc5   :  { %4686 = vmatprep.mubr.bf16.mxu0 %v1195_v45  ;;  %4726 = vmatprep.mubr.bf16.mxu1 %v1197_v46  ;;  %v379_v45 = vrot.slane %v34_v31, %v8721_v11  ;;  %v386_v46 = vrot.slane %v372_v36, %v8721_v11  ;;  %v8259_v36 = vld [vmem:[%s10135_s1 + $0x734] ss:$784 sps:$4 sm:$0xff]  }
  0xc7   :  { %v387_v47 = vcombine.high %v379_v45, %v379_v45  ;;  %v388_v48 = vcombine.high %v386_v46, %v386_v46 }
  0xc9   :  { %v1207_v55 = vpack.c.bf16 %v387_v47, %v387_v47  ;;  %v1209_v56 = vpack.c.bf16 %v388_v48, %v388_v48  ;;  %v8268_v47 = vld [vmem:[%s10135_s1 + $0x11c] ss:$784 sps:$4 sm:$0xff]  }
  0xcb   :  { %4669 = vmatpush1.bf16.xpose.msra.mxu0 %v8198_v49  ;;  %4709 = vmatpush1.bf16.xpose.msra.mxu1 %v8201_v50  ;;  %v1202_v49 = vpack.c.bf16 %v362_v17, %v362_v17  ;;  %v1204_v50 = vpack.c.bf16 %v369_v18, %v369_v18  ;;  %v8247_v17 = vld [vmem:[%s10135_s1 + $0x728] ss:$784 sps:$4 sm:$0xff]   ;;  %v8252_v18 = vld [vmem:[%s10135_s1 + $0x104] ss:$784 sps:$4 sm:$0xff]  }
  0xcc   :  { %4746 = vmatprep.subr.bf16.mxu0 %v8207_v51  ;;  %4786 = vmatprep.subr.bf16.mxu1 %v8210_v52  ;;  %v8231_v51 = vld [vmem:[%s10135_s1 + $0x710] ss:$784 sps:$4 sm:$0xff]   ;;  %v8234_v52 = vld [vmem:[%s10135_s1 + $0x718] ss:$784 sps:$4 sm:$0xff]  }
  0xd2   :  { %v3728_v1 = vpop.f32.mrf.mxu0  ;;  %v3768_v2 = vpop.f32.mrf.mxu1  ;;  %4687 = vmatmul.mubr.bf16.vlgmr.msra.gmra.mxu0 %v1194_v57  ;;  %4727 = vmatmul.mubr.bf16.vlgmr.msra.gmra.mxu1 %v1196_v58 }
  0xd3   :  { %v3769_v4 = vadd.f32 %v3768_v2, %v3728_v1  ;;  %4747 = vmatpush1.bf16.xpose.msra.mxu0 %v8205_v59  ;;  %4787 = vmatpush1.bf16.xpose.msra.mxu1 %v8208_v60  ;;  %v35_v59 = vld [vmem:[%s10136_s0 + $0x80] sm:$0xff] }
  0xd4   :  { %v3730_v5 = vpop.f32.mrf.mxu0  ;;  %v3770_v6 = vpop.f32.mrf.mxu1  ;;  %4748 = vmatprep.subr.bf16.mxu0 %v8213_v61  ;;  %4788 = vmatprep.subr.bf16.mxu1 %v8216_v62 }
  0xd5   :  { %4766 = vmatprep.mubr.bf16.mxu0 %v1199_v63  ;;  %4806 = vmatprep.mubr.bf16.mxu1 %v1201_v0  ;;  %v389_v0 = vcombine.high %v35_v59, %v35_v59 }
  0xd6   :  { %v3731_v8 = vpop.f32.mrf.mxu0  ;;  %v3771_v9 = vpop.f32.mrf.mxu1 }
  0xd7   :  { %v8249_v8 = vld [vmem:[%s10135_s1 + $0x72c] ss:$784 sps:$4 sm:$0xff]   ;;  %v396_v9 = vrot.slane %v35_v59, %v8721_v11 }
  0xd8   :  { %v3732_v13 = vpop.f32.mrf.mxu0  ;;  %v3772_v14 = vpop.f32.mrf.mxu1 }
  0xd9   :  { %v1206_v14 = vpack.c.bf16 %v379_v45, %v379_v45  ;;  %v8260_v45 = vld [vmem:[%s10135_s1 + $0x738] ss:$784 sps:$4 sm:$0xff]  }
  0xdb   :  { %4749 = vmatpush1.bf16.xpose.msra.mxu0 %v8211_v10  ;;  %4789 = vmatpush1.bf16.xpose.msra.mxu1 %v8214_v12  ;;  %v403_v10 = vrot.slane %v389_v0, %v8721_v11  ;;  %v404_v12 = vcombine.high %v396_v9, %v396_v9  ;;  %v8272_v0 = vld [vmem:[%s10135_s1 + $0x744] ss:$784 sps:$4 sm:$0xff]  }
  0xdc   :  { %4826 = vmatprep.subr.bf16.mxu0 %v8220_v15  ;;  %4866 = vmatprep.subr.bf16.mxu1 %v8223_v16  ;;  %v1208_v15 = vpack.c.bf16 %v386_v46, %v386_v46  ;;  %v8244_v16 = vld [vmem:[%s10135_s1 + $0x720] ss:$784 sps:$4 sm:$0xff]   ;;  %v8265_v46 = vld [vmem:[%s10135_s1 + $0x114] ss:$784 sps:$4 sm:$0xff]  }
  0xdd   :  { %v405_v13 = vcombine.high %v403_v10, %v403_v10  ;;  %v1211_v20 = vpack.c.bf16 %v404_v12, %v404_v12  ;;  %v8281_v12 = vld [vmem:[%s10135_s1 + $0x12c] ss:$784 sps:$4 sm:$0xff]  }
  0xe2   :  { %v3808_v29 = vpop.f32.mrf.mxu0  ;;  %v3848_v30 = vpop.f32.mrf.mxu1  ;;  %4767 = vmatmul.mubr.bf16.vlgmr.msra.gmra.mxu0 %v1198_v21  ;;  %4807 = vmatmul.mubr.bf16.vlgmr.msra.gmra.mxu1 %v1200_v22  ;;  %v1213_v21 = vpack.c.bf16 %v405_v13, %v405_v13 }
  0xe3   :  { %v3809_v32 = vadd.f32 %v3808_v29, %v3769_v4  ;;  %4827 = vmatpush1.bf16.xpose.msra.mxu0 %v8218_v23  ;;  %4867 = vmatpush1.bf16.xpose.msra.mxu1 %v8221_v24  ;;  %v8240_v4 = vld [vmem:[%s10135_s1 + $0xf8] ss:$784 sps:$4 sm:$0xff]  }
  0xe4   :  { %v3810_v33 = vpop.f32.mrf.mxu0  ;;  %v3850_v34 = vpop.f32.mrf.mxu1  ;;  %4828 = vmatprep.subr.bf16.mxu0 %v8226_v25  ;;  %4868 = vmatprep.subr.bf16.mxu1 %v8229_v26  ;;  %v36_v24 = vld [vmem:[%s10136_s0 + $0x88] sm:$0xff] }
  0xe5   :  { %v3849_v35 = vadd.f32 %v3848_v30, %v3809_v32  ;;  %4846 = vmatprep.mubr.bf16.mxu0 %v1203_v27  ;;  %4886 = vmatprep.mubr.bf16.mxu1 %v1205_v28  ;;  %v406_v29 = vcombine.high %v36_v24, %v36_v24  ;;  %v8250_v32 = vld [vmem:[%s10135_s1 + $0x100] ss:$784 sps:$4 sm:$0xff]   ;;  %v8253_v33 = vld [vmem:[%s10135_s1 + $0x108] ss:$784 sps:$4 sm:$0xff]  }
  0xe6   :  { %v3811_v37 = vpop.f32.mrf.mxu0  ;;  %v3851_v38 = vpop.f32.mrf.mxu1 }
  0xe7   :  { %v8262_v37 = vld [vmem:[%s10135_s1 + $0x73c] ss:$784 sps:$4 sm:$0xff]   ;;  %v413_v38 = vrot.slane %v36_v24, %v8721_v11 }
  0xe8   :  { %v3812_v41 = vpop.f32.mrf.mxu0  ;;  %v3852_v42 = vpop.f32.mrf.mxu1 }
  0xe9   :  { %v1210_v42 = vpack.c.bf16 %v396_v9, %v396_v9  ;;  %v8273_v9 = vld [vmem:[%s10135_s1 + $0x748] ss:$784 sps:$4 sm:$0xff]  }
  0xeb   :  { %4829 = vmatpush1.bf16.xpose.msra.mxu0 %v8224_v39  ;;  %4869 = vmatpush1.bf16.xpose.msra.mxu1 %v8227_v40  ;;  %v420_v39 = vrot.slane %v406_v29, %v8721_v11  ;;  %v421_v40 = vcombine.high %v413_v38, %v413_v38  ;;  %v8285_v29 = vld [vmem:[%s10135_s1 + $0x754] ss:$784 sps:$4 sm:$0xff]  }
  0xec   :  { %4906 = vmatprep.subr.bf16.mxu0 %v8233_v43  ;;  %4946 = vmatprep.subr.bf16.mxu1 %v8236_v44  ;;  %v1212_v43 = vpack.c.bf16 %v403_v10, %v403_v10  ;;  %v8257_v44 = vld [vmem:[%s10135_s1 + $0x730] ss:$784 sps:$4 sm:$0xff]   ;;  %v8278_v10 = vld [vmem:[%s10135_s1 + $0x124] ss:$784 sps:$4 sm:$0xff]  }
  0xed   :  { %v422_v41 = vcombine.high %v420_v39, %v420_v39  ;;  %v1215_v48 = vpack.c.bf16 %v421_v40, %v421_v40  ;;  %v8294_v40 = vld [vmem:[%s10135_s1 + $0x13c] ss:$784 sps:$4 sm:$0xff]  }
  0xf2   :  { %v3888_v57 = vpop.f32.mrf.mxu0  ;;  %v3928_v58 = vpop.f32.mrf.mxu1  ;;  %4847 = vmatmul.mubr.bf16.vlgmr.msra.gmra.mxu0 %v1202_v49  ;;  %4887 = vmatmul.mubr.bf16.vlgmr.msra.gmra.mxu1 %v1204_v50  ;;  %v1217_v49 = vpack.c.bf16 %v422_v41, %v422_v41 }
  0xf3   :  { %v3889_v60 = vadd.f32 %v3888_v57, %v3849_v35  ;;  %4907 = vmatpush1.bf16.xpose.msra.mxu0 %v8231_v51  ;;  %4947 = vmatpush1.bf16.xpose.msra.mxu1 %v8234_v52  ;;  %v37_v52 = vld [vmem:[%s10136_s0 + $0x90] sm:$0xff] }
  0xf4   :  { %v3890_v61 = vpop.f32.mrf.mxu0  ;;  %v3930_v62 = vpop.f32.mrf.mxu1  ;;  %4908 = vmatprep.subr.bf16.mxu0 %v8239_v53  ;;  %4948 = vmatprep.subr.bf16.mxu1 %v8242_v54  ;;  %v423_v57 = vcombine.high %v37_v52, %v37_v52 }
  0xf5   :  { %v3929_v63 = vadd.f32 %v3928_v58, %v3889_v60  ;;  %4926 = vmatprep.mubr.bf16.mxu0 %v1207_v55  ;;  %4966 = vmatprep.mubr.bf16.mxu1 %v1209_v56  ;;  %v8263_v60 = vld [vmem:[%s10135_s1 + $0x110] ss:$784 sps:$4 sm:$0xff]   ;;  %v8266_v61 = vld [vmem:[%s10135_s1 + $0x118] ss:$784 sps:$4 sm:$0xff]  }
  0xf6   :  { %v3891_v1 = vpop.f32.mrf.mxu0  ;;  %v3931_v2 = vpop.f32.mrf.mxu1 }
  0xf7   :  { %v8275_v1 = vld [vmem:[%s10135_s1 + $0x74c] ss:$784 sps:$4 sm:$0xff]   ;;  %v430_v2 = vrot.slane %v37_v52, %v8721_v11 }
  0xf8   :  { %v3892_v5 = vpop.f32.mrf.mxu0  ;;  %v3932_v6 = vpop.f32.mrf.mxu1 }
  0xf9   :  { %v1214_v6 = vpack.c.bf16 %v413_v38, %v413_v38  ;;  %v8286_v38 = vld [vmem:[%s10135_s1 + $0x758] ss:$784 sps:$4 sm:$0xff]  }
  0xfb   :  { %4909 = vmatpush1.bf16.xpose.msra.mxu0 %v8237_v3  ;;  %4949 = vmatpush1.bf16.xpose.msra.mxu1 %v8240_v4  ;;  %v437_v3 = vrot.slane %v423_v57, %v8721_v11  ;;  %v438_v4 = vcombine.high %v430_v2, %v430_v2  ;;  %v8298_v57 = vld [vmem:[%s10135_s1 + $0x764] ss:$784 sps:$4 sm:$0xff]  }
  0xfc   :  { %4986 = vmatprep.subr.bf16.mxu0 %v8246_v7  ;;  %5026 = vmatprep.subr.bf16.mxu1 %v8249_v8  ;;  %v1216_v7 = vpack.c.bf16 %v420_v39, %v420_v39  ;;  %v8270_v8 = vld [vmem:[%s10135_s1 + $0x740] ss:$784 sps:$4 sm:$0xff]   ;;  %v8291_v39 = vld [vmem:[%s10135_s1 + $0x134] ss:$784 sps:$4 sm:$0xff]  }
  0xfd   :  { %v439_v5 = vcombine.high %v437_v3, %v437_v3  ;;  %v1219_v13 = vpack.c.bf16 %v438_v4, %v438_v4  ;;  %v8307_v4 = vld [vmem:[%s10135_s1 + $0x14c] ss:$784 sps:$4 sm:$0xff]  }
 0x102   :  { %v3968_v22 = vpop.f32.mrf.mxu0  ;;  %v4008_v23 = vpop.f32.mrf.mxu1  ;;  %4927 = vmatmul.mubr.bf16.vlgmr.msra.gmra.mxu0 %v1206_v14  ;;  %4967 = vmatmul.mubr.bf16.vlgmr.msra.gmra.mxu1 %v1208_v15  ;;  %v1221_v14 = vpack.c.bf16 %v439_v5, %v439_v5 }
 0x103   :  { %v3969_v25 = vadd.f32 %v3968_v22, %v3929_v63  ;;  %4987 = vmatpush1.bf16.xpose.msra.mxu0 %v8244_v16  ;;  %5027 = vmatpush1.bf16.xpose.msra.mxu1 %v8247_v17  ;;  %v38_v17 = vld [vmem:[%s10136_s0 + $0x98] sm:$0xff] }
 0x104   :  { %v3970_v26 = vpop.f32.mrf.mxu0  ;;  %v4010_v27 = vpop.f32.mrf.mxu1  ;;  %4988 = vmatprep.subr.bf16.mxu0 %v8252_v18  ;;  %5028 = vmatprep.subr.bf16.mxu1 %v8255_v19  ;;  %v440_v22 = vcombine.high %v38_v17, %v38_v17 }
 0x105   :  { %v4009_v28 = vadd.f32 %v4008_v23, %v3969_v25  ;;  %5006 = vmatprep.mubr.bf16.mxu0 %v1211_v20  ;;  %5046 = vmatprep.mubr.bf16.mxu1 %v1213_v21  ;;  %v8276_v25 = vld [vmem:[%s10135_s1 + $0x120] ss:$784 sps:$4 sm:$0xff]   ;;  %v8279_v26 = vld [vmem:[%s10135_s1 + $0x128] ss:$784 sps:$4 sm:$0xff]  }
 0x106   :  { %v3971_v30 = vpop.f32.mrf.mxu0  ;;  %v4011_v31 = vpop.f32.mrf.mxu1 }
 0x107   :  { %v8288_v30 = vld [vmem:[%s10135_s1 + $0x75c] ss:$784 sps:$4 sm:$0xff]   ;;  %v447_v31 = vrot.slane %v38_v17, %v8721_v11 }
 0x108   :  { %v3972_v34 = vpop.f32.mrf.mxu0  ;;  %v4012_v35 = vpop.f32.mrf.mxu1 }
 0x109   :  { %v1218_v35 = vpack.c.bf16 %v430_v2, %v430_v2  ;;  %v8299_v2 = vld [vmem:[%s10135_s1 + $0x768] ss:$784 sps:$4 sm:$0xff]  }
 0x10b   :  { %4989 = vmatpush1.bf16.xpose.msra.mxu0 %v8250_v32  ;;  %5029 = vmatpush1.bf16.xpose.msra.mxu1 %v8253_v33  ;;  %v454_v32 = vrot.slane %v440_v22, %v8721_v11  ;;  %v455_v33 = vcombine.high %v447_v31, %v447_v31  ;;  %v8311_v22 = vld [vmem:[%s10135_s1 + $0x774] ss:$784 sps:$4 sm:$0xff]  }
 0x10c   :  { %5066 = vmatprep.subr.bf16.mxu0 %v8259_v36  ;;  %5106 = vmatprep.subr.bf16.mxu1 %v8262_v37  ;;  %v1220_v36 = vpack.c.bf16 %v437_v3, %v437_v3  ;;  %v8283_v37 = vld [vmem:[%s10135_s1 + $0x750] ss:$784 sps:$4 sm:$0xff]   ;;  %v8304_v3 = vld [vmem:[%s10135_s1 + $0x144] ss:$784 sps:$4 sm:$0xff]  }
 0x10d   :  { %v456_v34 = vcombine.high %v454_v32, %v454_v32  ;;  %v1223_v41 = vpack.c.bf16 %v455_v33, %v455_v33  ;;  %v8320_v33 = vld [vmem:[%s10135_s1 + $0x15c] ss:$784 sps:$4 sm:$0xff]  }
 0x112   :  { %v4048_v50 = vpop.f32.mrf.mxu0  ;;  %v4088_v51 = vpop.f32.mrf.mxu1  ;;  %5007 = vmatmul.mubr.bf16.vlgmr.msra.gmra.mxu0 %v1210_v42  ;;  %5047 = vmatmul.mubr.bf16.vlgmr.msra.gmra.mxu1 %v1212_v43  ;;  %v1225_v42 = vpack.c.bf16 %v456_v34, %v456_v34 }
 0x113   :  { %v4049_v53 = vadd.f32 %v4048_v50, %v4009_v28  ;;  %5067 = vmatpush1.bf16.xpose.msra.mxu0 %v8257_v44  ;;  %5107 = vmatpush1.bf16.xpose.msra.mxu1 %v8260_v45  ;;  %v39_v45 = vld [vmem:[%s10136_s0 + $0xa0] sm:$0xff] }
 0x114   :  { %v4050_v54 = vpop.f32.mrf.mxu0  ;;  %v4090_v55 = vpop.f32.mrf.mxu1  ;;  %5068 = vmatprep.subr.bf16.mxu0 %v8265_v46  ;;  %5108 = vmatprep.subr.bf16.mxu1 %v8268_v47  ;;  %v457_v50 = vcombine.high %v39_v45, %v39_v45 }
 0x115   :  { %v4089_v56 = vadd.f32 %v4088_v51, %v4049_v53  ;;  %5086 = vmatprep.mubr.bf16.mxu0 %v1215_v48  ;;  %5126 = vmatprep.mubr.bf16.mxu1 %v1217_v49  ;;  %v8289_v53 = vld [vmem:[%s10135_s1 + $0x130] ss:$784 sps:$4 sm:$0xff]   ;;  %v8292_v54 = vld [vmem:[%s10135_s1 + $0x138] ss:$784 sps:$4 sm:$0xff]  }
 0x116   :  { %v4051_v58 = vpop.f32.mrf.mxu0  ;;  %v4091_v59 = vpop.f32.mrf.mxu1 }
 0x117   :  { %v8301_v58 = vld [vmem:[%s10135_s1 + $0x76c] ss:$784 sps:$4 sm:$0xff]   ;;  %v464_v59 = vrot.slane %v39_v45, %v8721_v11 }
 0x118   :  { %v4052_v62 = vpop.f32.mrf.mxu0  ;;  %v4092_v63 = vpop.f32.mrf.mxu1 }
 0x119   :  { %v1222_v63 = vpack.c.bf16 %v447_v31, %v447_v31  ;;  %v8312_v31 = vld [vmem:[%s10135_s1 + $0x778] ss:$784 sps:$4 sm:$0xff]  }
 0x11b   :  { %5069 = vmatpush1.bf16.xpose.msra.mxu0 %v8263_v60  ;;  %5109 = vmatpush1.bf16.xpose.msra.mxu1 %v8266_v61  ;;  %v471_v60 = vrot.slane %v457_v50, %v8721_v11  ;;  %v472_v61 = vcombine.high %v464_v59, %v464_v59  ;;  %v8324_v50 = vld [vmem:[%s10135_s1 + $0x784] ss:$784 sps:$4 sm:$0xff]  }
 0x11c   :  { %5146 = vmatprep.subr.bf16.mxu0 %v8272_v0  ;;  %5186 = vmatprep.subr.bf16.mxu1 %v8275_v1  ;;  %v1224_v0 = vpack.c.bf16 %v454_v32, %v454_v32  ;;  %v8296_v1 = vld [vmem:[%s10135_s1 + $0x760] ss:$784 sps:$4 sm:$0xff]   ;;  %v8317_v32 = vld [vmem:[%s10135_s1 + $0x154] ss:$784 sps:$4 sm:$0xff]  }
 0x11d   :  { %v473_v62 = vcombine.high %v471_v60, %v471_v60  ;;  %v1227_v5 = vpack.c.bf16 %v472_v61, %v472_v61  ;;  %v8333_v61 = vld [vmem:[%s10135_s1 + $0x16c] ss:$784 sps:$4 sm:$0xff]  }
 0x122   :  { %v4128_v15 = vpop.f32.mrf.mxu0  ;;  %v4168_v16 = vpop.f32.mrf.mxu1  ;;  %5087 = vmatmul.mubr.bf16.vlgmr.msra.gmra.mxu0 %v1214_v6  ;;  %5127 = vmatmul.mubr.bf16.vlgmr.msra.gmra.mxu1 %v1216_v7  ;;  %v1229_v6 = vpack.c.bf16 %v473_v62, %v473_v62 }
 0x123   :  { %v4129_v18 = vadd.f32 %v4128_v15, %v4089_v56  ;;  %5147 = vmatpush1.bf16.xpose.msra.mxu0 %v8270_v8  ;;  %5187 = vmatpush1.bf16.xpose.msra.mxu1 %v8273_v9  ;;  %v40_v9 = vld [vmem:[%s10136_s0 + $0xa8] sm:$0xff] }
 0x124   :  { %v4130_v19 = vpop.f32.mrf.mxu0  ;;  %v4170_v20 = vpop.f32.mrf.mxu1  ;;  %5148 = vmatprep.subr.bf16.mxu0 %v8278_v10  ;;  %5188 = vmatprep.subr.bf16.mxu1 %v8281_v12  ;;  %v474_v15 = vcombine.high %v40_v9, %v40_v9 }
 0x125   :  { %v4169_v21 = vadd.f32 %v4168_v16, %v4129_v18  ;;  %5166 = vmatprep.mubr.bf16.mxu0 %v1219_v13  ;;  %5206 = vmatprep.mubr.bf16.mxu1 %v1221_v14  ;;  %v8302_v18 = vld [vmem:[%s10135_s1 + $0x140] ss:$784 sps:$4 sm:$0xff]   ;;  %v8305_v19 = vld [vmem:[%s10135_s1 + $0x148] ss:$784 sps:$4 sm:$0xff]  }
 0x126   :  { %v4131_v23 = vpop.f32.mrf.mxu0  ;;  %v4171_v24 = vpop.f32.mrf.mxu1 }
 0x127   :  { %v8314_v23 = vld [vmem:[%s10135_s1 + $0x77c] ss:$784 sps:$4 sm:$0xff]   ;;  %v481_v24 = vrot.slane %v40_v9, %v8721_v11 }
 0x128   :  { %v4132_v27 = vpop.f32.mrf.mxu0  ;;  %v4172_v28 = vpop.f32.mrf.mxu1 }
 0x129   :  { %v1226_v28 = vpack.c.bf16 %v464_v59, %v464_v59  ;;  %v8325_v59 = vld [vmem:[%s10135_s1 + $0x788] ss:$784 sps:$4 sm:$0xff]  }
 0x12b   :  { %5149 = vmatpush1.bf16.xpose.msra.mxu0 %v8276_v25  ;;  %5189 = vmatpush1.bf16.xpose.msra.mxu1 %v8279_v26  ;;  %v488_v25 = vrot.slane %v474_v15, %v8721_v11  ;;  %v489_v26 = vcombine.high %v481_v24, %v481_v24  ;;  %v8337_v15 = vld [vmem:[%s10135_s1 + $0x794] ss:$784 sps:$4 sm:$0xff]  }
 0x12c   :  { %5226 = vmatprep.subr.bf16.mxu0 %v8285_v29  ;;  %5266 = vmatprep.subr.bf16.mxu1 %v8288_v30  ;;  %v1228_v29 = vpack.c.bf16 %v471_v60, %v471_v60  ;;  %v8309_v30 = vld [vmem:[%s10135_s1 + $0x770] ss:$784 sps:$4 sm:$0xff]   ;;  %v8330_v60 = vld [vmem:[%s10135_s1 + $0x164] ss:$784 sps:$4 sm:$0xff]  }
 0x12d   :  { %v490_v27 = vcombine.high %v488_v25, %v488_v25  ;;  %v1231_v34 = vpack.c.bf16 %v489_v26, %v489_v26  ;;  %v8346_v26 = vld [vmem:[%s10135_s1 + $0x17c] ss:$784 sps:$4 sm:$0xff]  }
 0x132   :  { %v4208_v43 = vpop.f32.mrf.mxu0  ;;  %v4248_v44 = vpop.f32.mrf.mxu1  ;;  %5167 = vmatmul.mubr.bf16.vlgmr.msra.gmra.mxu0 %v1218_v35  ;;  %5207 = vmatmul.mubr.bf16.vlgmr.msra.gmra.mxu1 %v1220_v36  ;;  %v1233_v35 = vpack.c.bf16 %v490_v27, %v490_v27 }
 0x133   :  { %v4209_v46 = vadd.f32 %v4208_v43, %v4169_v21  ;;  %5227 = vmatpush1.bf16.xpose.msra.mxu0 %v8283_v37  ;;  %5267 = vmatpush1.bf16.xpose.msra.mxu1 %v8286_v38  ;;  %v41_v38 = vld [vmem:[%s10136_s0 + $0xb0] sm:$0xff] }
 0x134   :  { %v4210_v47 = vpop.f32.mrf.mxu0  ;;  %v4250_v48 = vpop.f32.mrf.mxu1  ;;  %5228 = vmatprep.subr.bf16.mxu0 %v8291_v39  ;;  %5268 = vmatprep.subr.bf16.mxu1 %v8294_v40  ;;  %v491_v43 = vcombine.high %v41_v38, %v41_v38 }
 0x135   :  { %v4249_v49 = vadd.f32 %v4248_v44, %v4209_v46  ;;  %5246 = vmatprep.mubr.bf16.mxu0 %v1223_v41  ;;  %5286 = vmatprep.mubr.bf16.mxu1 %v1225_v42  ;;  %v8315_v46 = vld [vmem:[%s10135_s1 + $0x150] ss:$784 sps:$4 sm:$0xff]   ;;  %v8318_v47 = vld [vmem:[%s10135_s1 + $0x158] ss:$784 sps:$4 sm:$0xff]  }
 0x136   :  { %v4211_v51 = vpop.f32.mrf.mxu0  ;;  %v4251_v52 = vpop.f32.mrf.mxu1 }
 0x137   :  { %v8327_v51 = vld [vmem:[%s10135_s1 + $0x78c] ss:$784 sps:$4 sm:$0xff]   ;;  %v498_v52 = vrot.slane %v41_v38, %v8721_v11 }
 0x138   :  { %v4212_v55 = vpop.f32.mrf.mxu0  ;;  %v4252_v56 = vpop.f32.mrf.mxu1 }
 0x139   :  { %v1230_v56 = vpack.c.bf16 %v481_v24, %v481_v24  ;;  %v8338_v24 = vld [vmem:[%s10135_s1 + $0x798] ss:$784 sps:$4 sm:$0xff]  }
 0x13b   :  { %5229 = vmatpush1.bf16.xpose.msra.mxu0 %v8289_v53  ;;  %5269 = vmatpush1.bf16.xpose.msra.mxu1 %v8292_v54  ;;  %v505_v53 = vrot.slane %v491_v43, %v8721_v11  ;;  %v506_v54 = vcombine.high %v498_v52, %v498_v52  ;;  %v8350_v43 = vld [vmem:[%s10135_s1 + $0x7a4] ss:$784 sps:$4 sm:$0xff]  }
 0x13c   :  { %5306 = vmatprep.subr.bf16.mxu0 %v8298_v57  ;;  %5346 = vmatprep.subr.bf16.mxu1 %v8301_v58  ;;  %v1232_v57 = vpack.c.bf16 %v488_v25, %v488_v25  ;;  %v8322_v58 = vld [vmem:[%s10135_s1 + $0x780] ss:$784 sps:$4 sm:$0xff]   ;;  %v8343_v25 = vld [vmem:[%s10135_s1 + $0x174] ss:$784 sps:$4 sm:$0xff]  }
 0x13d   :  { %v507_v55 = vcombine.high %v505_v53, %v505_v53  ;;  %v1235_v62 = vpack.c.bf16 %v506_v54, %v506_v54  ;;  %v8359_v54 = vld [vmem:[%s10135_s1 + $0x18c] ss:$784 sps:$4 sm:$0xff]  }
 0x142   :  { %v4288_v7 = vpop.f32.mrf.mxu0  ;;  %v4328_v8 = vpop.f32.mrf.mxu1  ;;  %5247 = vmatmul.mubr.bf16.vlgmr.msra.gmra.mxu0 %v1222_v63  ;;  %5287 = vmatmul.mubr.bf16.vlgmr.msra.gmra.mxu1 %v1224_v0  ;;  %v1237_v63 = vpack.c.bf16 %v507_v55, %v507_v55 }
 0x143   :  { %v4289_v10 = vadd.f32 %v4288_v7, %v4249_v49  ;;  %5307 = vmatpush1.bf16.xpose.msra.mxu0 %v8296_v1  ;;  %5347 = vmatpush1.bf16.xpose.msra.mxu1 %v8299_v2  ;;  %v42_v2 = vld [vmem:[%s10136_s0 + $0xb8] sm:$0xff] }
 0x144   :  { %v4290_v12 = vpop.f32.mrf.mxu0  ;;  %v4330_v13 = vpop.f32.mrf.mxu1  ;;  %5308 = vmatprep.subr.bf16.mxu0 %v8304_v3  ;;  %5348 = vmatprep.subr.bf16.mxu1 %v8307_v4  ;;  %v508_v7 = vcombine.high %v42_v2, %v42_v2 }
 0x145   :  { %v4329_v14 = vadd.f32 %v4328_v8, %v4289_v10  ;;  %5326 = vmatprep.mubr.bf16.mxu0 %v1227_v5  ;;  %5366 = vmatprep.mubr.bf16.mxu1 %v1229_v6  ;;  %v8328_v10 = vld [vmem:[%s10135_s1 + $0x160] ss:$784 sps:$4 sm:$0xff]   ;;  %v8331_v12 = vld [vmem:[%s10135_s1 + $0x168] ss:$784 sps:$4 sm:$0xff]  }
 0x146   :  { %v4291_v16 = vpop.f32.mrf.mxu0  ;;  %v4331_v17 = vpop.f32.mrf.mxu1 }
 0x147   :  { %v8340_v16 = vld [vmem:[%s10135_s1 + $0x79c] ss:$784 sps:$4 sm:$0xff]   ;;  %v515_v17 = vrot.slane %v42_v2, %v8721_v11 }
 0x148   :  { %v4292_v20 = vpop.f32.mrf.mxu0  ;;  %v4332_v21 = vpop.f32.mrf.mxu1 }
 0x149   :  { %v1234_v21 = vpack.c.bf16 %v498_v52, %v498_v52  ;;  %v8351_v52 = vld [vmem:[%s10135_s1 + $0x7a8] ss:$784 sps:$4 sm:$0xff]  }
 0x14b   :  { %5309 = vmatpush1.bf16.xpose.msra.mxu0 %v8302_v18  ;;  %5349 = vmatpush1.bf16.xpose.msra.mxu1 %v8305_v19  ;;  %v522_v18 = vrot.slane %v508_v7, %v8721_v11  ;;  %v523_v19 = vcombine.high %v515_v17, %v515_v17  ;;  %v8363_v7 = vld [vmem:[%s10135_s1 + $0x7b4] ss:$784 sps:$4 sm:$0xff]  }
 0x14c   :  { %5386 = vmatprep.subr.bf16.mxu0 %v8311_v22  ;;  %5426 = vmatprep.subr.bf16.mxu1 %v8314_v23  ;;  %v1236_v22 = vpack.c.bf16 %v505_v53, %v505_v53  ;;  %v8335_v23 = vld [vmem:[%s10135_s1 + $0x790] ss:$784 sps:$4 sm:$0xff]   ;;  %v8356_v53 = vld [vmem:[%s10135_s1 + $0x184] ss:$784 sps:$4 sm:$0xff]  }
 0x14d   :  { %v524_v20 = vcombine.high %v522_v18, %v522_v18  ;;  %v1239_v27 = vpack.c.bf16 %v523_v19, %v523_v19  ;;  %v8372_v19 = vld [vmem:[%s10135_s1 + $0x19c] ss:$784 sps:$4 sm:$0xff]  }
 0x152   :  { %v4368_v36 = vpop.f32.mrf.mxu0  ;;  %v4408_v37 = vpop.f32.mrf.mxu1  ;;  %5327 = vmatmul.mubr.bf16.vlgmr.msra.gmra.mxu0 %v1226_v28  ;;  %5367 = vmatmul.mubr.bf16.vlgmr.msra.gmra.mxu1 %v1228_v29  ;;  %v1241_v28 = vpack.c.bf16 %v524_v20, %v524_v20 }
 0x153   :  { %v4369_v39 = vadd.f32 %v4368_v36, %v4329_v14  ;;  %5387 = vmatpush1.bf16.xpose.msra.mxu0 %v8309_v30  ;;  %5427 = vmatpush1.bf16.xpose.msra.mxu1 %v8312_v31  ;;  %v43_v31 = vld [vmem:[%s10136_s0 + $0xc0] sm:$0xff] }
 0x154   :  { %v4370_v40 = vpop.f32.mrf.mxu0  ;;  %v4410_v41 = vpop.f32.mrf.mxu1  ;;  %5388 = vmatprep.subr.bf16.mxu0 %v8317_v32  ;;  %5428 = vmatprep.subr.bf16.mxu1 %v8320_v33  ;;  %v525_v36 = vcombine.high %v43_v31, %v43_v31 }
 0x155   :  { %v4409_v42 = vadd.f32 %v4408_v37, %v4369_v39  ;;  %5406 = vmatprep.mubr.bf16.mxu0 %v1231_v34  ;;  %5446 = vmatprep.mubr.bf16.mxu1 %v1233_v35  ;;  %v8341_v39 = vld [vmem:[%s10135_s1 + $0x170] ss:$784 sps:$4 sm:$0xff]   ;;  %v8344_v40 = vld [vmem:[%s10135_s1 + $0x178] ss:$784 sps:$4 sm:$0xff]  }
 0x156   :  { %v4371_v44 = vpop.f32.mrf.mxu0  ;;  %v4411_v45 = vpop.f32.mrf.mxu1 }
 0x157   :  { %v8353_v44 = vld [vmem:[%s10135_s1 + $0x7ac] ss:$784 sps:$4 sm:$0xff]   ;;  %v532_v45 = vrot.slane %v43_v31, %v8721_v11 }
 0x158   :  { %v4372_v48 = vpop.f32.mrf.mxu0  ;;  %v4412_v49 = vpop.f32.mrf.mxu1 }
 0x159   :  { %v1238_v49 = vpack.c.bf16 %v515_v17, %v515_v17  ;;  %v8364_v17 = vld [vmem:[%s10135_s1 + $0x7b8] ss:$784 sps:$4 sm:$0xff]  }
 0x15b   :  { %5389 = vmatpush1.bf16.xpose.msra.mxu0 %v8315_v46  ;;  %5429 = vmatpush1.bf16.xpose.msra.mxu1 %v8318_v47  ;;  %v539_v46 = vrot.slane %v525_v36, %v8721_v11  ;;  %v540_v47 = vcombine.high %v532_v45, %v532_v45  ;;  %v8376_v36 = vld [vmem:[%s10135_s1 + $0x7c4] ss:$784 sps:$4 sm:$0xff]  }
 0x15c   :  { %5466 = vmatprep.subr.bf16.mxu0 %v8324_v50  ;;  %5506 = vmatprep.subr.bf16.mxu1 %v8327_v51  ;;  %v1240_v50 = vpack.c.bf16 %v522_v18, %v522_v18  ;;  %v8348_v51 = vld [vmem:[%s10135_s1 + $0x7a0] ss:$784 sps:$4 sm:$0xff]   ;;  %v8369_v18 = vld [vmem:[%s10135_s1 + $0x194] ss:$784 sps:$4 sm:$0xff]  }
 0x15d   :  { %v541_v48 = vcombine.high %v539_v46, %v539_v46  ;;  %v1243_v55 = vpack.c.bf16 %v540_v47, %v540_v47  ;;  %v8385_v47 = vld [vmem:[%s10135_s1 + $0x1ac] ss:$784 sps:$4 sm:$0xff]  }
 0x162   :  { %v4448_v0 = vpop.f32.mrf.mxu0  ;;  %v4488_v1 = vpop.f32.mrf.mxu1  ;;  %5407 = vmatmul.mubr.bf16.vlgmr.msra.gmra.mxu0 %v1230_v56  ;;  %5447 = vmatmul.mubr.bf16.vlgmr.msra.gmra.mxu1 %v1232_v57  ;;  %v1245_v56 = vpack.c.bf16 %v541_v48, %v541_v48 }
 0x163   :  { %v4449_v3 = vadd.f32 %v4448_v0, %v4409_v42  ;;  %5467 = vmatpush1.bf16.xpose.msra.mxu0 %v8322_v58  ;;  %5507 = vmatpush1.bf16.xpose.msra.mxu1 %v8325_v59  ;;  %v44_v59 = vld [vmem:[%s10136_s0 + $0xc8] sm:$0xff] }
 0x164   :  { %v4450_v4 = vpop.f32.mrf.mxu0  ;;  %v4490_v5 = vpop.f32.mrf.mxu1  ;;  %5468 = vmatprep.subr.bf16.mxu0 %v8330_v60  ;;  %5508 = vmatprep.subr.bf16.mxu1 %v8333_v61  ;;  %v542_v0 = vcombine.high %v44_v59, %v44_v59 }
 0x165   :  { %v4489_v6 = vadd.f32 %v4488_v1, %v4449_v3  ;;  %5486 = vmatprep.mubr.bf16.mxu0 %v1235_v62  ;;  %5526 = vmatprep.mubr.bf16.mxu1 %v1237_v63  ;;  %v8354_v3 = vld [vmem:[%s10135_s1 + $0x180] ss:$784 sps:$4 sm:$0xff]   ;;  %v8357_v4 = vld [vmem:[%s10135_s1 + $0x188] ss:$784 sps:$4 sm:$0xff]  }
 0x166   :  { %v4451_v8 = vpop.f32.mrf.mxu0  ;;  %v4491_v9 = vpop.f32.mrf.mxu1 }
 0x167   :  { %v8366_v8 = vld [vmem:[%s10135_s1 + $0x7bc] ss:$784 sps:$4 sm:$0xff]   ;;  %v549_v9 = vrot.slane %v44_v59, %v8721_v11 }
 0x168   :  { %v4452_v13 = vpop.f32.mrf.mxu0  ;;  %v4492_v14 = vpop.f32.mrf.mxu1 }
 0x169   :  { %v1242_v14 = vpack.c.bf16 %v532_v45, %v532_v45  ;;  %v8377_v45 = vld [vmem:[%s10135_s1 + $0x7c8] ss:$784 sps:$4 sm:$0xff]  }
 0x16b   :  { %5469 = vmatpush1.bf16.xpose.msra.mxu0 %v8328_v10  ;;  %5509 = vmatpush1.bf16.xpose.msra.mxu1 %v8331_v12  ;;  %v556_v10 = vrot.slane %v542_v0, %v8721_v11  ;;  %v557_v12 = vcombine.high %v549_v9, %v549_v9  ;;  %v8389_v0 = vld [vmem:[%s10135_s1 + $0x7d4] ss:$784 sps:$4 sm:$0xff]  }
 0x16c   :  { %5546 = vmatprep.subr.bf16.mxu0 %v8337_v15  ;;  %5586 = vmatprep.subr.bf16.mxu1 %v8340_v16  ;;  %v1244_v15 = vpack.c.bf16 %v539_v46, %v539_v46  ;;  %v8361_v16 = vld [vmem:[%s10135_s1 + $0x7b0] ss:$784 sps:$4 sm:$0xff]   ;;  %v8382_v46 = vld [vmem:[%s10135_s1 + $0x1a4] ss:$784 sps:$4 sm:$0xff]  }
 0x16d   :  { %v558_v13 = vcombine.high %v556_v10, %v556_v10  ;;  %v1247_v20 = vpack.c.bf16 %v557_v12, %v557_v12  ;;  %v8398_v12 = vld [vmem:[%s10135_s1 + $0x1bc] ss:$784 sps:$4 sm:$0xff]  }
 0x172   :  { %v4528_v29 = vpop.f32.mrf.mxu0  ;;  %v4568_v30 = vpop.f32.mrf.mxu1  ;;  %5487 = vmatmul.mubr.bf16.vlgmr.msra.gmra.mxu0 %v1234_v21  ;;  %5527 = vmatmul.mubr.bf16.vlgmr.msra.gmra.mxu1 %v1236_v22  ;;  %v1249_v21 = vpack.c.bf16 %v558_v13, %v558_v13 }
 0x173   :  { %v4529_v32 = vadd.f32 %v4528_v29, %v4489_v6  ;;  %5547 = vmatpush1.bf16.xpose.msra.mxu0 %v8335_v23  ;;  %5587 = vmatpush1.bf16.xpose.msra.mxu1 %v8338_v24  ;;  %v45_v24 = vld [vmem:[%s10136_s0 + $0xd0] sm:$0xff] }
 0x174   :  { %v4530_v33 = vpop.f32.mrf.mxu0  ;;  %v4570_v34 = vpop.f32.mrf.mxu1  ;;  %5548 = vmatprep.subr.bf16.mxu0 %v8343_v25  ;;  %5588 = vmatprep.subr.bf16.mxu1 %v8346_v26  ;;  %v559_v29 = vcombine.high %v45_v24, %v45_v24 }
 0x175   :  { %v4569_v35 = vadd.f32 %v4568_v30, %v4529_v32  ;;  %5566 = vmatprep.mubr.bf16.mxu0 %v1239_v27  ;;  %5606 = vmatprep.mubr.bf16.mxu1 %v1241_v28  ;;  %v8367_v32 = vld [vmem:[%s10135_s1 + $0x190] ss:$784 sps:$4 sm:$0xff]   ;;  %v8370_v33 = vld [vmem:[%s10135_s1 + $0x198] ss:$784 sps:$4 sm:$0xff]  }
 0x176   :  { %v4531_v37 = vpop.f32.mrf.mxu0  ;;  %v4571_v38 = vpop.f32.mrf.mxu1 }
 0x177   :  { %v8379_v37 = vld [vmem:[%s10135_s1 + $0x7cc] ss:$784 sps:$4 sm:$0xff]   ;;  %v566_v38 = vrot.slane %v45_v24, %v8721_v11 }
 0x178   :  { %v4532_v41 = vpop.f32.mrf.mxu0  ;;  %v4572_v42 = vpop.f32.mrf.mxu1 }
 0x179   :  { %v1246_v42 = vpack.c.bf16 %v549_v9, %v549_v9  ;;  %v8390_v9 = vld [vmem:[%s10135_s1 + $0x7d8] ss:$784 sps:$4 sm:$0xff]  }
 0x17b   :  { %5549 = vmatpush1.bf16.xpose.msra.mxu0 %v8341_v39  ;;  %5589 = vmatpush1.bf16.xpose.msra.mxu1 %v8344_v40  ;;  %v573_v39 = vrot.slane %v559_v29, %v8721_v11  ;;  %v574_v40 = vcombine.high %v566_v38, %v566_v38  ;;  %v8402_v29 = vld [vmem:[%s10135_s1 + $0x7e4] ss:$784 sps:$4 sm:$0xff]  }
 0x17c   :  { %5626 = vmatprep.subr.bf16.mxu0 %v8350_v43  ;;  %5666 = vmatprep.subr.bf16.mxu1 %v8353_v44  ;;  %v1248_v43 = vpack.c.bf16 %v556_v10, %v556_v10  ;;  %v8374_v44 = vld [vmem:[%s10135_s1 + $0x7c0] ss:$784 sps:$4 sm:$0xff]   ;;  %v8395_v10 = vld [vmem:[%s10135_s1 + $0x1b4] ss:$784 sps:$4 sm:$0xff]  }
 0x17d   :  { %v575_v41 = vcombine.high %v573_v39, %v573_v39  ;;  %v1251_v48 = vpack.c.bf16 %v574_v40, %v574_v40  ;;  %v8411_v40 = vld [vmem:[%s10135_s1 + $0x1cc] ss:$784 sps:$4 sm:$0xff]  }
 0x182   :  { %v4608_v57 = vpop.f32.mrf.mxu0  ;;  %v4648_v58 = vpop.f32.mrf.mxu1  ;;  %5567 = vmatmul.mubr.bf16.vlgmr.msra.gmra.mxu0 %v1238_v49  ;;  %5607 = vmatmul.mubr.bf16.vlgmr.msra.gmra.mxu1 %v1240_v50  ;;  %v1253_v49 = vpack.c.bf16 %v575_v41, %v575_v41 }
 0x183   :  { %v4609_v60 = vadd.f32 %v4608_v57, %v4569_v35  ;;  %5627 = vmatpush1.bf16.xpose.msra.mxu0 %v8348_v51  ;;  %5667 = vmatpush1.bf16.xpose.msra.mxu1 %v8351_v52  ;;  %v46_v52 = vld [vmem:[%s10136_s0 + $0xd8] sm:$0xff] }
 0x184   :  { %v4610_v61 = vpop.f32.mrf.mxu0  ;;  %v4650_v62 = vpop.f32.mrf.mxu1  ;;  %5628 = vmatprep.subr.bf16.mxu0 %v8356_v53  ;;  %5668 = vmatprep.subr.bf16.mxu1 %v8359_v54  ;;  %v576_v57 = vcombine.high %v46_v52, %v46_v52 }
 0x185   :  { %v4649_v63 = vadd.f32 %v4648_v58, %v4609_v60  ;;  %5646 = vmatprep.mubr.bf16.mxu0 %v1243_v55  ;;  %5686 = vmatprep.mubr.bf16.mxu1 %v1245_v56  ;;  %v8380_v60 = vld [vmem:[%s10135_s1 + $0x1a0] ss:$784 sps:$4 sm:$0xff]   ;;  %v8383_v61 = vld [vmem:[%s10135_s1 + $0x1a8] ss:$784 sps:$4 sm:$0xff]  }
 0x186   :  { %v4611_v1 = vpop.f32.mrf.mxu0  ;;  %v4651_v2 = vpop.f32.mrf.mxu1 }
 0x187   :  { %v8392_v1 = vld [vmem:[%s10135_s1 + $0x7dc] ss:$784 sps:$4 sm:$0xff]   ;;  %v583_v2 = vrot.slane %v46_v52, %v8721_v11 }
 0x188   :  { %v4612_v5 = vpop.f32.mrf.mxu0  ;;  %v4652_v6 = vpop.f32.mrf.mxu1 }
 0x189   :  { %v1250_v6 = vpack.c.bf16 %v566_v38, %v566_v38  ;;  %v8403_v38 = vld [vmem:[%s10135_s1 + $0x7e8] ss:$784 sps:$4 sm:$0xff]  }
 0x18b   :  { %5629 = vmatpush1.bf16.xpose.msra.mxu0 %v8354_v3  ;;  %5669 = vmatpush1.bf16.xpose.msra.mxu1 %v8357_v4  ;;  %v590_v3 = vrot.slane %v576_v57, %v8721_v11  ;;  %v591_v4 = vcombine.high %v583_v2, %v583_v2  ;;  %v8415_v57 = vld [vmem:[%s10135_s1 + $0x7f4] ss:$784 sps:$4 sm:$0xff]  }
 0x18c   :  { %5706 = vmatprep.subr.bf16.mxu0 %v8363_v7  ;;  %5746 = vmatprep.subr.bf16.mxu1 %v8366_v8  ;;  %v1252_v7 = vpack.c.bf16 %v573_v39, %v573_v39  ;;  %v8387_v8 = vld [vmem:[%s10135_s1 + $0x7d0] ss:$784 sps:$4 sm:$0xff]   ;;  %v8408_v39 = vld [vmem:[%s10135_s1 + $0x1c4] ss:$784 sps:$4 sm:$0xff]  }
 0x18d   :  { %v592_v5 = vcombine.high %v590_v3, %v590_v3  ;;  %v1255_v13 = vpack.c.bf16 %v591_v4, %v591_v4  ;;  %v8424_v4 = vld [vmem:[%s10135_s1 + $0x1dc] ss:$784 sps:$4 sm:$0xff]  }
 0x192   :  { %v4688_v22 = vpop.f32.mrf.mxu0  ;;  %v4728_v23 = vpop.f32.mrf.mxu1  ;;  %5647 = vmatmul.mubr.bf16.vlgmr.msra.gmra.mxu0 %v1242_v14  ;;  %5687 = vmatmul.mubr.bf16.vlgmr.msra.gmra.mxu1 %v1244_v15  ;;  %v1257_v14 = vpack.c.bf16 %v592_v5, %v592_v5 }
 0x193   :  { %v4689_v25 = vadd.f32 %v4688_v22, %v4649_v63  ;;  %5707 = vmatpush1.bf16.xpose.msra.mxu0 %v8361_v16  ;;  %5747 = vmatpush1.bf16.xpose.msra.mxu1 %v8364_v17  ;;  %v47_v17 = vld [vmem:[%s10136_s0 + $0xe0] sm:$0xff] }
 0x194   :  { %v4690_v26 = vpop.f32.mrf.mxu0  ;;  %v4730_v27 = vpop.f32.mrf.mxu1  ;;  %5708 = vmatprep.subr.bf16.mxu0 %v8369_v18  ;;  %5748 = vmatprep.subr.bf16.mxu1 %v8372_v19  ;;  %v593_v22 = vcombine.high %v47_v17, %v47_v17 }
 0x195   :  { %v4729_v28 = vadd.f32 %v4728_v23, %v4689_v25  ;;  %5726 = vmatprep.mubr.bf16.mxu0 %v1247_v20  ;;  %5766 = vmatprep.mubr.bf16.mxu1 %v1249_v21  ;;  %v8393_v25 = vld [vmem:[%s10135_s1 + $0x1b0] ss:$784 sps:$4 sm:$0xff]   ;;  %v8396_v26 = vld [vmem:[%s10135_s1 + $0x1b8] ss:$784 sps:$4 sm:$0xff]  }
 0x196   :  { %v4691_v30 = vpop.f32.mrf.mxu0  ;;  %v4731_v31 = vpop.f32.mrf.mxu1 }
 0x197   :  { %v8405_v30 = vld [vmem:[%s10135_s1 + $0x7ec] ss:$784 sps:$4 sm:$0xff]   ;;  %v600_v31 = vrot.slane %v47_v17, %v8721_v11 }
 0x198   :  { %v4692_v34 = vpop.f32.mrf.mxu0  ;;  %v4732_v35 = vpop.f32.mrf.mxu1 }
 0x199   :  { %v1254_v35 = vpack.c.bf16 %v583_v2, %v583_v2  ;;  %v8416_v2 = vld [vmem:[%s10135_s1 + $0x7f8] ss:$784 sps:$4 sm:$0xff]  }
 0x19b   :  { %5709 = vmatpush1.bf16.xpose.msra.mxu0 %v8367_v32  ;;  %5749 = vmatpush1.bf16.xpose.msra.mxu1 %v8370_v33  ;;  %v607_v32 = vrot.slane %v593_v22, %v8721_v11  ;;  %v608_v33 = vcombine.high %v600_v31, %v600_v31  ;;  %v8428_v22 = vld [vmem:[%s10135_s1 + $0x804] ss:$784 sps:$4 sm:$0xff]  }
 0x19c   :  { %5786 = vmatprep.subr.bf16.mxu0 %v8376_v36  ;;  %5826 = vmatprep.subr.bf16.mxu1 %v8379_v37  ;;  %v1256_v36 = vpack.c.bf16 %v590_v3, %v590_v3  ;;  %v8400_v37 = vld [vmem:[%s10135_s1 + $0x7e0] ss:$784 sps:$4 sm:$0xff]   ;;  %v8421_v3 = vld [vmem:[%s10135_s1 + $0x1d4] ss:$784 sps:$4 sm:$0xff]  }
 0x19d   :  { %v609_v34 = vcombine.high %v607_v32, %v607_v32  ;;  %v1259_v41 = vpack.c.bf16 %v608_v33, %v608_v33  ;;  %v8437_v33 = vld [vmem:[%s10135_s1 + $0x1ec] ss:$784 sps:$4 sm:$0xff]  }
 0x1a2   :  { %v4768_v50 = vpop.f32.mrf.mxu0  ;;  %v4808_v51 = vpop.f32.mrf.mxu1  ;;  %5727 = vmatmul.mubr.bf16.vlgmr.msra.gmra.mxu0 %v1246_v42  ;;  %5767 = vmatmul.mubr.bf16.vlgmr.msra.gmra.mxu1 %v1248_v43  ;;  %v1261_v42 = vpack.c.bf16 %v609_v34, %v609_v34 }
 0x1a3   :  { %v4769_v53 = vadd.f32 %v4768_v50, %v4729_v28  ;;  %5787 = vmatpush1.bf16.xpose.msra.mxu0 %v8374_v44  ;;  %5827 = vmatpush1.bf16.xpose.msra.mxu1 %v8377_v45  ;;  %v48_v45 = vld [vmem:[%s10136_s0 + $0xe8] sm:$0xff] }
 0x1a4   :  { %v4770_v54 = vpop.f32.mrf.mxu0  ;;  %v4810_v55 = vpop.f32.mrf.mxu1  ;;  %5788 = vmatprep.subr.bf16.mxu0 %v8382_v46  ;;  %5828 = vmatprep.subr.bf16.mxu1 %v8385_v47  ;;  %v610_v50 = vcombine.high %v48_v45, %v48_v45 }
 0x1a5   :  { %v4809_v56 = vadd.f32 %v4808_v51, %v4769_v53  ;;  %5806 = vmatprep.mubr.bf16.mxu0 %v1251_v48  ;;  %5846 = vmatprep.mubr.bf16.mxu1 %v1253_v49  ;;  %v8406_v53 = vld [vmem:[%s10135_s1 + $0x1c0] ss:$784 sps:$4 sm:$0xff]   ;;  %v8409_v54 = vld [vmem:[%s10135_s1 + $0x1c8] ss:$784 sps:$4 sm:$0xff]  }
 0x1a6   :  { %v4771_v58 = vpop.f32.mrf.mxu0  ;;  %v4811_v59 = vpop.f32.mrf.mxu1 }
 0x1a7   :  { %v8418_v58 = vld [vmem:[%s10135_s1 + $0x7fc] ss:$784 sps:$4 sm:$0xff]   ;;  %v617_v59 = vrot.slane %v48_v45, %v8721_v11 }
 0x1a8   :  { %v4772_v62 = vpop.f32.mrf.mxu0  ;;  %v4812_v63 = vpop.f32.mrf.mxu1 }
 0x1a9   :  { %v1258_v63 = vpack.c.bf16 %v600_v31, %v600_v31  ;;  %v8429_v31 = vld [vmem:[%s10135_s1 + $0x808] ss:$784 sps:$4 sm:$0xff]  }
 0x1ab   :  { %5789 = vmatpush1.bf16.xpose.msra.mxu0 %v8380_v60  ;;  %5829 = vmatpush1.bf16.xpose.msra.mxu1 %v8383_v61  ;;  %v624_v60 = vrot.slane %v610_v50, %v8721_v11  ;;  %v625_v61 = vcombine.high %v617_v59, %v617_v59  ;;  %v8441_v50 = vld [vmem:[%s10135_s1 + $0x814] ss:$784 sps:$4 sm:$0xff]  }
 0x1ac   :  { %5866 = vmatprep.subr.bf16.mxu0 %v8389_v0  ;;  %5906 = vmatprep.subr.bf16.mxu1 %v8392_v1  ;;  %v1260_v0 = vpack.c.bf16 %v607_v32, %v607_v32  ;;  %v8413_v1 = vld [vmem:[%s10135_s1 + $0x7f0] ss:$784 sps:$4 sm:$0xff]   ;;  %v8434_v32 = vld [vmem:[%s10135_s1 + $0x1e4] ss:$784 sps:$4 sm:$0xff]  }
 0x1ad   :  { %v626_v62 = vcombine.high %v624_v60, %v624_v60  ;;  %v1263_v5 = vpack.c.bf16 %v625_v61, %v625_v61  ;;  %v8450_v61 = vld [vmem:[%s10135_s1 + $0x1fc] ss:$784 sps:$4 sm:$0xff]  }
 0x1b2   :  { %v4848_v15 = vpop.f32.mrf.mxu0  ;;  %v4888_v16 = vpop.f32.mrf.mxu1  ;;  %5807 = vmatmul.mubr.bf16.vlgmr.msra.gmra.mxu0 %v1250_v6  ;;  %5847 = vmatmul.mubr.bf16.vlgmr.msra.gmra.mxu1 %v1252_v7  ;;  %v1265_v6 = vpack.c.bf16 %v626_v62, %v626_v62 }
 0x1b3   :  { %v4849_v18 = vadd.f32 %v4848_v15, %v4809_v56  ;;  %5867 = vmatpush1.bf16.xpose.msra.mxu0 %v8387_v8  ;;  %5907 = vmatpush1.bf16.xpose.msra.mxu1 %v8390_v9  ;;  %v49_v9 = vld [vmem:[%s10136_s0 + $0xf0] sm:$0xff] }
 0x1b4   :  { %v4850_v19 = vpop.f32.mrf.mxu0  ;;  %v4890_v20 = vpop.f32.mrf.mxu1  ;;  %5868 = vmatprep.subr.bf16.mxu0 %v8395_v10  ;;  %5908 = vmatprep.subr.bf16.mxu1 %v8398_v12  ;;  %v627_v15 = vcombine.high %v49_v9, %v49_v9 }
 0x1b5   :  { %v4889_v21 = vadd.f32 %v4888_v16, %v4849_v18  ;;  %5886 = vmatprep.mubr.bf16.mxu0 %v1255_v13  ;;  %5926 = vmatprep.mubr.bf16.mxu1 %v1257_v14  ;;  %v8419_v18 = vld [vmem:[%s10135_s1 + $0x1d0] ss:$784 sps:$4 sm:$0xff]   ;;  %v8422_v19 = vld [vmem:[%s10135_s1 + $0x1d8] ss:$784 sps:$4 sm:$0xff]  }
 0x1b6   :  { %v4851_v23 = vpop.f32.mrf.mxu0  ;;  %v4891_v24 = vpop.f32.mrf.mxu1 }
 0x1b7   :  { %v8431_v23 = vld [vmem:[%s10135_s1 + $0x80c] ss:$784 sps:$4 sm:$0xff]   ;;  %v634_v24 = vrot.slane %v49_v9, %v8721_v11 }
 0x1b8   :  { %v4852_v27 = vpop.f32.mrf.mxu0  ;;  %v4892_v28 = vpop.f32.mrf.mxu1 }
 0x1b9   :  { %v1262_v28 = vpack.c.bf16 %v617_v59, %v617_v59  ;;  %v8442_v59 = vld [vmem:[%s10135_s1 + $0x818] ss:$784 sps:$4 sm:$0xff]  }
 0x1bb   :  { %5869 = vmatpush1.bf16.xpose.msra.mxu0 %v8393_v25  ;;  %5909 = vmatpush1.bf16.xpose.msra.mxu1 %v8396_v26  ;;  %v641_v25 = vrot.slane %v627_v15, %v8721_v11  ;;  %v642_v26 = vcombine.high %v634_v24, %v634_v24  ;;  %v8454_v15 = vld [vmem:[%s10135_s1 + $0x824] ss:$784 sps:$4 sm:$0xff]  }
 0x1bc   :  { %5946 = vmatprep.subr.bf16.mxu0 %v8402_v29  ;;  %5986 = vmatprep.subr.bf16.mxu1 %v8405_v30  ;;  %v1264_v29 = vpack.c.bf16 %v624_v60, %v624_v60  ;;  %v8426_v30 = vld [vmem:[%s10135_s1 + $0x800] ss:$784 sps:$4 sm:$0xff]   ;;  %v8447_v60 = vld [vmem:[%s10135_s1 + $0x1f4] ss:$784 sps:$4 sm:$0xff]  }
 0x1bd   :  { %v643_v27 = vcombine.high %v641_v25, %v641_v25  ;;  %v1267_v34 = vpack.c.bf16 %v642_v26, %v642_v26  ;;  %v8463_v26 = vld [vmem:[%s10135_s1 + $0x20c] ss:$784 sps:$4 sm:$0xff]  }
 0x1c2   :  { %v4928_v43 = vpop.f32.mrf.mxu0  ;;  %v4968_v44 = vpop.f32.mrf.mxu1  ;;  %5887 = vmatmul.mubr.bf16.vlgmr.msra.gmra.mxu0 %v1254_v35  ;;  %5927 = vmatmul.mubr.bf16.vlgmr.msra.gmra.mxu1 %v1256_v36  ;;  %v1269_v35 = vpack.c.bf16 %v643_v27, %v643_v27 }
 0x1c3   :  { %v4929_v46 = vadd.f32 %v4928_v43, %v4889_v21  ;;  %5947 = vmatpush1.bf16.xpose.msra.mxu0 %v8400_v37  ;;  %5987 = vmatpush1.bf16.xpose.msra.mxu1 %v8403_v38  ;;  %v50_v38 = vld [vmem:[%s10136_s0 + $0xf8] sm:$0xff] }
 0x1c4   :  { %v4930_v47 = vpop.f32.mrf.mxu0  ;;  %v4970_v48 = vpop.f32.mrf.mxu1  ;;  %5948 = vmatprep.subr.bf16.mxu0 %v8408_v39  ;;  %5988 = vmatprep.subr.bf16.mxu1 %v8411_v40  ;;  %v644_v43 = vcombine.high %v50_v38, %v50_v38 }
 0x1c5   :  { %v4969_v49 = vadd.f32 %v4968_v44, %v4929_v46  ;;  %5966 = vmatprep.mubr.bf16.mxu0 %v1259_v41  ;;  %6006 = vmatprep.mubr.bf16.mxu1 %v1261_v42  ;;  %v8432_v46 = vld [vmem:[%s10135_s1 + $0x1e0] ss:$784 sps:$4 sm:$0xff]   ;;  %v8435_v47 = vld [vmem:[%s10135_s1 + $0x1e8] ss:$784 sps:$4 sm:$0xff]  }
 0x1c6   :  { %v4931_v51 = vpop.f32.mrf.mxu0  ;;  %v4971_v52 = vpop.f32.mrf.mxu1 }
 0x1c7   :  { %v8444_v51 = vld [vmem:[%s10135_s1 + $0x81c] ss:$784 sps:$4 sm:$0xff]   ;;  %v651_v52 = vrot.slane %v50_v38, %v8721_v11 }
 0x1c8   :  { %v4932_v55 = vpop.f32.mrf.mxu0  ;;  %v4972_v56 = vpop.f32.mrf.mxu1 }
 0x1c9   :  { %v1266_v56 = vpack.c.bf16 %v634_v24, %v634_v24  ;;  %v8455_v24 = vld [vmem:[%s10135_s1 + $0x828] ss:$784 sps:$4 sm:$0xff]  }
 0x1cb   :  { %5949 = vmatpush1.bf16.xpose.msra.mxu0 %v8406_v53  ;;  %5989 = vmatpush1.bf16.xpose.msra.mxu1 %v8409_v54  ;;  %v658_v53 = vrot.slane %v644_v43, %v8721_v11  ;;  %v659_v54 = vcombine.high %v651_v52, %v651_v52  ;;  %v8467_v43 = vld [vmem:[%s10135_s1 + $0x834] ss:$784 sps:$4 sm:$0xff]  }
 0x1cc   :  { %6026 = vmatprep.subr.bf16.mxu0 %v8415_v57  ;;  %6066 = vmatprep.subr.bf16.mxu1 %v8418_v58  ;;  %v1268_v57 = vpack.c.bf16 %v641_v25, %v641_v25  ;;  %v8439_v58 = vld [vmem:[%s10135_s1 + $0x810] ss:$784 sps:$4 sm:$0xff]   ;;  %v8460_v25 = vld [vmem:[%s10135_s1 + $0x204] ss:$784 sps:$4 sm:$0xff]  }
 0x1cd   :  { %v660_v55 = vcombine.high %v658_v53, %v658_v53  ;;  %v1271_v62 = vpack.c.bf16 %v659_v54, %v659_v54  ;;  %v8476_v54 = vld [vmem:[%s10135_s1 + $0x21c] ss:$784 sps:$4 sm:$0xff]  }
 0x1d2   :  { %v5008_v7 = vpop.f32.mrf.mxu0  ;;  %v5048_v8 = vpop.f32.mrf.mxu1  ;;  %5967 = vmatmul.mubr.bf16.vlgmr.msra.gmra.mxu0 %v1258_v63  ;;  %6007 = vmatmul.mubr.bf16.vlgmr.msra.gmra.mxu1 %v1260_v0  ;;  %v1273_v63 = vpack.c.bf16 %v660_v55, %v660_v55 }
 0x1d3   :  { %v5009_v10 = vadd.f32 %v5008_v7, %v4969_v49  ;;  %6027 = vmatpush1.bf16.xpose.msra.mxu0 %v8413_v1  ;;  %6067 = vmatpush1.bf16.xpose.msra.mxu1 %v8416_v2  ;;  %v51_v2 = vld [vmem:[%s10136_s0 + $0x100] sm:$0xff] }
 0x1d4   :  { %v5010_v12 = vpop.f32.mrf.mxu0  ;;  %v5050_v13 = vpop.f32.mrf.mxu1  ;;  %6028 = vmatprep.subr.bf16.mxu0 %v8421_v3  ;;  %6068 = vmatprep.subr.bf16.mxu1 %v8424_v4  ;;  %v661_v7 = vcombine.high %v51_v2, %v51_v2 }
 0x1d5   :  { %v5049_v14 = vadd.f32 %v5048_v8, %v5009_v10  ;;  %6046 = vmatprep.mubr.bf16.mxu0 %v1263_v5  ;;  %6086 = vmatprep.mubr.bf16.mxu1 %v1265_v6  ;;  %v8445_v10 = vld [vmem:[%s10135_s1 + $0x1f0] ss:$784 sps:$4 sm:$0xff]   ;;  %v8448_v12 = vld [vmem:[%s10135_s1 + $0x1f8] ss:$784 sps:$4 sm:$0xff]  }
 0x1d6   :  { %v5011_v16 = vpop.f32.mrf.mxu0  ;;  %v5051_v17 = vpop.f32.mrf.mxu1 }
 0x1d7   :  { %v8457_v16 = vld [vmem:[%s10135_s1 + $0x82c] ss:$784 sps:$4 sm:$0xff]   ;;  %v668_v17 = vrot.slane %v51_v2, %v8721_v11 }
 0x1d8   :  { %v5012_v20 = vpop.f32.mrf.mxu0  ;;  %v5052_v21 = vpop.f32.mrf.mxu1 }
 0x1d9   :  { %v1270_v21 = vpack.c.bf16 %v651_v52, %v651_v52  ;;  %v8468_v52 = vld [vmem:[%s10135_s1 + $0x838] ss:$784 sps:$4 sm:$0xff]  }
 0x1db   :  { %6029 = vmatpush1.bf16.xpose.msra.mxu0 %v8419_v18  ;;  %6069 = vmatpush1.bf16.xpose.msra.mxu1 %v8422_v19  ;;  %v675_v18 = vrot.slane %v661_v7, %v8721_v11  ;;  %v676_v19 = vcombine.high %v668_v17, %v668_v17  ;;  %v8480_v7 = vld [vmem:[%s10135_s1 + $0x844] ss:$784 sps:$4 sm:$0xff]  }
 0x1dc   :  { %6106 = vmatprep.subr.bf16.mxu0 %v8428_v22  ;;  %6146 = vmatprep.subr.bf16.mxu1 %v8431_v23  ;;  %v1272_v22 = vpack.c.bf16 %v658_v53, %v658_v53  ;;  %v8452_v23 = vld [vmem:[%s10135_s1 + $0x820] ss:$784 sps:$4 sm:$0xff]   ;;  %v8473_v53 = vld [vmem:[%s10135_s1 + $0x214] ss:$784 sps:$4 sm:$0xff]  }
 0x1dd   :  { %v677_v20 = vcombine.high %v675_v18, %v675_v18  ;;  %v1275_v27 = vpack.c.bf16 %v676_v19, %v676_v19  ;;  %v8489_v19 = vld [vmem:[%s10135_s1 + $0x22c] ss:$784 sps:$4 sm:$0xff]  }
 0x1e2   :  { %v5088_v36 = vpop.f32.mrf.mxu0  ;;  %v5128_v37 = vpop.f32.mrf.mxu1  ;;  %6047 = vmatmul.mubr.bf16.vlgmr.msra.gmra.mxu0 %v1262_v28  ;;  %6087 = vmatmul.mubr.bf16.vlgmr.msra.gmra.mxu1 %v1264_v29  ;;  %v1277_v28 = vpack.c.bf16 %v677_v20, %v677_v20 }
 0x1e3   :  { %v5089_v39 = vadd.f32 %v5088_v36, %v5049_v14  ;;  %6107 = vmatpush1.bf16.xpose.msra.mxu0 %v8426_v30  ;;  %6147 = vmatpush1.bf16.xpose.msra.mxu1 %v8429_v31  ;;  %v52_v31 = vld [vmem:[%s10136_s0 + $0x108] sm:$0xff] }
 0x1e4   :  { %v5090_v40 = vpop.f32.mrf.mxu0  ;;  %v5130_v41 = vpop.f32.mrf.mxu1  ;;  %6108 = vmatprep.subr.bf16.mxu0 %v8434_v32  ;;  %6148 = vmatprep.subr.bf16.mxu1 %v8437_v33  ;;  %v678_v36 = vcombine.high %v52_v31, %v52_v31 }
 0x1e5   :  { %v5129_v42 = vadd.f32 %v5128_v37, %v5089_v39  ;;  %6126 = vmatprep.mubr.bf16.mxu0 %v1267_v34  ;;  %6166 = vmatprep.mubr.bf16.mxu1 %v1269_v35  ;;  %v8458_v39 = vld [vmem:[%s10135_s1 + $0x200] ss:$784 sps:$4 sm:$0xff]   ;;  %v8461_v40 = vld [vmem:[%s10135_s1 + $0x208] ss:$784 sps:$4 sm:$0xff]  }
 0x1e6   :  { %v5091_v44 = vpop.f32.mrf.mxu0  ;;  %v5131_v45 = vpop.f32.mrf.mxu1 }
 0x1e7   :  { %v8470_v44 = vld [vmem:[%s10135_s1 + $0x83c] ss:$784 sps:$4 sm:$0xff]   ;;  %v685_v45 = vrot.slane %v52_v31, %v8721_v11 }
 0x1e8   :  { %v5092_v48 = vpop.f32.mrf.mxu0  ;;  %v5132_v49 = vpop.f32.mrf.mxu1 }
 0x1e9   :  { %v1274_v49 = vpack.c.bf16 %v668_v17, %v668_v17  ;;  %v8481_v17 = vld [vmem:[%s10135_s1 + $0x848] ss:$784 sps:$4 sm:$0xff]  }
 0x1eb   :  { %6109 = vmatpush1.bf16.xpose.msra.mxu0 %v8432_v46  ;;  %6149 = vmatpush1.bf16.xpose.msra.mxu1 %v8435_v47  ;;  %v692_v46 = vrot.slane %v678_v36, %v8721_v11  ;;  %v693_v47 = vcombine.high %v685_v45, %v685_v45  ;;  %v8493_v36 = vld [vmem:[%s10135_s1 + $0x854] ss:$784 sps:$4 sm:$0xff]  }
 0x1ec   :  { %6186 = vmatprep.subr.bf16.mxu0 %v8441_v50  ;;  %6226 = vmatprep.subr.bf16.mxu1 %v8444_v51  ;;  %v1276_v50 = vpack.c.bf16 %v675_v18, %v675_v18  ;;  %v8465_v51 = vld [vmem:[%s10135_s1 + $0x830] ss:$784 sps:$4 sm:$0xff]   ;;  %v8486_v18 = vld [vmem:[%s10135_s1 + $0x224] ss:$784 sps:$4 sm:$0xff]  }
 0x1ed   :  { %v694_v48 = vcombine.high %v692_v46, %v692_v46  ;;  %v1279_v55 = vpack.c.bf16 %v693_v47, %v693_v47  ;;  %v8502_v47 = vld [vmem:[%s10135_s1 + $0x23c] ss:$784 sps:$4 sm:$0xff]  }
 0x1f2   :  { %v5168_v0 = vpop.f32.mrf.mxu0  ;;  %v5208_v1 = vpop.f32.mrf.mxu1  ;;  %6127 = vmatmul.mubr.bf16.vlgmr.msra.gmra.mxu0 %v1266_v56  ;;  %6167 = vmatmul.mubr.bf16.vlgmr.msra.gmra.mxu1 %v1268_v57  ;;  %v1281_v56 = vpack.c.bf16 %v694_v48, %v694_v48 }
 0x1f3   :  { %v5169_v3 = vadd.f32 %v5168_v0, %v5129_v42  ;;  %6187 = vmatpush1.bf16.xpose.msra.mxu0 %v8439_v58  ;;  %6227 = vmatpush1.bf16.xpose.msra.mxu1 %v8442_v59  ;;  %v53_v59 = vld [vmem:[%s10136_s0 + $0x110] sm:$0xff] }
 0x1f4   :  { %v5170_v4 = vpop.f32.mrf.mxu0  ;;  %v5210_v5 = vpop.f32.mrf.mxu1  ;;  %6188 = vmatprep.subr.bf16.mxu0 %v8447_v60  ;;  %6228 = vmatprep.subr.bf16.mxu1 %v8450_v61  ;;  %v695_v0 = vcombine.high %v53_v59, %v53_v59 }
 0x1f5   :  { %v5209_v6 = vadd.f32 %v5208_v1, %v5169_v3  ;;  %6206 = vmatprep.mubr.bf16.mxu0 %v1271_v62  ;;  %6246 = vmatprep.mubr.bf16.mxu1 %v1273_v63  ;;  %v8471_v3 = vld [vmem:[%s10135_s1 + $0x210] ss:$784 sps:$4 sm:$0xff]   ;;  %v8474_v4 = vld [vmem:[%s10135_s1 + $0x218] ss:$784 sps:$4 sm:$0xff]  }
 0x1f6   :  { %v5171_v8 = vpop.f32.mrf.mxu0  ;;  %v5211_v9 = vpop.f32.mrf.mxu1 }
 0x1f7   :  { %v8483_v8 = vld [vmem:[%s10135_s1 + $0x84c] ss:$784 sps:$4 sm:$0xff]   ;;  %v702_v9 = vrot.slane %v53_v59, %v8721_v11 }
 0x1f8   :  { %v5172_v13 = vpop.f32.mrf.mxu0  ;;  %v5212_v14 = vpop.f32.mrf.mxu1 }
 0x1f9   :  { %v1278_v14 = vpack.c.bf16 %v685_v45, %v685_v45  ;;  %v8494_v45 = vld [vmem:[%s10135_s1 + $0x858] ss:$784 sps:$4 sm:$0xff]  }
 0x1fb   :  { %6189 = vmatpush1.bf16.xpose.msra.mxu0 %v8445_v10  ;;  %6229 = vmatpush1.bf16.xpose.msra.mxu1 %v8448_v12  ;;  %v709_v10 = vrot.slane %v695_v0, %v8721_v11  ;;  %v710_v12 = vcombine.high %v702_v9, %v702_v9  ;;  %v8506_v0 = vld [vmem:[%s10135_s1 + $0x864] ss:$784 sps:$4 sm:$0xff]  }
 0x1fc   :  { %6266 = vmatprep.subr.bf16.mxu0 %v8454_v15  ;;  %6306 = vmatprep.subr.bf16.mxu1 %v8457_v16  ;;  %v1280_v15 = vpack.c.bf16 %v692_v46, %v692_v46  ;;  %v8478_v16 = vld [vmem:[%s10135_s1 + $0x840] ss:$784 sps:$4 sm:$0xff]   ;;  %v8499_v46 = vld [vmem:[%s10135_s1 + $0x234] ss:$784 sps:$4 sm:$0xff]  }
 0x1fd   :  { %v711_v13 = vcombine.high %v709_v10, %v709_v10  ;;  %v1283_v20 = vpack.c.bf16 %v710_v12, %v710_v12  ;;  %v8515_v12 = vld [vmem:[%s10135_s1 + $0x24c] ss:$784 sps:$4 sm:$0xff]  }
 0x202   :  { %v5248_v29 = vpop.f32.mrf.mxu0  ;;  %v5288_v30 = vpop.f32.mrf.mxu1  ;;  %6207 = vmatmul.mubr.bf16.vlgmr.msra.gmra.mxu0 %v1270_v21  ;;  %6247 = vmatmul.mubr.bf16.vlgmr.msra.gmra.mxu1 %v1272_v22  ;;  %v1285_v21 = vpack.c.bf16 %v711_v13, %v711_v13 }
 0x203   :  { %v5249_v32 = vadd.f32 %v5248_v29, %v5209_v6  ;;  %6267 = vmatpush1.bf16.xpose.msra.mxu0 %v8452_v23  ;;  %6307 = vmatpush1.bf16.xpose.msra.mxu1 %v8455_v24  ;;  %v54_v24 = vld [vmem:[%s10136_s0 + $0x118] sm:$0xff] }
 0x204   :  { %v5250_v33 = vpop.f32.mrf.mxu0  ;;  %v5290_v34 = vpop.f32.mrf.mxu1  ;;  %6268 = vmatprep.subr.bf16.mxu0 %v8460_v25  ;;  %6308 = vmatprep.subr.bf16.mxu1 %v8463_v26  ;;  %v712_v29 = vcombine.high %v54_v24, %v54_v24 }
 0x205   :  { %v5289_v35 = vadd.f32 %v5288_v30, %v5249_v32  ;;  %6286 = vmatprep.mubr.bf16.mxu0 %v1275_v27  ;;  %6326 = vmatprep.mubr.bf16.mxu1 %v1277_v28  ;;  %v8484_v32 = vld [vmem:[%s10135_s1 + $0x220] ss:$784 sps:$4 sm:$0xff]   ;;  %v8487_v33 = vld [vmem:[%s10135_s1 + $0x228] ss:$784 sps:$4 sm:$0xff]  }
 0x206   :  { %v5251_v37 = vpop.f32.mrf.mxu0  ;;  %v5291_v38 = vpop.f32.mrf.mxu1 }
 0x207   :  { %v8496_v37 = vld [vmem:[%s10135_s1 + $0x85c] ss:$784 sps:$4 sm:$0xff]   ;;  %v719_v38 = vrot.slane %v54_v24, %v8721_v11 }
 0x208   :  { %v5252_v41 = vpop.f32.mrf.mxu0  ;;  %v5292_v42 = vpop.f32.mrf.mxu1 }
 0x209   :  { %v1282_v42 = vpack.c.bf16 %v702_v9, %v702_v9  ;;  %v8507_v9 = vld [vmem:[%s10135_s1 + $0x868] ss:$784 sps:$4 sm:$0xff]  }
 0x20b   :  { %6269 = vmatpush1.bf16.xpose.msra.mxu0 %v8458_v39  ;;  %6309 = vmatpush1.bf16.xpose.msra.mxu1 %v8461_v40  ;;  %v726_v39 = vrot.slane %v712_v29, %v8721_v11  ;;  %v727_v40 = vcombine.high %v719_v38, %v719_v38  ;;  %v8519_v29 = vld [vmem:[%s10135_s1 + $0x874] ss:$784 sps:$4 sm:$0xff]  }
 0x20c   :  { %6346 = vmatprep.subr.bf16.mxu0 %v8467_v43  ;;  %6386 = vmatprep.subr.bf16.mxu1 %v8470_v44  ;;  %v1284_v43 = vpack.c.bf16 %v709_v10, %v709_v10  ;;  %v8491_v44 = vld [vmem:[%s10135_s1 + $0x850] ss:$784 sps:$4 sm:$0xff]   ;;  %v8512_v10 = vld [vmem:[%s10135_s1 + $0x244] ss:$784 sps:$4 sm:$0xff]  }
 0x20d   :  { %v728_v41 = vcombine.high %v726_v39, %v726_v39  ;;  %v1287_v48 = vpack.c.bf16 %v727_v40, %v727_v40  ;;  %v8528_v40 = vld [vmem:[%s10135_s1 + $0x25c] ss:$784 sps:$4 sm:$0xff]  }
 0x212   :  { %v5328_v57 = vpop.f32.mrf.mxu0  ;;  %v5368_v58 = vpop.f32.mrf.mxu1  ;;  %6287 = vmatmul.mubr.bf16.vlgmr.msra.gmra.mxu0 %v1274_v49  ;;  %6327 = vmatmul.mubr.bf16.vlgmr.msra.gmra.mxu1 %v1276_v50  ;;  %v1289_v49 = vpack.c.bf16 %v728_v41, %v728_v41 }
 0x213   :  { %v5329_v60 = vadd.f32 %v5328_v57, %v5289_v35  ;;  %6347 = vmatpush1.bf16.xpose.msra.mxu0 %v8465_v51  ;;  %6387 = vmatpush1.bf16.xpose.msra.mxu1 %v8468_v52  ;;  %v55_v52 = vld [vmem:[%s10136_s0 + $0x120] sm:$0xff] }
 0x214   :  { %v5330_v61 = vpop.f32.mrf.mxu0  ;;  %v5370_v62 = vpop.f32.mrf.mxu1  ;;  %6348 = vmatprep.subr.bf16.mxu0 %v8473_v53  ;;  %6388 = vmatprep.subr.bf16.mxu1 %v8476_v54  ;;  %v729_v57 = vcombine.high %v55_v52, %v55_v52 }
 0x215   :  { %v5369_v63 = vadd.f32 %v5368_v58, %v5329_v60  ;;  %6366 = vmatprep.mubr.bf16.mxu0 %v1279_v55  ;;  %6406 = vmatprep.mubr.bf16.mxu1 %v1281_v56  ;;  %v8497_v60 = vld [vmem:[%s10135_s1 + $0x230] ss:$784 sps:$4 sm:$0xff]   ;;  %v8500_v61 = vld [vmem:[%s10135_s1 + $0x238] ss:$784 sps:$4 sm:$0xff]  }
 0x216   :  { %v5331_v1 = vpop.f32.mrf.mxu0  ;;  %v5371_v2 = vpop.f32.mrf.mxu1 }
 0x217   :  { %v8509_v1 = vld [vmem:[%s10135_s1 + $0x86c] ss:$784 sps:$4 sm:$0xff]   ;;  %v736_v2 = vrot.slane %v55_v52, %v8721_v11 }
 0x218   :  { %v5332_v5 = vpop.f32.mrf.mxu0  ;;  %v5372_v6 = vpop.f32.mrf.mxu1 }
 0x219   :  { %v1286_v6 = vpack.c.bf16 %v719_v38, %v719_v38  ;;  %v8520_v38 = vld [vmem:[%s10135_s1 + $0x878] ss:$784 sps:$4 sm:$0xff]  }
 0x21b   :  { %6349 = vmatpush1.bf16.xpose.msra.mxu0 %v8471_v3  ;;  %6389 = vmatpush1.bf16.xpose.msra.mxu1 %v8474_v4  ;;  %v743_v3 = vrot.slane %v729_v57, %v8721_v11  ;;  %v744_v4 = vcombine.high %v736_v2, %v736_v2  ;;  %v8532_v57 = vld [vmem:[%s10135_s1 + $0x884] ss:$784 sps:$4 sm:$0xff]  }
 0x21c   :  { %6426 = vmatprep.subr.bf16.mxu0 %v8480_v7  ;;  %6466 = vmatprep.subr.bf16.mxu1 %v8483_v8  ;;  %v1288_v7 = vpack.c.bf16 %v726_v39, %v726_v39  ;;  %v8504_v8 = vld [vmem:[%s10135_s1 + $0x860] ss:$784 sps:$4 sm:$0xff]   ;;  %v8525_v39 = vld [vmem:[%s10135_s1 + $0x254] ss:$784 sps:$4 sm:$0xff]  }
 0x21d   :  { %v745_v5 = vcombine.high %v743_v3, %v743_v3  ;;  %v1291_v13 = vpack.c.bf16 %v744_v4, %v744_v4  ;;  %v8541_v4 = vld [vmem:[%s10135_s1 + $0x26c] ss:$784 sps:$4 sm:$0xff]  }
 0x222   :  { %v5408_v22 = vpop.f32.mrf.mxu0  ;;  %v5448_v23 = vpop.f32.mrf.mxu1  ;;  %6367 = vmatmul.mubr.bf16.vlgmr.msra.gmra.mxu0 %v1278_v14  ;;  %6407 = vmatmul.mubr.bf16.vlgmr.msra.gmra.mxu1 %v1280_v15  ;;  %v1293_v14 = vpack.c.bf16 %v745_v5, %v745_v5 }
 0x223   :  { %v5409_v25 = vadd.f32 %v5408_v22, %v5369_v63  ;;  %6427 = vmatpush1.bf16.xpose.msra.mxu0 %v8478_v16  ;;  %6467 = vmatpush1.bf16.xpose.msra.mxu1 %v8481_v17  ;;  %v56_v17 = vld [vmem:[%s10136_s0 + $0x128] sm:$0xff] }
 0x224   :  { %v5410_v26 = vpop.f32.mrf.mxu0  ;;  %v5450_v27 = vpop.f32.mrf.mxu1  ;;  %6428 = vmatprep.subr.bf16.mxu0 %v8486_v18  ;;  %6468 = vmatprep.subr.bf16.mxu1 %v8489_v19  ;;  %v746_v22 = vcombine.high %v56_v17, %v56_v17 }
 0x225   :  { %v5449_v28 = vadd.f32 %v5448_v23, %v5409_v25  ;;  %6446 = vmatprep.mubr.bf16.mxu0 %v1283_v20  ;;  %6486 = vmatprep.mubr.bf16.mxu1 %v1285_v21  ;;  %v8510_v25 = vld [vmem:[%s10135_s1 + $0x240] ss:$784 sps:$4 sm:$0xff]   ;;  %v8513_v26 = vld [vmem:[%s10135_s1 + $0x248] ss:$784 sps:$4 sm:$0xff]  }
 0x226   :  { %v5411_v30 = vpop.f32.mrf.mxu0  ;;  %v5451_v31 = vpop.f32.mrf.mxu1 }
 0x227   :  { %v8522_v30 = vld [vmem:[%s10135_s1 + $0x87c] ss:$784 sps:$4 sm:$0xff]   ;;  %v753_v31 = vrot.slane %v56_v17, %v8721_v11 }
 0x228   :  { %v5412_v34 = vpop.f32.mrf.mxu0  ;;  %v5452_v35 = vpop.f32.mrf.mxu1 }
 0x229   :  { %v1290_v35 = vpack.c.bf16 %v736_v2, %v736_v2  ;;  %v8533_v2 = vld [vmem:[%s10135_s1 + $0x888] ss:$784 sps:$4 sm:$0xff]  }
 0x22b   :  { %6429 = vmatpush1.bf16.xpose.msra.mxu0 %v8484_v32  ;;  %6469 = vmatpush1.bf16.xpose.msra.mxu1 %v8487_v33  ;;  %v760_v32 = vrot.slane %v746_v22, %v8721_v11  ;;  %v761_v33 = vcombine.high %v753_v31, %v753_v31  ;;  %v8545_v22 = vld [vmem:[%s10135_s1 + $0x894] ss:$784 sps:$4 sm:$0xff]  }
 0x22c   :  { %6506 = vmatprep.subr.bf16.mxu0 %v8493_v36  ;;  %6546 = vmatprep.subr.bf16.mxu1 %v8496_v37  ;;  %v1292_v36 = vpack.c.bf16 %v743_v3, %v743_v3  ;;  %v8517_v37 = vld [vmem:[%s10135_s1 + $0x870] ss:$784 sps:$4 sm:$0xff]   ;;  %v8538_v3 = vld [vmem:[%s10135_s1 + $0x264] ss:$784 sps:$4 sm:$0xff]  }
 0x22d   :  { %v762_v34 = vcombine.high %v760_v32, %v760_v32  ;;  %v1295_v41 = vpack.c.bf16 %v761_v33, %v761_v33  ;;  %v8554_v33 = vld [vmem:[%s10135_s1 + $0x27c] ss:$784 sps:$4 sm:$0xff]  }
 0x232   :  { %v5488_v50 = vpop.f32.mrf.mxu0  ;;  %v5528_v51 = vpop.f32.mrf.mxu1  ;;  %6447 = vmatmul.mubr.bf16.vlgmr.msra.gmra.mxu0 %v1282_v42  ;;  %6487 = vmatmul.mubr.bf16.vlgmr.msra.gmra.mxu1 %v1284_v43  ;;  %v1297_v42 = vpack.c.bf16 %v762_v34, %v762_v34 }
 0x233   :  { %v5489_v53 = vadd.f32 %v5488_v50, %v5449_v28  ;;  %6507 = vmatpush1.bf16.xpose.msra.mxu0 %v8491_v44  ;;  %6547 = vmatpush1.bf16.xpose.msra.mxu1 %v8494_v45  ;;  %v57_v45 = vld [vmem:[%s10136_s0 + $0x130] sm:$0xff] }
 0x234   :  { %v5490_v54 = vpop.f32.mrf.mxu0  ;;  %v5530_v55 = vpop.f32.mrf.mxu1  ;;  %6508 = vmatprep.subr.bf16.mxu0 %v8499_v46  ;;  %6548 = vmatprep.subr.bf16.mxu1 %v8502_v47  ;;  %v763_v50 = vcombine.high %v57_v45, %v57_v45 }
 0x235   :  { %v5529_v56 = vadd.f32 %v5528_v51, %v5489_v53  ;;  %6526 = vmatprep.mubr.bf16.mxu0 %v1287_v48  ;;  %6566 = vmatprep.mubr.bf16.mxu1 %v1289_v49  ;;  %v8523_v53 = vld [vmem:[%s10135_s1 + $0x250] ss:$784 sps:$4 sm:$0xff]   ;;  %v8526_v54 = vld [vmem:[%s10135_s1 + $0x258] ss:$784 sps:$4 sm:$0xff]  }
 0x236   :  { %v5491_v58 = vpop.f32.mrf.mxu0  ;;  %v5531_v59 = vpop.f32.mrf.mxu1 }
 0x237   :  { %v8535_v58 = vld [vmem:[%s10135_s1 + $0x88c] ss:$784 sps:$4 sm:$0xff]   ;;  %v770_v59 = vrot.slane %v57_v45, %v8721_v11 }
 0x238   :  { %v5492_v62 = vpop.f32.mrf.mxu0  ;;  %v5532_v63 = vpop.f32.mrf.mxu1 }
 0x239   :  { %v1294_v63 = vpack.c.bf16 %v753_v31, %v753_v31  ;;  %v8546_v31 = vld [vmem:[%s10135_s1 + $0x898] ss:$784 sps:$4 sm:$0xff]  }
 0x23b   :  { %6509 = vmatpush1.bf16.xpose.msra.mxu0 %v8497_v60  ;;  %6549 = vmatpush1.bf16.xpose.msra.mxu1 %v8500_v61  ;;  %v777_v60 = vrot.slane %v763_v50, %v8721_v11  ;;  %v778_v61 = vcombine.high %v770_v59, %v770_v59  ;;  %v8558_v50 = vld [vmem:[%s10135_s1 + $0x8a4] ss:$784 sps:$4 sm:$0xff]  }
 0x23c   :  { %6586 = vmatprep.subr.bf16.mxu0 %v8506_v0  ;;  %6626 = vmatprep.subr.bf16.mxu1 %v8509_v1  ;;  %v1296_v0 = vpack.c.bf16 %v760_v32, %v760_v32  ;;  %v8530_v1 = vld [vmem:[%s10135_s1 + $0x880] ss:$784 sps:$4 sm:$0xff]   ;;  %v8551_v32 = vld [vmem:[%s10135_s1 + $0x274] ss:$784 sps:$4 sm:$0xff]  }
 0x23d   :  { %v779_v62 = vcombine.high %v777_v60, %v777_v60  ;;  %v1299_v5 = vpack.c.bf16 %v778_v61, %v778_v61  ;;  %v8567_v61 = vld [vmem:[%s10135_s1 + $0x28c] ss:$784 sps:$4 sm:$0xff]  }
 0x242   :  { %v5568_v15 = vpop.f32.mrf.mxu0  ;;  %v5608_v16 = vpop.f32.mrf.mxu1  ;;  %6527 = vmatmul.mubr.bf16.vlgmr.msra.gmra.mxu0 %v1286_v6  ;;  %6567 = vmatmul.mubr.bf16.vlgmr.msra.gmra.mxu1 %v1288_v7  ;;  %v1301_v6 = vpack.c.bf16 %v779_v62, %v779_v62 }
 0x243   :  { %v5569_v18 = vadd.f32 %v5568_v15, %v5529_v56  ;;  %6587 = vmatpush1.bf16.xpose.msra.mxu0 %v8504_v8  ;;  %6627 = vmatpush1.bf16.xpose.msra.mxu1 %v8507_v9  ;;  %v58_v9 = vld [vmem:[%s10136_s0 + $0x138] sm:$0xff] }
 0x244   :  { %v5570_v19 = vpop.f32.mrf.mxu0  ;;  %v5610_v20 = vpop.f32.mrf.mxu1  ;;  %6588 = vmatprep.subr.bf16.mxu0 %v8512_v10  ;;  %6628 = vmatprep.subr.bf16.mxu1 %v8515_v12  ;;  %v780_v15 = vcombine.high %v58_v9, %v58_v9 }
 0x245   :  { %v5609_v21 = vadd.f32 %v5608_v16, %v5569_v18  ;;  %6606 = vmatprep.mubr.bf16.mxu0 %v1291_v13  ;;  %6646 = vmatprep.mubr.bf16.mxu1 %v1293_v14  ;;  %v8536_v18 = vld [vmem:[%s10135_s1 + $0x260] ss:$784 sps:$4 sm:$0xff]   ;;  %v8539_v19 = vld [vmem:[%s10135_s1 + $0x268] ss:$784 sps:$4 sm:$0xff]  }
 0x246   :  { %v5571_v23 = vpop.f32.mrf.mxu0  ;;  %v5611_v24 = vpop.f32.mrf.mxu1 }
 0x247   :  { %v8548_v23 = vld [vmem:[%s10135_s1 + $0x89c] ss:$784 sps:$4 sm:$0xff]   ;;  %v787_v24 = vrot.slane %v58_v9, %v8721_v11 }
 0x248   :  { %v5572_v27 = vpop.f32.mrf.mxu0  ;;  %v5612_v28 = vpop.f32.mrf.mxu1 }
 0x249   :  { %v1298_v28 = vpack.c.bf16 %v770_v59, %v770_v59  ;;  %v8559_v59 = vld [vmem:[%s10135_s1 + $0x8a8] ss:$784 sps:$4 sm:$0xff]  }
 0x24b   :  { %6589 = vmatpush1.bf16.xpose.msra.mxu0 %v8510_v25  ;;  %6629 = vmatpush1.bf16.xpose.msra.mxu1 %v8513_v26  ;;  %v794_v25 = vrot.slane %v780_v15, %v8721_v11  ;;  %v795_v26 = vcombine.high %v787_v24, %v787_v24  ;;  %v8571_v15 = vld [vmem:[%s10135_s1 + $0x8b4] ss:$784 sps:$4 sm:$0xff]  }
 0x24c   :  { %6666 = vmatprep.subr.bf16.mxu0 %v8519_v29  ;;  %6706 = vmatprep.subr.bf16.mxu1 %v8522_v30  ;;  %v1300_v29 = vpack.c.bf16 %v777_v60, %v777_v60  ;;  %v8543_v30 = vld [vmem:[%s10135_s1 + $0x890] ss:$784 sps:$4 sm:$0xff]   ;;  %v8564_v60 = vld [vmem:[%s10135_s1 + $0x284] ss:$784 sps:$4 sm:$0xff]  }
 0x24d   :  { %v796_v27 = vcombine.high %v794_v25, %v794_v25  ;;  %v1303_v34 = vpack.c.bf16 %v795_v26, %v795_v26  ;;  %v8580_v26 = vld [vmem:[%s10135_s1 + $0x29c] ss:$784 sps:$4 sm:$0xff]  }
 0x252   :  { %v5648_v43 = vpop.f32.mrf.mxu0  ;;  %v5688_v44 = vpop.f32.mrf.mxu1  ;;  %6607 = vmatmul.mubr.bf16.vlgmr.msra.gmra.mxu0 %v1290_v35  ;;  %6647 = vmatmul.mubr.bf16.vlgmr.msra.gmra.mxu1 %v1292_v36  ;;  %v1305_v35 = vpack.c.bf16 %v796_v27, %v796_v27 }
 0x253   :  { %v5649_v46 = vadd.f32 %v5648_v43, %v5609_v21  ;;  %6667 = vmatpush1.bf16.xpose.msra.mxu0 %v8517_v37  ;;  %6707 = vmatpush1.bf16.xpose.msra.mxu1 %v8520_v38  ;;  %v59_v38 = vld [vmem:[%s10136_s0 + $0x140] sm:$0xff] }
 0x254   :  { %v5650_v47 = vpop.f32.mrf.mxu0  ;;  %v5690_v48 = vpop.f32.mrf.mxu1  ;;  %6668 = vmatprep.subr.bf16.mxu0 %v8525_v39  ;;  %6708 = vmatprep.subr.bf16.mxu1 %v8528_v40  ;;  %v797_v43 = vcombine.high %v59_v38, %v59_v38 }
 0x255   :  { %v5689_v49 = vadd.f32 %v5688_v44, %v5649_v46  ;;  %6686 = vmatprep.mubr.bf16.mxu0 %v1295_v41  ;;  %6726 = vmatprep.mubr.bf16.mxu1 %v1297_v42  ;;  %v8549_v46 = vld [vmem:[%s10135_s1 + $0x270] ss:$784 sps:$4 sm:$0xff]   ;;  %v8552_v47 = vld [vmem:[%s10135_s1 + $0x278] ss:$784 sps:$4 sm:$0xff]  }
 0x256   :  { %v5651_v51 = vpop.f32.mrf.mxu0  ;;  %v5691_v52 = vpop.f32.mrf.mxu1 }
 0x257   :  { %v8561_v51 = vld [vmem:[%s10135_s1 + $0x8ac] ss:$784 sps:$4 sm:$0xff]   ;;  %v804_v52 = vrot.slane %v59_v38, %v8721_v11 }
 0x258   :  { %v5652_v55 = vpop.f32.mrf.mxu0  ;;  %v5692_v56 = vpop.f32.mrf.mxu1 }
 0x259   :  { %v1302_v56 = vpack.c.bf16 %v787_v24, %v787_v24  ;;  %v8572_v24 = vld [vmem:[%s10135_s1 + $0x8b8] ss:$784 sps:$4 sm:$0xff]  }
 0x25b   :  { %6669 = vmatpush1.bf16.xpose.msra.mxu0 %v8523_v53  ;;  %6709 = vmatpush1.bf16.xpose.msra.mxu1 %v8526_v54  ;;  %v811_v53 = vrot.slane %v797_v43, %v8721_v11  ;;  %v812_v54 = vcombine.high %v804_v52, %v804_v52  ;;  %v8584_v43 = vld [vmem:[%s10135_s1 + $0x8c4] ss:$784 sps:$4 sm:$0xff]  }
 0x25c   :  { %6746 = vmatprep.subr.bf16.mxu0 %v8532_v57  ;;  %6786 = vmatprep.subr.bf16.mxu1 %v8535_v58  ;;  %v1304_v57 = vpack.c.bf16 %v794_v25, %v794_v25  ;;  %v8556_v58 = vld [vmem:[%s10135_s1 + $0x8a0] ss:$784 sps:$4 sm:$0xff]   ;;  %v8577_v25 = vld [vmem:[%s10135_s1 + $0x294] ss:$784 sps:$4 sm:$0xff]  }
 0x25d   :  { %v813_v55 = vcombine.high %v811_v53, %v811_v53  ;;  %v1307_v62 = vpack.c.bf16 %v812_v54, %v812_v54  ;;  %v8593_v54 = vld [vmem:[%s10135_s1 + $0x2ac] ss:$784 sps:$4 sm:$0xff]  }
 0x262   :  { %v5728_v7 = vpop.f32.mrf.mxu0  ;;  %v5768_v8 = vpop.f32.mrf.mxu1  ;;  %6687 = vmatmul.mubr.bf16.vlgmr.msra.gmra.mxu0 %v1294_v63  ;;  %6727 = vmatmul.mubr.bf16.vlgmr.msra.gmra.mxu1 %v1296_v0  ;;  %v1309_v63 = vpack.c.bf16 %v813_v55, %v813_v55 }
 0x263   :  { %v5729_v10 = vadd.f32 %v5728_v7, %v5689_v49  ;;  %6747 = vmatpush1.bf16.xpose.msra.mxu0 %v8530_v1  ;;  %6787 = vmatpush1.bf16.xpose.msra.mxu1 %v8533_v2  ;;  %v60_v2 = vld [vmem:[%s10136_s0 + $0x148] sm:$0xff] }
 0x264   :  { %v5730_v12 = vpop.f32.mrf.mxu0  ;;  %v5770_v13 = vpop.f32.mrf.mxu1  ;;  %6748 = vmatprep.subr.bf16.mxu0 %v8538_v3  ;;  %6788 = vmatprep.subr.bf16.mxu1 %v8541_v4  ;;  %v814_v7 = vcombine.high %v60_v2, %v60_v2 }
 0x265   :  { %v5769_v14 = vadd.f32 %v5768_v8, %v5729_v10  ;;  %6766 = vmatprep.mubr.bf16.mxu0 %v1299_v5  ;;  %6806 = vmatprep.mubr.bf16.mxu1 %v1301_v6  ;;  %v8562_v10 = vld [vmem:[%s10135_s1 + $0x280] ss:$784 sps:$4 sm:$0xff]   ;;  %v8565_v12 = vld [vmem:[%s10135_s1 + $0x288] ss:$784 sps:$4 sm:$0xff]  }
 0x266   :  { %v5731_v16 = vpop.f32.mrf.mxu0  ;;  %v5771_v17 = vpop.f32.mrf.mxu1 }
 0x267   :  { %v8574_v16 = vld [vmem:[%s10135_s1 + $0x8bc] ss:$784 sps:$4 sm:$0xff]   ;;  %v821_v17 = vrot.slane %v60_v2, %v8721_v11 }
 0x268   :  { %v5732_v20 = vpop.f32.mrf.mxu0  ;;  %v5772_v21 = vpop.f32.mrf.mxu1 }
 0x269   :  { %v1306_v21 = vpack.c.bf16 %v804_v52, %v804_v52  ;;  %v8585_v52 = vld [vmem:[%s10135_s1 + $0x8c8] ss:$784 sps:$4 sm:$0xff]  }
 0x26b   :  { %6749 = vmatpush1.bf16.xpose.msra.mxu0 %v8536_v18  ;;  %6789 = vmatpush1.bf16.xpose.msra.mxu1 %v8539_v19  ;;  %v828_v18 = vrot.slane %v814_v7, %v8721_v11  ;;  %v829_v19 = vcombine.high %v821_v17, %v821_v17  ;;  %v8597_v7 = vld [vmem:[%s10135_s1 + $0x8d4] ss:$784 sps:$4 sm:$0xff]  }
 0x26c   :  { %6826 = vmatprep.subr.bf16.mxu0 %v8545_v22  ;;  %6866 = vmatprep.subr.bf16.mxu1 %v8548_v23  ;;  %v1308_v22 = vpack.c.bf16 %v811_v53, %v811_v53  ;;  %v8569_v23 = vld [vmem:[%s10135_s1 + $0x8b0] ss:$784 sps:$4 sm:$0xff]   ;;  %v8590_v53 = vld [vmem:[%s10135_s1 + $0x2a4] ss:$784 sps:$4 sm:$0xff]  }
 0x26d   :  { %v830_v20 = vcombine.high %v828_v18, %v828_v18  ;;  %v1311_v27 = vpack.c.bf16 %v829_v19, %v829_v19  ;;  %v8606_v19 = vld [vmem:[%s10135_s1 + $0x2bc] ss:$784 sps:$4 sm:$0xff]  }
 0x272   :  { %v5808_v36 = vpop.f32.mrf.mxu0  ;;  %v5848_v37 = vpop.f32.mrf.mxu1  ;;  %6767 = vmatmul.mubr.bf16.vlgmr.msra.gmra.mxu0 %v1298_v28  ;;  %6807 = vmatmul.mubr.bf16.vlgmr.msra.gmra.mxu1 %v1300_v29  ;;  %v1313_v28 = vpack.c.bf16 %v830_v20, %v830_v20 }
 0x273   :  { %v5809_v39 = vadd.f32 %v5808_v36, %v5769_v14  ;;  %6827 = vmatpush1.bf16.xpose.msra.mxu0 %v8543_v30  ;;  %6867 = vmatpush1.bf16.xpose.msra.mxu1 %v8546_v31  ;;  %v61_v31 = vld [vmem:[%s10136_s0 + $0x150] sm:$0xff] }
 0x274   :  { %v5810_v40 = vpop.f32.mrf.mxu0  ;;  %v5850_v41 = vpop.f32.mrf.mxu1  ;;  %6828 = vmatprep.subr.bf16.mxu0 %v8551_v32  ;;  %6868 = vmatprep.subr.bf16.mxu1 %v8554_v33  ;;  %v831_v36 = vcombine.high %v61_v31, %v61_v31 }
 0x275   :  { %v5849_v42 = vadd.f32 %v5848_v37, %v5809_v39  ;;  %6846 = vmatprep.mubr.bf16.mxu0 %v1303_v34  ;;  %6886 = vmatprep.mubr.bf16.mxu1 %v1305_v35  ;;  %v8575_v39 = vld [vmem:[%s10135_s1 + $0x290] ss:$784 sps:$4 sm:$0xff]   ;;  %v8578_v40 = vld [vmem:[%s10135_s1 + $0x298] ss:$784 sps:$4 sm:$0xff]  }
 0x276   :  { %v5811_v44 = vpop.f32.mrf.mxu0  ;;  %v5851_v45 = vpop.f32.mrf.mxu1 }
 0x277   :  { %v8587_v44 = vld [vmem:[%s10135_s1 + $0x8cc] ss:$784 sps:$4 sm:$0xff]   ;;  %v838_v45 = vrot.slane %v61_v31, %v8721_v11 }
 0x278   :  { %v5812_v48 = vpop.f32.mrf.mxu0  ;;  %v5852_v49 = vpop.f32.mrf.mxu1 }
 0x279   :  { %v1310_v49 = vpack.c.bf16 %v821_v17, %v821_v17  ;;  %v8598_v17 = vld [vmem:[%s10135_s1 + $0x8d8] ss:$784 sps:$4 sm:$0xff]  }
 0x27b   :  { %6829 = vmatpush1.bf16.xpose.msra.mxu0 %v8549_v46  ;;  %6869 = vmatpush1.bf16.xpose.msra.mxu1 %v8552_v47  ;;  %v845_v46 = vrot.slane %v831_v36, %v8721_v11  ;;  %v846_v47 = vcombine.high %v838_v45, %v838_v45  ;;  %v8610_v36 = vld [vmem:[%s10135_s1 + $0x8e4] ss:$784 sps:$4 sm:$0xff]  }
 0x27c   :  { %6906 = vmatprep.subr.bf16.mxu0 %v8558_v50  ;;  %6946 = vmatprep.subr.bf16.mxu1 %v8561_v51  ;;  %v1312_v50 = vpack.c.bf16 %v828_v18, %v828_v18  ;;  %v8582_v51 = vld [vmem:[%s10135_s1 + $0x8c0] ss:$784 sps:$4 sm:$0xff]   ;;  %v8603_v18 = vld [vmem:[%s10135_s1 + $0x2b4] ss:$784 sps:$4 sm:$0xff]  }
 0x27d   :  { %v847_v48 = vcombine.high %v845_v46, %v845_v46  ;;  %v1315_v55 = vpack.c.bf16 %v846_v47, %v846_v47  ;;  %v8619_v47 = vld [vmem:[%s10135_s1 + $0x2cc] ss:$784 sps:$4 sm:$0xff]  }
 0x282   :  { %v5888_v0 = vpop.f32.mrf.mxu0  ;;  %v5928_v1 = vpop.f32.mrf.mxu1  ;;  %6847 = vmatmul.mubr.bf16.vlgmr.msra.gmra.mxu0 %v1302_v56  ;;  %6887 = vmatmul.mubr.bf16.vlgmr.msra.gmra.mxu1 %v1304_v57  ;;  %v1317_v56 = vpack.c.bf16 %v847_v48, %v847_v48 }
 0x283   :  { %v5889_v3 = vadd.f32 %v5888_v0, %v5849_v42  ;;  %6907 = vmatpush1.bf16.xpose.msra.mxu0 %v8556_v58  ;;  %6947 = vmatpush1.bf16.xpose.msra.mxu1 %v8559_v59  ;;  %v62_v59 = vld [vmem:[%s10136_s0 + $0x158] sm:$0xff] }
 0x284   :  { %v5890_v4 = vpop.f32.mrf.mxu0  ;;  %v5930_v5 = vpop.f32.mrf.mxu1  ;;  %6908 = vmatprep.subr.bf16.mxu0 %v8564_v60  ;;  %6948 = vmatprep.subr.bf16.mxu1 %v8567_v61  ;;  %v848_v0 = vcombine.high %v62_v59, %v62_v59 }
 0x285   :  { %v5929_v6 = vadd.f32 %v5928_v1, %v5889_v3  ;;  %6926 = vmatprep.mubr.bf16.mxu0 %v1307_v62  ;;  %6966 = vmatprep.mubr.bf16.mxu1 %v1309_v63  ;;  %v8588_v3 = vld [vmem:[%s10135_s1 + $0x2a0] ss:$784 sps:$4 sm:$0xff]   ;;  %v8591_v4 = vld [vmem:[%s10135_s1 + $0x2a8] ss:$784 sps:$4 sm:$0xff]  }
 0x286   :  { %v5891_v8 = vpop.f32.mrf.mxu0  ;;  %v5931_v9 = vpop.f32.mrf.mxu1 }
 0x287   :  { %v8600_v8 = vld [vmem:[%s10135_s1 + $0x8dc] ss:$784 sps:$4 sm:$0xff]   ;;  %v855_v9 = vrot.slane %v62_v59, %v8721_v11 }
 0x288   :  { %v5892_v13 = vpop.f32.mrf.mxu0  ;;  %v5932_v14 = vpop.f32.mrf.mxu1 }
 0x289   :  { %v1314_v14 = vpack.c.bf16 %v838_v45, %v838_v45  ;;  %v8611_v45 = vld [vmem:[%s10135_s1 + $0x8e8] ss:$784 sps:$4 sm:$0xff]  }
 0x28b   :  { %6909 = vmatpush1.bf16.xpose.msra.mxu0 %v8562_v10  ;;  %6949 = vmatpush1.bf16.xpose.msra.mxu1 %v8565_v12  ;;  %v862_v10 = vrot.slane %v848_v0, %v8721_v11  ;;  %v863_v12 = vcombine.high %v855_v9, %v855_v9  ;;  %v8623_v0 = vld [vmem:[%s10135_s1 + $0x8f4] ss:$784 sps:$4 sm:$0xff]  }
 0x28c   :  { %6986 = vmatprep.subr.bf16.mxu0 %v8571_v15  ;;  %7026 = vmatprep.subr.bf16.mxu1 %v8574_v16  ;;  %v1316_v15 = vpack.c.bf16 %v845_v46, %v845_v46  ;;  %v8595_v16 = vld [vmem:[%s10135_s1 + $0x8d0] ss:$784 sps:$4 sm:$0xff]   ;;  %v8616_v46 = vld [vmem:[%s10135_s1 + $0x2c4] ss:$784 sps:$4 sm:$0xff]  }
 0x28d   :  { %v864_v13 = vcombine.high %v862_v10, %v862_v10  ;;  %v1319_v20 = vpack.c.bf16 %v863_v12, %v863_v12  ;;  %v8632_v12 = vld [vmem:[%s10135_s1 + $0x2dc] ss:$784 sps:$4 sm:$0xff]  }
 0x292   :  { %v5968_v29 = vpop.f32.mrf.mxu0  ;;  %v6008_v30 = vpop.f32.mrf.mxu1  ;;  %6927 = vmatmul.mubr.bf16.vlgmr.msra.gmra.mxu0 %v1306_v21  ;;  %6967 = vmatmul.mubr.bf16.vlgmr.msra.gmra.mxu1 %v1308_v22  ;;  %v1321_v21 = vpack.c.bf16 %v864_v13, %v864_v13 }
 0x293   :  { %v5969_v32 = vadd.f32 %v5968_v29, %v5929_v6  ;;  %6987 = vmatpush1.bf16.xpose.msra.mxu0 %v8569_v23  ;;  %7027 = vmatpush1.bf16.xpose.msra.mxu1 %v8572_v24  ;;  %v63_v24 = vld [vmem:[%s10136_s0 + $0x160] sm:$0xff] }
 0x294   :  { %v5970_v33 = vpop.f32.mrf.mxu0  ;;  %v6010_v34 = vpop.f32.mrf.mxu1  ;;  %6988 = vmatprep.subr.bf16.mxu0 %v8577_v25  ;;  %7028 = vmatprep.subr.bf16.mxu1 %v8580_v26  ;;  %v865_v29 = vcombine.high %v63_v24, %v63_v24 }
 0x295   :  { %v6009_v35 = vadd.f32 %v6008_v30, %v5969_v32  ;;  %7006 = vmatprep.mubr.bf16.mxu0 %v1311_v27  ;;  %7046 = vmatprep.mubr.bf16.mxu1 %v1313_v28  ;;  %v8601_v32 = vld [vmem:[%s10135_s1 + $0x2b0] ss:$784 sps:$4 sm:$0xff]   ;;  %v8604_v33 = vld [vmem:[%s10135_s1 + $0x2b8] ss:$784 sps:$4 sm:$0xff]  }
 0x296   :  { %v5971_v37 = vpop.f32.mrf.mxu0  ;;  %v6011_v38 = vpop.f32.mrf.mxu1 }
 0x297   :  { %v8613_v37 = vld [vmem:[%s10135_s1 + $0x8ec] ss:$784 sps:$4 sm:$0xff]   ;;  %v872_v38 = vrot.slane %v63_v24, %v8721_v11 }
 0x298   :  { %v5972_v41 = vpop.f32.mrf.mxu0  ;;  %v6012_v42 = vpop.f32.mrf.mxu1 }
 0x299   :  { %v1318_v42 = vpack.c.bf16 %v855_v9, %v855_v9  ;;  %v8624_v9 = vld [vmem:[%s10135_s1 + $0x8f8] ss:$784 sps:$4 sm:$0xff]  }
 0x29b   :  { %6989 = vmatpush1.bf16.xpose.msra.mxu0 %v8575_v39  ;;  %7029 = vmatpush1.bf16.xpose.msra.mxu1 %v8578_v40  ;;  %v879_v39 = vrot.slane %v865_v29, %v8721_v11  ;;  %v880_v40 = vcombine.high %v872_v38, %v872_v38  ;;  %v8636_v29 = vld [vmem:[%s10135_s1 + $0x904] ss:$784 sps:$4 sm:$0xff]  }
 0x29c   :  { %7066 = vmatprep.subr.bf16.mxu0 %v8584_v43  ;;  %7106 = vmatprep.subr.bf16.mxu1 %v8587_v44  ;;  %v1320_v43 = vpack.c.bf16 %v862_v10, %v862_v10  ;;  %v8608_v44 = vld [vmem:[%s10135_s1 + $0x8e0] ss:$784 sps:$4 sm:$0xff]   ;;  %v8629_v10 = vld [vmem:[%s10135_s1 + $0x2d4] ss:$784 sps:$4 sm:$0xff]  }
 0x29d   :  { %v881_v41 = vcombine.high %v879_v39, %v879_v39  ;;  %v1323_v48 = vpack.c.bf16 %v880_v40, %v880_v40  ;;  %v8645_v40 = vld [vmem:[%s10135_s1 + $0x2ec] ss:$784 sps:$4 sm:$0xff]  }
 0x2a2   :  { %v6048_v57 = vpop.f32.mrf.mxu0  ;;  %v6088_v58 = vpop.f32.mrf.mxu1  ;;  %7007 = vmatmul.mubr.bf16.vlgmr.msra.gmra.mxu0 %v1310_v49  ;;  %7047 = vmatmul.mubr.bf16.vlgmr.msra.gmra.mxu1 %v1312_v50  ;;  %v1325_v49 = vpack.c.bf16 %v881_v41, %v881_v41 }
 0x2a3   :  { %v6049_v60 = vadd.f32 %v6048_v57, %v6009_v35  ;;  %7067 = vmatpush1.bf16.xpose.msra.mxu0 %v8582_v51  ;;  %7107 = vmatpush1.bf16.xpose.msra.mxu1 %v8585_v52  ;;  %v64_v52 = vld [vmem:[%s10136_s0 + $0x168] sm:$0xff] }
 0x2a4   :  { %v6050_v61 = vpop.f32.mrf.mxu0  ;;  %v6090_v62 = vpop.f32.mrf.mxu1  ;;  %7068 = vmatprep.subr.bf16.mxu0 %v8590_v53  ;;  %7108 = vmatprep.subr.bf16.mxu1 %v8593_v54  ;;  %v882_v57 = vcombine.high %v64_v52, %v64_v52 }
 0x2a5   :  { %v6089_v63 = vadd.f32 %v6088_v58, %v6049_v60  ;;  %7086 = vmatprep.mubr.bf16.mxu0 %v1315_v55  ;;  %7126 = vmatprep.mubr.bf16.mxu1 %v1317_v56  ;;  %v8614_v60 = vld [vmem:[%s10135_s1 + $0x2c0] ss:$784 sps:$4 sm:$0xff]   ;;  %v8617_v61 = vld [vmem:[%s10135_s1 + $0x2c8] ss:$784 sps:$4 sm:$0xff]  }
 0x2a6   :  { %v6051_v1 = vpop.f32.mrf.mxu0  ;;  %v6091_v2 = vpop.f32.mrf.mxu1 }
 0x2a7   :  { %v8626_v1 = vld [vmem:[%s10135_s1 + $0x8fc] ss:$784 sps:$4 sm:$0xff]   ;;  %v889_v2 = vrot.slane %v64_v52, %v8721_v11 }
 0x2a8   :  { %v6052_v5 = vpop.f32.mrf.mxu0  ;;  %v6092_v6 = vpop.f32.mrf.mxu1 }
 0x2a9   :  { %v1322_v6 = vpack.c.bf16 %v872_v38, %v872_v38  ;;  %v8637_v38 = vld [vmem:[%s10135_s1 + $0x908] ss:$784 sps:$4 sm:$0xff]  }
 0x2ab   :  { %7069 = vmatpush1.bf16.xpose.msra.mxu0 %v8588_v3  ;;  %7109 = vmatpush1.bf16.xpose.msra.mxu1 %v8591_v4  ;;  %v896_v3 = vrot.slane %v882_v57, %v8721_v11  ;;  %v897_v4 = vcombine.high %v889_v2, %v889_v2  ;;  %v8649_v57 = vld [vmem:[%s10135_s1 + $0x914] ss:$784 sps:$4 sm:$0xff]  }
 0x2ac   :  { %7146 = vmatprep.subr.bf16.mxu0 %v8597_v7  ;;  %7186 = vmatprep.subr.bf16.mxu1 %v8600_v8  ;;  %v1324_v7 = vpack.c.bf16 %v879_v39, %v879_v39  ;;  %v8621_v8 = vld [vmem:[%s10135_s1 + $0x8f0] ss:$784 sps:$4 sm:$0xff]   ;;  %v8642_v39 = vld [vmem:[%s10135_s1 + $0x2e4] ss:$784 sps:$4 sm:$0xff]  }
 0x2ad   :  { %v898_v5 = vcombine.high %v896_v3, %v896_v3  ;;  %v1327_v13 = vpack.c.bf16 %v897_v4, %v897_v4  ;;  %v8658_v4 = vld [vmem:[%s10135_s1 + $0x2fc] ss:$784 sps:$4 sm:$0xff]  }
 0x2b2   :  { %v6128_v22 = vpop.f32.mrf.mxu0  ;;  %v6168_v23 = vpop.f32.mrf.mxu1  ;;  %7087 = vmatmul.mubr.bf16.vlgmr.msra.gmra.mxu0 %v1314_v14  ;;  %7127 = vmatmul.mubr.bf16.vlgmr.msra.gmra.mxu1 %v1316_v15  ;;  %v1329_v14 = vpack.c.bf16 %v898_v5, %v898_v5 }
 0x2b3   :  { %v6129_v25 = vadd.f32 %v6128_v22, %v6089_v63  ;;  %7147 = vmatpush1.bf16.xpose.msra.mxu0 %v8595_v16  ;;  %7187 = vmatpush1.bf16.xpose.msra.mxu1 %v8598_v17  ;;  %v65_v17 = vld [vmem:[%s10136_s0 + $0x170] sm:$0xff] }
 0x2b4   :  { %v6130_v26 = vpop.f32.mrf.mxu0  ;;  %v6170_v27 = vpop.f32.mrf.mxu1  ;;  %7148 = vmatprep.subr.bf16.mxu0 %v8603_v18  ;;  %7188 = vmatprep.subr.bf16.mxu1 %v8606_v19  ;;  %v899_v22 = vcombine.high %v65_v17, %v65_v17 }
 0x2b5   :  { %v6169_v28 = vadd.f32 %v6168_v23, %v6129_v25  ;;  %7166 = vmatprep.mubr.bf16.mxu0 %v1319_v20  ;;  %7206 = vmatprep.mubr.bf16.mxu1 %v1321_v21  ;;  %v8627_v25 = vld [vmem:[%s10135_s1 + $0x2d0] ss:$784 sps:$4 sm:$0xff]   ;;  %v8630_v26 = vld [vmem:[%s10135_s1 + $0x2d8] ss:$784 sps:$4 sm:$0xff]  }
 0x2b6   :  { %v6131_v30 = vpop.f32.mrf.mxu0  ;;  %v6171_v31 = vpop.f32.mrf.mxu1 }
 0x2b7   :  { %v8639_v30 = vld [vmem:[%s10135_s1 + $0x90c] ss:$784 sps:$4 sm:$0xff]   ;;  %v906_v31 = vrot.slane %v65_v17, %v8721_v11 }
 0x2b8   :  { %v6132_v34 = vpop.f32.mrf.mxu0  ;;  %v6172_v35 = vpop.f32.mrf.mxu1 }
 0x2b9   :  { %v1326_v35 = vpack.c.bf16 %v889_v2, %v889_v2  ;;  %v8650_v2 = vld [vmem:[%s10135_s1 + $0x918] ss:$784 sps:$4 sm:$0xff]  }
 0x2bb   :  { %7149 = vmatpush1.bf16.xpose.msra.mxu0 %v8601_v32  ;;  %7189 = vmatpush1.bf16.xpose.msra.mxu1 %v8604_v33  ;;  %v913_v32 = vrot.slane %v899_v22, %v8721_v11  ;;  %v914_v33 = vcombine.high %v906_v31, %v906_v31  ;;  %v8662_v22 = vld [vmem:[%s10135_s1 + $0x924] ss:$784 sps:$4 sm:$0xff]  }
 0x2bc   :  { %7226 = vmatprep.subr.bf16.mxu0 %v8610_v36  ;;  %7266 = vmatprep.subr.bf16.mxu1 %v8613_v37  ;;  %v1328_v36 = vpack.c.bf16 %v896_v3, %v896_v3  ;;  %v8634_v37 = vld [vmem:[%s10135_s1 + $0x900] ss:$784 sps:$4 sm:$0xff]   ;;  %v8655_v3 = vld [vmem:[%s10135_s1 + $0x2f4] ss:$784 sps:$4 sm:$0xff]  }
 0x2bd   :  { %v915_v34 = vcombine.high %v913_v32, %v913_v32  ;;  %v1331_v41 = vpack.c.bf16 %v914_v33, %v914_v33 }
 0x2c2   :  { %v6208_v50 = vpop.f32.mrf.mxu0  ;;  %v6248_v51 = vpop.f32.mrf.mxu1  ;;  %7167 = vmatmul.mubr.bf16.vlgmr.msra.gmra.mxu0 %v1318_v42  ;;  %7207 = vmatmul.mubr.bf16.vlgmr.msra.gmra.mxu1 %v1320_v43  ;;  %v1333_v42 = vpack.c.bf16 %v915_v34, %v915_v34 }
 0x2c3   :  { %v6209_v53 = vadd.f32 %v6208_v50, %v6169_v28  ;;  %7227 = vmatpush1.bf16.xpose.msra.mxu0 %v8608_v44  ;;  %7267 = vmatpush1.bf16.xpose.msra.mxu1 %v8611_v45  ;;  %v66_v45 = vld [vmem:[%s10136_s0 + $0x178] sm:$0xff] }
 0x2c4   :  { %v6210_v54 = vpop.f32.mrf.mxu0  ;;  %v6250_v55 = vpop.f32.mrf.mxu1  ;;  %7228 = vmatprep.subr.bf16.mxu0 %v8616_v46  ;;  %7268 = vmatprep.subr.bf16.mxu1 %v8619_v47  ;;  %v916_v50 = vcombine.high %v66_v45, %v66_v45 }
 0x2c5   :  { %v6249_v56 = vadd.f32 %v6248_v51, %v6209_v53  ;;  %7246 = vmatprep.mubr.bf16.mxu0 %v1323_v48  ;;  %7286 = vmatprep.mubr.bf16.mxu1 %v1325_v49  ;;  %v8640_v53 = vld [vmem:[%s10135_s1 + $0x2e0] ss:$784 sps:$4 sm:$0xff]   ;;  %v8643_v54 = vld [vmem:[%s10135_s1 + $0x2e8] ss:$784 sps:$4 sm:$0xff]  }
 0x2c6   :  { %v6211_v58 = vpop.f32.mrf.mxu0  ;;  %v6251_v59 = vpop.f32.mrf.mxu1 }
 0x2c7   :  { %v8652_v58 = vld [vmem:[%s10135_s1 + $0x91c] ss:$784 sps:$4 sm:$0xff]   ;;  %v923_v59 = vrot.slane %v66_v45, %v8721_v11 }
 0x2c8   :  { %v6212_v62 = vpop.f32.mrf.mxu0  ;;  %v6252_v63 = vpop.f32.mrf.mxu1 }
 0x2c9   :  { %v1330_v63 = vpack.c.bf16 %v906_v31, %v906_v31  ;;  %v8663_v31 = vld [vmem:[%s10135_s1 + $0x928] ss:$784 sps:$4 sm:$0xff]  }
 0x2cb   :  { %7229 = vmatpush1.bf16.xpose.msra.mxu0 %v8614_v60  ;;  %7269 = vmatpush1.bf16.xpose.msra.mxu1 %v8617_v61  ;;  %v930_v60 = vrot.slane %v916_v50, %v8721_v11  ;;  %v931_v61 = vcombine.high %v923_v59, %v923_v59 }
 0x2cc   :  { %7306 = vmatprep.subr.bf16.mxu0 %v8623_v0  ;;  %7346 = vmatprep.subr.bf16.mxu1 %v8626_v1  ;;  %v1332_v0 = vpack.c.bf16 %v913_v32, %v913_v32  ;;  %v8647_v1 = vld [vmem:[%s10135_s1 + $0x910] ss:$784 sps:$4 sm:$0xff]   ;;  %v8671_v32 = vld [vmem:[%s10135_s1 + $0x30c] ss:$784 sps:$4 sm:$0xff]  }
 0x2cd   :  { %v932_v62 = vcombine.high %v930_v60, %v930_v60  ;;  %v1335_v5 = vpack.c.bf16 %v931_v61, %v931_v61 }
 0x2d2   :  { %v6288_v15 = vpop.f32.mrf.mxu0  ;;  %v6328_v16 = vpop.f32.mrf.mxu1  ;;  %7247 = vmatmul.mubr.bf16.vlgmr.msra.gmra.mxu0 %v1322_v6  ;;  %7287 = vmatmul.mubr.bf16.vlgmr.msra.gmra.mxu1 %v1324_v7  ;;  %v1337_v6 = vpack.c.bf16 %v932_v62, %v932_v62 }
 0x2d3   :  { %v6289_v18 = vadd.f32 %v6288_v15, %v6249_v56  ;;  %7307 = vmatpush1.bf16.xpose.msra.mxu0 %v8621_v8  ;;  %7347 = vmatpush1.bf16.xpose.msra.mxu1 %v8624_v9  ;;  %v67_v9 = vld [vmem:[%s10136_s0 + $0x180] sm:$0xff] }
 0x2d4   :  { %v6290_v19 = vpop.f32.mrf.mxu0  ;;  %v6330_v20 = vpop.f32.mrf.mxu1  ;;  %7308 = vmatprep.subr.bf16.mxu0 %v8629_v10  ;;  %7348 = vmatprep.subr.bf16.mxu1 %v8632_v12  ;;  %v933_v15 = vcombine.high %v67_v9, %v67_v9 }
 0x2d5   :  { %v6329_v21 = vadd.f32 %v6328_v16, %v6289_v18  ;;  %7326 = vmatprep.mubr.bf16.mxu0 %v1327_v13  ;;  %7366 = vmatprep.mubr.bf16.mxu1 %v1329_v14  ;;  %v8653_v18 = vld [vmem:[%s10135_s1 + $0x2f0] ss:$784 sps:$4 sm:$0xff]   ;;  %v8656_v19 = vld [vmem:[%s10135_s1 + $0x2f8] ss:$784 sps:$4 sm:$0xff]  }
 0x2d6   :  { %v6291_v23 = vpop.f32.mrf.mxu0  ;;  %v6331_v24 = vpop.f32.mrf.mxu1 }
 0x2d7   :  { %v8665_v23 = vld [vmem:[%s10135_s1 + $0x92c] ss:$784 sps:$4 sm:$0xff]   ;;  %v940_v24 = vrot.slane %v67_v9, %v8721_v11 }
 0x2d8   :  { %v6292_v27 = vpop.f32.mrf.mxu0  ;;  %v6332_v28 = vpop.f32.mrf.mxu1 }
 0x2d9   :  { %v1334_v28 = vpack.c.bf16 %v923_v59, %v923_v59 }
 0x2db   :  { %7309 = vmatpush1.bf16.xpose.msra.mxu0 %v8627_v25  ;;  %7349 = vmatpush1.bf16.xpose.msra.mxu1 %v8630_v26  ;;  %v947_v25 = vrot.slane %v933_v15, %v8721_v11  ;;  %v948_v26 = vcombine.high %v940_v24, %v940_v24  ;;  %v8668_v11 = vld [vmem:[%s10135_s1 + $0x304] ss:$784 sps:$4 sm:$0xff]  }
 0x2dc   :  { %7386 = vmatprep.subr.bf16.mxu0 %v8636_v29  ;;  %7426 = vmatprep.subr.bf16.mxu1 %v8639_v30  ;;  %v1336_v29 = vpack.c.bf16 %v930_v60, %v930_v60  ;;  %v8660_v30 = vld [vmem:[%s10135_s1 + $0x920] ss:$784 sps:$4 sm:$0xff]  }
 0x2dd   :  { %v949_v27 = vcombine.high %v947_v25, %v947_v25  ;;  %v1339_v33 = vpack.c.bf16 %v948_v26, %v948_v26 }
 0x2df   :  { %v1341_v34 = vpack.c.bf16 %v949_v27, %v949_v27 }
 0x2e2   :  { %v6368_v43 = vpop.f32.mrf.mxu0  ;;  %v6408_v44 = vpop.f32.mrf.mxu1  ;;  %7327 = vmatmul.mubr.bf16.vlgmr.msra.gmra.mxu0 %v1326_v35  ;;  %7367 = vmatmul.mubr.bf16.vlgmr.msra.gmra.mxu1 %v1328_v36 }
 0x2e3   :  { %v6369_v46 = vadd.f32 %v6368_v43, %v6329_v21  ;;  %7387 = vmatpush1.bf16.xpose.msra.mxu0 %v8634_v37  ;;  %7427 = vmatpush1.bf16.xpose.msra.mxu1 %v8637_v38  ;;  %v8666_v43 = vld [vmem:[%s10135_s1 + $0x300] ss:$784 sps:$4 sm:$0xff]  }
 0x2e4   :  { %v6370_v47 = vpop.f32.mrf.mxu0  ;;  %v6410_v48 = vpop.f32.mrf.mxu1  ;;  %7388 = vmatprep.subr.bf16.mxu0 %v8642_v39  ;;  %7428 = vmatprep.subr.bf16.mxu1 %v8645_v40 }
 0x2e5   :  { %v6409_v49 = vadd.f32 %v6408_v44, %v6369_v46  ;;  %7406 = vmatprep.mubr.bf16.mxu0 %v1331_v41  ;;  %7446 = vmatprep.mubr.bf16.mxu1 %v1333_v42  ;;  %v8669_v44 = vld [vmem:[%s10135_s1 + $0x308] ss:$784 sps:$4 sm:$0xff]   ;;  %v1338_v47 = vpack.c.bf16 %v940_v24, %v940_v24  ;;  %v1340_v48 = vpack.c.bf16 %v947_v25, %v947_v25 }
 0x2e6   :  { %v6371_v51 = vpop.f32.mrf.mxu0  ;;  %v6411_v52 = vpop.f32.mrf.mxu1 }
 0x2e8   :  { %v6372_v55 = vpop.f32.mrf.mxu0  ;;  %v6412_v56 = vpop.f32.mrf.mxu1 }
 0x2eb   :  { %7389 = vmatpush1.bf16.xpose.msra.mxu0 %v8640_v53  ;;  %7429 = vmatpush1.bf16.xpose.msra.mxu1 %v8643_v54 }
 0x2ec   :  { %7466 = vmatprep.subr.bf16.mxu0 %v8649_v57  ;;  %7506 = vmatprep.subr.bf16.mxu1 %v8652_v58 }
 0x2f2   :  { %v6448_v7 = vpop.f32.mrf.mxu0  ;;  %v6488_v8 = vpop.f32.mrf.mxu1  ;;  %7407 = vmatmul.mubr.bf16.vlgmr.msra.gmra.mxu0 %v1330_v63  ;;  %7447 = vmatmul.mubr.bf16.vlgmr.msra.gmra.mxu1 %v1332_v0 }
 0x2f3   :  { %v6449_v10 = vadd.f32 %v6448_v7, %v6409_v49  ;;  %7467 = vmatpush1.bf16.xpose.msra.mxu0 %v8647_v1  ;;  %7507 = vmatpush1.bf16.xpose.msra.mxu1 %v8650_v2 }
 0x2f4   :  { %v6450_v12 = vpop.f32.mrf.mxu0  ;;  %v6490_v13 = vpop.f32.mrf.mxu1  ;;  %7468 = vmatprep.subr.bf16.mxu0 %v8655_v3  ;;  %7508 = vmatprep.subr.bf16.mxu1 %v8658_v4 }
 0x2f5   :  { %v6489_v14 = vadd.f32 %v6488_v8, %v6449_v10  ;;  %7486 = vmatprep.mubr.bf16.mxu0 %v1335_v5  ;;  %7526 = vmatprep.mubr.bf16.mxu1 %v1337_v6 }
 0x2f6   :  { %v6451_v16 = vpop.f32.mrf.mxu0  ;;  %v6491_v17 = vpop.f32.mrf.mxu1 }
 0x2f8   :  { %v6452_v20 = vpop.f32.mrf.mxu0  ;;  %v6492_v21 = vpop.f32.mrf.mxu1 }
 0x2fb   :  { %7469 = vmatpush1.bf16.xpose.msra.mxu0 %v8653_v18  ;;  %7509 = vmatpush1.bf16.xpose.msra.mxu1 %v8656_v19 }
 0x2fc   :  { %7546 = vmatprep.subr.bf16.mxu0 %v8662_v22  ;;  %7586 = vmatprep.subr.bf16.mxu1 %v8665_v23 }
 0x302   :  { %v6528_v35 = vpop.f32.mrf.mxu0  ;;  %v6568_v36 = vpop.f32.mrf.mxu1  ;;  %7487 = vmatmul.mubr.bf16.vlgmr.msra.gmra.mxu0 %v1334_v28  ;;  %7527 = vmatmul.mubr.bf16.vlgmr.msra.gmra.mxu1 %v1336_v29 }
 0x303   :  { %v6529_v37 = vadd.f32 %v6528_v35, %v6489_v14  ;;  %7547 = vmatpush1.bf16.xpose.msra.mxu0 %v8660_v30  ;;  %7587 = vmatpush1.bf16.xpose.msra.mxu1 %v8663_v31 }
 0x304   :  { %v6530_v38 = vpop.f32.mrf.mxu0  ;;  %v6570_v39 = vpop.f32.mrf.mxu1  ;;  %7548 = vmatprep.subr.bf16.mxu0 %v8668_v11  ;;  %7588 = vmatprep.subr.bf16.mxu1 %v8671_v32 }
 0x305   :  { %v6569_v40 = vadd.f32 %v6568_v36, %v6529_v37  ;;  %7566 = vmatprep.mubr.bf16.mxu0 %v1339_v33  ;;  %7606 = vmatprep.mubr.bf16.mxu1 %v1341_v34 }
 0x306   :  { %v6531_v41 = vpop.f32.mrf.mxu0  ;;  %v6571_v42 = vpop.f32.mrf.mxu1 }
 0x308   :  { %v6532_v45 = vpop.f32.mrf.mxu0  ;;  %v6572_v46 = vpop.f32.mrf.mxu1 }
 0x30b   :  { %7549 = vmatpush1.bf16.xpose.msra.mxu0 %v8666_v43  ;;  %7589 = vmatpush1.bf16.xpose.msra.mxu1 %v8669_v44 }
 0x312   :  { %v6608_v49 = vpop.f32.mrf.mxu0  ;;  %v6648_v50 = vpop.f32.mrf.mxu1  ;;  %7567 = vmatmul.mubr.bf16.vlgmr.msra.gmra.mxu0 %v1338_v47  ;;  %7607 = vmatmul.mubr.bf16.vlgmr.msra.gmra.mxu1 %v1340_v48 }
 0x313   :  { %v6609_v51 = vadd.f32 %v6608_v49, %v6569_v40 }
 0x314   :  { %v6610_v52 = vpop.f32.mrf.mxu0  ;;  %v6650_v53 = vpop.f32.mrf.mxu1 }
 0x315   :  { %v6649_v54 = vadd.f32 %v6648_v50, %v6609_v51 }
 0x316   :  { %v6611_v55 = vpop.f32.mrf.mxu0  ;;  %v6651_v56 = vpop.f32.mrf.mxu1 }
 0x318   :  { %v6612_v57 = vpop.f32.mrf.mxu0  ;;  %v6652_v58 = vpop.f32.mrf.mxu1 }
 0x322   :  { %v6688_v59 = vpop.f32.mrf.mxu0  ;;  %v6728_v60 = vpop.f32.mrf.mxu1 }
 0x323   :  { %v6689_v61 = vadd.f32 %v6688_v59, %v6649_v54 }
 0x324   :  { %v6690_v62 = vpop.f32.mrf.mxu0  ;;  %v6730_v63 = vpop.f32.mrf.mxu1 }
 0x325   :  { %v6729_v0 = vadd.f32 %v6728_v60, %v6689_v61 }
 0x326   :  { %v6691_v1 = vpop.f32.mrf.mxu0  ;;  %v6731_v2 = vpop.f32.mrf.mxu1 }
 0x328   :  { %v6692_v3 = vpop.f32.mrf.mxu0  ;;  %v6732_v4 = vpop.f32.mrf.mxu1 }
 0x332   :  { %v6768_v5 = vpop.f32.mrf.mxu0  ;;  %v6808_v6 = vpop.f32.mrf.mxu1 }
 0x333   :  { %v6769_v7 = vadd.f32 %v6768_v5, %v6729_v0 }
 0x334   :  { %v6770_v8 = vpop.f32.mrf.mxu0  ;;  %v6810_v9 = vpop.f32.mrf.mxu1 }
 0x335   :  { %v6809_v10 = vadd.f32 %v6808_v6, %v6769_v7 }
 0x336   :  { %v6771_v12 = vpop.f32.mrf.mxu0  ;;  %v6811_v13 = vpop.f32.mrf.mxu1 }
 0x338   :  { %v6772_v14 = vpop.f32.mrf.mxu0  ;;  %v6812_v15 = vpop.f32.mrf.mxu1 }
 0x342   :  { %v6848_v16 = vpop.f32.mrf.mxu0  ;;  %v6888_v17 = vpop.f32.mrf.mxu1 }
 0x343   :  { %v6849_v18 = vadd.f32 %v6848_v16, %v6809_v10 }
 0x344   :  { %v6850_v19 = vpop.f32.mrf.mxu0  ;;  %v6890_v20 = vpop.f32.mrf.mxu1 }
 0x345   :  { %v6889_v21 = vadd.f32 %v6888_v17, %v6849_v18 }
 0x346   :  { %v6851_v22 = vpop.f32.mrf.mxu0  ;;  %v6891_v23 = vpop.f32.mrf.mxu1 }
 0x348   :  { %v6852_v24 = vpop.f32.mrf.mxu0  ;;  %v6892_v25 = vpop.f32.mrf.mxu1 }
 0x352   :  { %v6928_v26 = vpop.f32.mrf.mxu0  ;;  %v6968_v27 = vpop.f32.mrf.mxu1 }
 0x353   :  { %v6929_v28 = vadd.f32 %v6928_v26, %v6889_v21 }
 0x354   :  { %v6930_v29 = vpop.f32.mrf.mxu0  ;;  %v6970_v30 = vpop.f32.mrf.mxu1 }
 0x355   :  { %v6969_v31 = vadd.f32 %v6968_v27, %v6929_v28 }
 0x356   :  { %v6931_v11 = vpop.f32.mrf.mxu0  ;;  %v6971_v32 = vpop.f32.mrf.mxu1 }
 0x358   :  { %v6932_v33 = vpop.f32.mrf.mxu0  ;;  %v6972_v34 = vpop.f32.mrf.mxu1 }
 0x362   :  { %v7008_v35 = vpop.f32.mrf.mxu0  ;;  %v7048_v36 = vpop.f32.mrf.mxu1 }
 0x363   :  { %v7009_v37 = vadd.f32 %v7008_v35, %v6969_v31 }
 0x364   :  { %v7010_v38 = vpop.f32.mrf.mxu0  ;;  %v7050_v39 = vpop.f32.mrf.mxu1 }
 0x365   :  { %v7049_v40 = vadd.f32 %v7048_v36, %v7009_v37 }
 0x366   :  { %v7011_v41 = vpop.f32.mrf.mxu0  ;;  %v7051_v42 = vpop.f32.mrf.mxu1 }
 0x368   :  { %v7012_v43 = vpop.f32.mrf.mxu0  ;;  %v7052_v44 = vpop.f32.mrf.mxu1 }
 0x372   :  { %v7088_v45 = vpop.f32.mrf.mxu0  ;;  %v7128_v46 = vpop.f32.mrf.mxu1 }
 0x373   :  { %v7089_v47 = vadd.f32 %v7088_v45, %v7049_v40 }
 0x374   :  { %v7090_v48 = vpop.f32.mrf.mxu0  ;;  %v7130_v49 = vpop.f32.mrf.mxu1 }
 0x375   :  { %v7129_v50 = vadd.f32 %v7128_v46, %v7089_v47  ;;  %v8033_v46 = vld [vmem:[%s10137_s2] ss:$0 sm:$0xff] }
 0x376   :  { %v7091_v51 = vpop.f32.mrf.mxu0  ;;  %v7131_v52 = vpop.f32.mrf.mxu1 }
 0x378   :  { %v7092_v53 = vpop.f32.mrf.mxu0  ;;  %v7132_v54 = vpop.f32.mrf.mxu1 }
 0x379   :  { %v7627_v54 = vstv %s10138_s3 }
 0x382   :  { %v7168_v55 = vpop.f32.mrf.mxu0  ;;  %v7208_v56 = vpop.f32.mrf.mxu1 }
 0x383   :  { %v7169_v20 = vadd.f32 %v7168_v55, %v7129_v50 }
 0x384   :  { %v7170_v57 = vpop.f32.mrf.mxu0  ;;  %v7210_v58 = vpop.f32.mrf.mxu1 }
 0x385   :  { %v7209_v25 = vadd.f32 %v7208_v56, %v7169_v20 }
 0x386   :  { %v7171_v59 = vpop.f32.mrf.mxu0  ;;  %v7211_v60 = vpop.f32.mrf.mxu1 }
 0x388   :  { %v7172_v61 = vpop.f32.mrf.mxu0  ;;  %v7212_v62 = vpop.f32.mrf.mxu1 }
 0x392   :  { %v7248_v63 = vpop.f32.mrf.mxu0  ;;  %v7288_v0 = vpop.f32.mrf.mxu1 }
 0x393   :  { %v7249_v26 = vadd.f32 %v7248_v63, %v7209_v25 }
 0x394   :  { %v7250_v1 = vpop.f32.mrf.mxu0  ;;  %v7290_v2 = vpop.f32.mrf.mxu1 }
 0x395   :  { %v7289_v27 = vadd.f32 %v7288_v0, %v7249_v26 }
 0x396   :  { %v7251_v3 = vpop.f32.mrf.mxu0  ;;  %v7291_v4 = vpop.f32.mrf.mxu1 }
 0x398   :  { %v7252_v5 = vpop.f32.mrf.mxu0  ;;  %v7292_v6 = vpop.f32.mrf.mxu1 }
 0x3a2   :  { %v7328_v7 = vpop.f32.mrf.mxu0  ;;  %v7368_v8 = vpop.f32.mrf.mxu1 }
 0x3a3   :  { %v7329_v28 = vadd.f32 %v7328_v7, %v7289_v27 }
 0x3a4   :  { %v7330_v9 = vpop.f32.mrf.mxu0  ;;  %v7370_v10 = vpop.f32.mrf.mxu1 }
 0x3a5   :  { %v7369_v32 = vadd.f32 %v7368_v8, %v7329_v28 }
 0x3a6   :  { %v7331_v12 = vpop.f32.mrf.mxu0  ;;  %v7371_v13 = vpop.f32.mrf.mxu1 }
 0x3a8   :  { %v7332_v14 = vpop.f32.mrf.mxu0  ;;  %v7372_v15 = vpop.f32.mrf.mxu1 }
 0x3b2   :  { %v7408_v16 = vpop.f32.mrf.mxu0  ;;  %v7448_v17 = vpop.f32.mrf.mxu1 }
 0x3b3   :  { %v7409_v35 = vadd.f32 %v7408_v16, %v7369_v32 }
 0x3b4   :  { %v7410_v18 = vpop.f32.mrf.mxu0  ;;  %v7450_v19 = vpop.f32.mrf.mxu1 }
 0x3b5   :  { %v7449_v38 = vadd.f32 %v7448_v17, %v7409_v35 }
 0x3b6   :  { %v7411_v21 = vpop.f32.mrf.mxu0  ;;  %v7451_v22 = vpop.f32.mrf.mxu1 }
 0x3b8   :  { %v7412_v23 = vpop.f32.mrf.mxu0  ;;  %v7452_v24 = vpop.f32.mrf.mxu1 }
 0x3c2   :  { %v7488_v29 = vpop.f32.mrf.mxu0  ;;  %v7528_v30 = vpop.f32.mrf.mxu1 }
 0x3c3   :  { %v7489_v39 = vadd.f32 %v7488_v29, %v7449_v38 }
 0x3c4   :  { %v7490_v31 = vpop.f32.mrf.mxu0  ;;  %v7530_v11 = vpop.f32.mrf.mxu1 }
 0x3c5   :  { %v7529_v40 = vadd.f32 %v7528_v30, %v7489_v39 }
 0x3c6   :  { %v7491_v33 = vpop.f32.mrf.mxu0  ;;  %v7531_v34 = vpop.f32.mrf.mxu1 }
 0x3c8   :  { %v7492_v36 = vpop.f32.mrf.mxu0  ;;  %v7532_v37 = vpop.f32.mrf.mxu1 }
 0x3d2   :  { %v7568_v41 = vpop.f32.mrf.mxu0  ;;  %v7608_v42 = vpop.f32.mrf.mxu1 }
 0x3d3   :  { %v7569_v43 = vadd.f32 %v7568_v41, %v7529_v40 }
 0x3d4   :  { %v7570_v44 = vpop.f32.mrf.mxu0  ;;  %v7610_v45 = vpop.f32.mrf.mxu1 }
 0x3d5   :  { %v7609_v47 = vadd.f32 %v7608_v42, %v7569_v43 }
 0x3d6   :  { %v7571_v48 = vpop.f32.mrf.mxu0  ;;  %v7611_v49 = vpop.f32.mrf.mxu1 }
 0x3d7   :  { %v7621_v50 = vmul.f32 %v8033_v46, %v7609_v47 }
 0x3d8   :  { %v7572_v51 = vpop.f32.mrf.mxu0  ;;  %v7612_v52 = vpop.f32.mrf.mxu1 }
 0x3d9   :  { %v7623_v53 = vsel %vm7622_vm0, %v7621_v50, 0.0 }
 0x3da   :  { %7624 = vadd.xlane.f32.xlu0 %v7623_v53 }
 0x463   :  { %v7625_v55 = vpop.xlane.xlu0 %7624 }
 0x464   :  { %v7628_v56 = vadd.f32 %v7627_v54, %v7625_v55 }
 0x466   :  { %v8034_v57 = vmul.f32 -1.442695, %v7628_v56 }
 0x468   :  { %8673 = vpow2.f32 %v8034_v57 }
 0x475   :  { %v8674_v58 = vpop.eup %8673 }
 0x476   :  { %v7632_v59 = vadd.f32 1.0, %v8674_v58 }
 0x478   :  { %8675 = vrcp.f32 %v7632_v59 }
 0x485   :  { %v8676_v60 = vpop.eup %8675 }
 0x486   :  { %7636 = vst.msk [vmem:[%s10139_s4] sm:$0x3] %vm7635_vm1, %v8676_v60 }

</bundles_post_ra>
